<compile_context>
chip_gen: v7x
topology: tpu7x:2x2x1
jax: 0.10.0
libtpu: 0.0.40
codegen_flags: <defaults>
</compile_context>

<pallas_src>
import functools

import jax
import jax.numpy as jnp
from jax import lax
from jax.experimental import pallas as pl
from jax.experimental.pallas import tpu as pltpu


# ---------------------------------------------------------------------------
# Fused whole-model kernel: grid=(num_layers,), activation resident in VMEM.
# ---------------------------------------------------------------------------
def _fused_bert_kernel(vl_ref,                                   # SMEM (B,) int32
                       x_ref,                                    # (B*S, D) bf16 embeddings
                       wqkv_ref, bqkv_ref, wo_ref, bo_ref,
                       ln1g_ref, ln1b_ref, w1_ref, b1_ref, w2_ref, b2_ref,
                       ln2g_ref, ln2b_ref,
                       wh_ref, bh_ref, wc_ref, bc_ref,           # classifier head
                       o_ref,                                    # (B, NPAD) f32 logits
                       x_scr,                                    # VMEM (B*S, D) bf16
                       *, batch, seq, num_heads, num_layers, eps):
    l = pl.program_id(0)
    BS, D = x_scr.shape
    H = num_heads
    Dh = D // H
    scale = 1.0 / (Dh ** 0.5)

    # ---- layer 0: pull the embeddings into the resident activation ----
    @pl.when(l == 0)
    def _():
        x_scr[...] = x_ref[...]

    x = x_scr[...]                                               # (BS, D) bf16

    # ---- fused QKV projection: one MXU pass with a 3*D-wide RHS ----
    qkv = jnp.dot(x, wqkv_ref[0], preferred_element_type=jnp.float32)
    qkv = (qkv + bqkv_ref[0]).astype(jnp.bfloat16)               # (BS, 3D)
    q = qkv[:, :D]
    k = qkv[:, D:2 * D]
    v = qkv[:, 2 * D:]

    # ---- hoisted additive mask: block-diagonal over batch + valid_lens ----
    # (d2l masked_softmax fill = -1e6; cross-sequence keys also get -1e6,
    #  which contributes ~0 after exp, matching per-sequence softmax.)
    rb = lax.broadcasted_iota(jnp.int32, (BS, BS), 0)            # query row id
    cb = lax.broadcasted_iota(jnp.int32, (BS, BS), 1)            # key   col id
    neg = jnp.full((BS, BS), -1e6, jnp.float32)
    for b in range(batch):                                       # static, B small
        lo, hi = b * seq, (b + 1) * seq
        in_seq = (rb >= lo) & (rb < hi) & (cb >= lo) & (cb < hi)
        visible = in_seq & (cb < lo + vl_ref[b])                 # key_pos < valid_len
        neg = jnp.where(visible, 0.0, neg)

    # ---- multi-head attention with per-head accumulation into W_o ----
    # TODO(synk): for long sequences, tile S with an online-softmax (flash)
    # loop instead of materializing the full (BS, BS) score block per head.
    wo = wo_ref[0]                                               # (D, D) bf16
    proj = jnp.zeros((BS, D), jnp.float32)
    for h in range(H):                                           # static unroll, H=4
        qh = q[:, h * Dh:(h + 1) * Dh]
        kh = k[:, h * Dh:(h + 1) * Dh]
        vh = v[:, h * Dh:(h + 1) * Dh]
        s = jnp.dot(qh, kh.T, preferred_element_type=jnp.float32) * scale + neg
        m = jnp.max(s, axis=-1, keepdims=True)
        e = jnp.exp(s - m)
        p = e * pl.reciprocal(jnp.sum(e, axis=-1, keepdims=True), approx=True)
        ctx = jnp.dot(p.astype(jnp.bfloat16), vh,
                      preferred_element_type=jnp.float32)        # (BS, Dh)
        # accumulate output projection per head (row-slice of W_o, no concat)
        proj = proj + jnp.dot(ctx.astype(jnp.bfloat16), wo[h * Dh:(h + 1) * Dh, :],
                              preferred_element_type=jnp.float32)
    proj = proj + bo_ref[0]

    # ---- AddNorm1 (f32 statistics) ----
    z1 = x.astype(jnp.float32) + proj
    mu1 = jnp.mean(z1, axis=-1, keepdims=True)
    var1 = jnp.mean((z1 - mu1) ** 2, axis=-1, keepdims=True)
    y = (z1 - mu1) * lax.rsqrt(var1 + eps) * ln1g_ref[0] + ln1b_ref[0]
    y_bf = y.astype(jnp.bfloat16)

    # ---- position-wise FFN (intermediate stays on-chip) ----
    f = jnp.dot(y_bf, w1_ref[0], preferred_element_type=jnp.float32) + b1_ref[0]
    f = jnp.maximum(f, 0.0).astype(jnp.bfloat16)                 # (BS, F)
    f = jnp.dot(f, w2_ref[0], preferred_element_type=jnp.float32) + b2_ref[0]

    # ---- AddNorm2 ----
    z2 = y + f
    mu2 = jnp.mean(z2, axis=-1, keepdims=True)
    var2 = jnp.mean((z2 - mu2) ** 2, axis=-1, keepdims=True)
    out = (z2 - mu2) * lax.rsqrt(var2 + eps) * ln2g_ref[0] + ln2b_ref[0]  # (BS, D) f32

    x_scr[...] = out.astype(jnp.bfloat16)                        # feed next layer

    # ---- classifier head on the last layer's CLS rows (fused, no extra call) ----
    @pl.when(l == num_layers - 1)
    def _():
        cls = jnp.concatenate([out[b * seq:b * seq + 1, :] for b in range(batch)],
                              axis=0).astype(jnp.bfloat16)       # (B, D)
        h1 = jnp.dot(cls, wh_ref[...], preferred_element_type=jnp.float32) + bh_ref[...]
        h1 = jnp.tanh(h1).astype(jnp.bfloat16)                   # tanh in f32
        o_ref[...] = (jnp.dot(h1, wc_ref[...], preferred_element_type=jnp.float32)
                      + bc_ref[...])                             # lane-padded logits


# ---------------------------------------------------------------------------
# Forward pass (BERTClassifier.forward) — single pallas_call
# ---------------------------------------------------------------------------
def bert_classifier_forward(params, tokens, segments, valid_lens, num_heads):
    B, S = tokens.shape
    D = params["tok_emb"].shape[1]
    L, _, threeD = params["w_qkv"].shape
    F = params["w_ffn1"].shape[2]
    NPAD = params["out_w_pad"].shape[1]
    BS = B * S

    # BERTEncoder embeddings (gather glue in plain JAX); tables are bf16 so the
    # sum is emitted directly in bf16 (no f32 (B,S,D) round-trip).
    x = (params["tok_emb"][tokens] + params["seg_emb"][segments]
         + params["pos_emb"][None, :S, :]).reshape(BS, D)
    vl = valid_lens.astype(jnp.int32)

    lmap = lambda l, vl: (l, 0, 0)     # per-layer stacked weights
    cmap = lambda l, vl: (0, 0)        # constant (DMA'd once, resident)

    grid_spec = pltpu.PrefetchScalarGridSpec(
        num_scalar_prefetch=1,
        grid=(L,),
        in_specs=[
            pl.BlockSpec((BS, D), cmap),              # x (embeddings)
            pl.BlockSpec((1, D, threeD), lmap),       # w_qkv
            pl.BlockSpec((1, 1, threeD), lmap),       # b_qkv
            pl.BlockSpec((1, D, D), lmap),            # wo
            pl.BlockSpec((1, 1, D), lmap),            # bo
            pl.BlockSpec((1, 1, D), lmap),            # ln1 gamma
            pl.BlockSpec((1, 1, D), lmap),            # ln1 beta
            pl.BlockSpec((1, D, F), lmap),            # w_ffn1
            pl.BlockSpec((1, 1, F), lmap),            # b_ffn1
            pl.BlockSpec((1, F, D), lmap),            # w_ffn2
            pl.BlockSpec((1, 1, D), lmap),            # b_ffn2
            pl.BlockSpec((1, 1, D), lmap),            # ln2 gamma
            pl.BlockSpec((1, 1, D), lmap),            # ln2 beta
            pl.BlockSpec((D, 256), cmap),             # hidden_w
            pl.BlockSpec((1, 256), cmap),             # hidden_b
            pl.BlockSpec((256, NPAD), cmap),          # out_w (lane-padded)
            pl.BlockSpec((1, NPAD), cmap),            # out_b (lane-padded)
        ],
        out_specs=pl.BlockSpec((B, NPAD), cmap),
        scratch_shapes=[pltpu.VMEM((BS, D), jnp.bfloat16)],       # resident activation
    )
    # TODO(synk): at larger batch, add a leading "parallel" grid axis over
    # batch chunks (TB*S >= 128/256 rows) so v7x's two TensorCores are both
    # used; and set vmem_limit_bytes / tile FFN along F when scaling D, F, S.
    logits_pad = pl.pallas_call(
        functools.partial(_fused_bert_kernel, batch=B, seq=S, num_heads=num_heads,
                          num_layers=L, eps=1e-5),
        out_shape=jax.ShapeDtypeStruct((B, NPAD), jnp.float32),
        grid_spec=grid_spec,
        compiler_params=pltpu.CompilerParams(
            dimension_semantics=("arbitrary",)),
    )(vl, x,
      params["w_qkv"], params["b_qkv"], params["wo"], params["bo"],
      params["ln1_g"], params["ln1_b"],
      params["w_ffn1"], params["b_ffn1"], params["w_ffn2"], params["b_ffn2"],
      params["ln2_g"], params["ln2_b"],
      params["hidden_w"], params["hidden_b"],
      params["out_w_pad"], params["out_b_pad"])
    return logits_pad[:, :params["num_classes"]]


# ---------------------------------------------------------------------------
# Parameters (deterministic synthetic init; stacked / fused / cast for kernel)
# ---------------------------------------------------------------------------
def init_params(key, vocab_size, num_hiddens, ffn_num_hiddens, num_heads,
                num_layers, max_len, num_classes):
    D, F = num_hiddens, ffn_num_hiddens

    def dense(k, fan_in, fan_out):
        kw, kb = jax.random.split(k)
        lim = 1.0 / (fan_in ** 0.5)
        w = jax.random.uniform(kw, (fan_in, fan_out), jnp.float32, -lim, lim)
        b = jax.random.uniform(kb, (fan_out,), jnp.float32, -lim, lim)
        return w, b

    keys = jax.random.split(key, 5 + num_layers)
    params = {
        # bf16 embedding tables -> embedding sum emitted directly in bf16
        "tok_emb": (0.02 * jax.random.normal(keys[0], (vocab_size, D))).astype(jnp.bfloat16),
        "seg_emb": (0.02 * jax.random.normal(keys[1], (2, D))).astype(jnp.bfloat16),
        "pos_emb": (0.02 * jax.random.normal(keys[2], (max_len, D))).astype(jnp.bfloat16),
        "num_classes": num_classes,
    }

    w_qkv, b_qkv, wo_l, bo_l = [], [], [], []
    ln1g, ln1b, ln2g, ln2b = [], [], [], []
    w1_l, b1_l, w2_l, b2_l = [], [], [], []
    for l in range(num_layers):
        ks = jax.random.split(keys[3 + l], 6)
        wq, bq = dense(ks[0], D, D)
        wk, bk = dense(ks[1], D, D)
        wv, bv = dense(ks[2], D, D)
        wo, bo = dense(ks[3], D, D)
        w1, b1 = dense(ks[4], D, F)
        w2, b2 = dense(ks[5], F, D)
        w_qkv.append(jnp.concatenate([wq, wk, wv], axis=1).astype(jnp.bfloat16))
        b_qkv.append(jnp.concatenate([bq, bk, bv]).reshape(1, 3 * D))
        wo_l.append(wo.astype(jnp.bfloat16)); bo_l.append(bo.reshape(1, D))
        ln1g.append(jnp.ones((1, D), jnp.float32)); ln1b.append(jnp.zeros((1, D), jnp.float32))
        w1_l.append(w1.astype(jnp.bfloat16)); b1_l.append(b1.reshape(1, F))
        w2_l.append(w2.astype(jnp.bfloat16)); b2_l.append(b2.reshape(1, D))
        ln2g.append(jnp.ones((1, D), jnp.float32)); ln2b.append(jnp.zeros((1, D), jnp.float32))

    # stacked along a leading layer axis -> streamed per grid step
    params["w_qkv"] = jnp.stack(w_qkv);  params["b_qkv"] = jnp.stack(b_qkv)
    params["wo"] = jnp.stack(wo_l);      params["bo"] = jnp.stack(bo_l)
    params["ln1_g"] = jnp.stack(ln1g);   params["ln1_b"] = jnp.stack(ln1b)
    params["w_ffn1"] = jnp.stack(w1_l);  params["b_ffn1"] = jnp.stack(b1_l)
    params["w_ffn2"] = jnp.stack(w2_l);  params["b_ffn2"] = jnp.stack(b2_l)
    params["ln2_g"] = jnp.stack(ln2g);   params["ln2_b"] = jnp.stack(ln2b)

    wh, bh = dense(keys[3 + num_layers], D, 256)            # bert.hidden: Linear(D,256)+Tanh
    wc, bc = dense(keys[4 + num_layers], 256, num_classes)  # self.output: Linear(256,3)
    params["hidden_w"] = wh.astype(jnp.bfloat16)
    params["hidden_b"] = bh.reshape(1, 256)
    # pad the 3-wide classifier output to 128 lanes (lane-dense stores)
    npad = 128
    params["out_w_pad"] = jnp.zeros((256, npad), jnp.float32).at[:, :num_classes] \
        .set(wc).astype(jnp.bfloat16)
    params["out_b_pad"] = jnp.zeros((1, npad), jnp.float32).at[:, :num_classes].set(bc)
    return params


# ---------------------------------------------------------------------------
if __name__ == "__main__":
    vocab_size, num_hiddens, ffn_num_hiddens = 128, 256, 512
    num_heads, num_layers, max_len, num_classes = 4, 2, 64, 3
    B, S = 2, 8

    root = jax.random.PRNGKey(0)
    kp, kt = jax.random.split(root, 2)
    params = init_params(kp, vocab_size, num_hiddens, ffn_num_hiddens,
                         num_heads, num_layers, max_len, num_classes)

    tokens = jax.random.randint(kt, (B, S), 0, vocab_size, dtype=jnp.int32)
    segments = jnp.concatenate(
        [jnp.zeros((B, S // 2), jnp.int32), jnp.ones((B, S // 2), jnp.int32)], axis=1)
    valid_lens = jnp.array([5, 8], dtype=jnp.int32)

    logits = bert_classifier_forward(params, tokens, segments, valid_lens, num_heads)
    logits = jax.block_until_ready(logits)
    assert logits.shape == (B, num_classes)
    assert bool(jnp.all(jnp.isfinite(logits)))
    print("KERNEL_OK")
</pallas_src>

<mosaic_0001>
module attributes {stable_mosaic.version = 11 : i64} {
  func.func @_fused_bert_kernel(%arg0: i32, %arg1: memref<2xi32, #tpu.memory_space<smem>>, %arg2: memref<16x256xbf16, #tpu.memory_space<vmem>>, %arg3: memref<1x256x768xbf16, #tpu.memory_space<vmem>>, %arg4: memref<1x1x768xf32, #tpu.memory_space<vmem>>, %arg5: memref<1x256x256xbf16, #tpu.memory_space<vmem>>, %arg6: memref<1x1x256xf32, #tpu.memory_space<vmem>>, %arg7: memref<1x1x256xf32, #tpu.memory_space<vmem>>, %arg8: memref<1x1x256xf32, #tpu.memory_space<vmem>>, %arg9: memref<1x256x512xbf16, #tpu.memory_space<vmem>>, %arg10: memref<1x1x512xf32, #tpu.memory_space<vmem>>, %arg11: memref<1x512x256xbf16, #tpu.memory_space<vmem>>, %arg12: memref<1x1x256xf32, #tpu.memory_space<vmem>>, %arg13: memref<1x1x256xf32, #tpu.memory_space<vmem>>, %arg14: memref<1x1x256xf32, #tpu.memory_space<vmem>>, %arg15: memref<256x256xbf16, #tpu.memory_space<vmem>>, %arg16: memref<1x256xf32, #tpu.memory_space<vmem>>, %arg17: memref<256x128xbf16, #tpu.memory_space<vmem>>, %arg18: memref<1x128xf32, #tpu.memory_space<vmem>>, %arg19: memref<2x128xf32, #tpu.memory_space<vmem>>, %arg20: memref<16x256xbf16, #tpu.memory_space<vmem>>) attributes {dimension_semantics = [#tpu.dimension_semantics<arbitrary>], iteration_bounds = array<i64: 2>, scalar_prefetch = 1 : i64, scratch_operands = 1 : i64, tpu.core_type = #tpu.core_type<tc>, window_params = [{pipeline_mode = #tpu.pipeline_mode<synchronous>, transform_indices = @transform_0, window_bounds = array<i64: 16, 256>}, {transform_indices = @transform_1, window_bounds = array<i64: 1, 256, 768>}, {transform_indices = @transform_2, window_bounds = array<i64: 1, 1, 768>}, {transform_indices = @transform_3, window_bounds = array<i64: 1, 256, 256>}, {transform_indices = @transform_4, window_bounds = array<i64: 1, 1, 256>}, {transform_indices = @transform_5, window_bounds = array<i64: 1, 1, 256>}, {transform_indices = @transform_6, window_bounds = array<i64: 1, 1, 256>}, {transform_indices = @transform_7, window_bounds = array<i64: 1, 256, 512>}, {transform_indices = @transform_8, window_bounds = array<i64: 1, 1, 512>}, {transform_indices = @transform_9, window_bounds = array<i64: 1, 512, 256>}, {transform_indices = @transform_10, window_bounds = array<i64: 1, 1, 256>}, {transform_indices = @transform_11, window_bounds = array<i64: 1, 1, 256>}, {transform_indices = @transform_12, window_bounds = array<i64: 1, 1, 256>}, {pipeline_mode = #tpu.pipeline_mode<synchronous>, transform_indices = @transform_13, window_bounds = array<i64: 256, 256>}, {pipeline_mode = #tpu.pipeline_mode<synchronous>, transform_indices = @transform_14, window_bounds = array<i64: 1, 256>}, {pipeline_mode = #tpu.pipeline_mode<synchronous>, transform_indices = @transform_15, window_bounds = array<i64: 256, 128>}, {pipeline_mode = #tpu.pipeline_mode<synchronous>, transform_indices = @transform_16, window_bounds = array<i64: 1, 128>}, {pipeline_mode = #tpu.pipeline_mode<synchronous>, transform_indices = @transform_17, window_bounds = array<i64: 2, 128>}]} {
    %c0_i32 = arith.constant 0 : i32
    %0 = arith.cmpi eq, %arg0, %c0_i32 : i32
    %1 = arith.extui %0 : i1 to i32
    %c0_i32_0 = arith.constant 0 : i32
    %2 = arith.cmpi ne, %1, %c0_i32_0 : i32
    scf.if %2 {
      %c0_91 = arith.constant 0 : index
      %c0_92 = arith.constant 0 : index
      %235 = vector.load %arg2[%c0_91, %c0_92] : memref<16x256xbf16, #tpu.memory_space<vmem>>, vector<16x256xbf16>
      %c0_93 = arith.constant 0 : index
      %c0_94 = arith.constant 0 : index
      %236 = vector.load %arg20[%c0_93, %c0_94] : memref<16x256xbf16, #tpu.memory_space<vmem>>, vector<16x256xbf16>
      tpu.vector_store %arg20[%c0_93, %c0_94], %235 {strides = array<i32>} : memref<16x256xbf16, #tpu.memory_space<vmem>>, vector<16x256xbf16>,
    } else {
    }
    %c0 = arith.constant 0 : index
    %c0_1 = arith.constant 0 : index
    %3 = vector.load %arg20[%c0, %c0_1] : memref<16x256xbf16, #tpu.memory_space<vmem>>, vector<16x256xbf16>
    %c0_2 = arith.constant 0 : index
    %c0_3 = arith.constant 0 : index
    %c0_4 = arith.constant 0 : index
    %4 = vector.load %arg3[%c0_2, %c0_3, %c0_4] : memref<1x256x768xbf16, #tpu.memory_space<vmem>>, vector<1x256x768xbf16>
    %5 = vector.shape_cast %4 : vector<1x256x768xbf16> to vector<256x768xbf16>
    %cst = arith.constant dense<0.000000e+00> : vector<16x768xf32>
    %6 = tpu.matmul %3, %5, %cst {dimension_numbers = #tpu.dot_dimension_numbers<[1], [0], [0], [1], [0, 0, 1, 1], [], []>} : vector<16x256xbf16>, vector<256x768xbf16>, vector<16x768xf32> -> vector<16x768xf32>
    %c0_5 = arith.constant 0 : index
    %c0_6 = arith.constant 0 : index
    %c0_7 = arith.constant 0 : index
    %7 = vector.load %arg4[%c0_5, %c0_6, %c0_7] : memref<1x1x768xf32, #tpu.memory_space<vmem>>, vector<1x1x768xf32>
    %8 = vector.shape_cast %7 : vector<1x1x768xf32> to vector<1x768xf32>
    %9 = vector.broadcast %8 : vector<1x768xf32> to vector<16x768xf32>
    %10 = arith.addf %6, %9 : vector<16x768xf32>
    %11 = arith.truncf %10 : vector<16x768xf32> to vector<16x768xbf16>
    %12 = vector.extract_strided_slice %11 {offsets = [0, 0], sizes = [16, 256], strides = [1, 1]} : vector<16x768xbf16> to vector<16x256xbf16>
    %13 = vector.extract_strided_slice %11 {offsets = [0, 256], sizes = [16, 256], strides = [1, 1]} : vector<16x768xbf16> to vector<16x256xbf16>
    %14 = vector.extract_strided_slice %11 {offsets = [0, 512], sizes = [16, 256], strides = [1, 1]} : vector<16x768xbf16> to vector<16x256xbf16>
    %15 = tpu.iota {dimensions = array<i32: 0>} : vector<16x16xi32>
    %16 = tpu.iota {dimensions = array<i32: 1>} : vector<16x16xi32>
    %cst_8 = arith.constant -1.000000e+06 : f32
    %17 = vector.broadcast %cst_8 : f32 to vector<16x16xf32>
    %c0_i32_9 = arith.constant 0 : i32
    %18 = vector.broadcast %c0_i32_9 : i32 to vector<16x16xi32>
    %19 = arith.cmpi sge, %15, %18 : vector<16x16xi32>
    %c8_i32 = arith.constant 8 : i32
    %20 = vector.broadcast %c8_i32 : i32 to vector<16x16xi32>
    %21 = arith.cmpi slt, %15, %20 : vector<16x16xi32>
    %22 = arith.andi %19, %21 : vector<16x16xi1>
    %c0_i32_10 = arith.constant 0 : i32
    %23 = vector.broadcast %c0_i32_10 : i32 to vector<16x16xi32>
    %24 = arith.cmpi sge, %16, %23 : vector<16x16xi32>
    %25 = arith.andi %22, %24 : vector<16x16xi1>
    %c8_i32_11 = arith.constant 8 : i32
    %26 = vector.broadcast %c8_i32_11 : i32 to vector<16x16xi32>
    %27 = arith.cmpi slt, %16, %26 : vector<16x16xi32>
    %28 = arith.andi %25, %27 : vector<16x16xi1>
    %c0_12 = arith.constant 0 : index
    %29 = memref.load %arg1[%c0_12] : memref<2xi32, #tpu.memory_space<smem>>
    %c0_i32_13 = arith.constant 0 : i32
    %30 = arith.addi %c0_i32_13, %29 : i32
    %31 = vector.broadcast %30 : i32 to vector<16x16xi32>
    %32 = arith.cmpi slt, %16, %31 : vector<16x16xi32>
    %33 = arith.andi %28, %32 : vector<16x16xi1>
    %cst_14 = arith.constant 0.000000e+00 : f32
    %34 = vector.broadcast %cst_14 : f32 to vector<16x16xf32>
    %35 = arith.select %33, %34, %17 : vector<16x16xi1>, vector<16x16xf32>
    %c8_i32_15 = arith.constant 8 : i32
    %36 = vector.broadcast %c8_i32_15 : i32 to vector<16x16xi32>
    %37 = arith.cmpi sge, %15, %36 : vector<16x16xi32>
    %c16_i32 = arith.constant 16 : i32
    %38 = vector.broadcast %c16_i32 : i32 to vector<16x16xi32>
    %39 = arith.cmpi slt, %15, %38 : vector<16x16xi32>
    %40 = arith.andi %37, %39 : vector<16x16xi1>
    %c8_i32_16 = arith.constant 8 : i32
    %41 = vector.broadcast %c8_i32_16 : i32 to vector<16x16xi32>
    %42 = arith.cmpi sge, %16, %41 : vector<16x16xi32>
    %43 = arith.andi %40, %42 : vector<16x16xi1>
    %c16_i32_17 = arith.constant 16 : i32
    %44 = vector.broadcast %c16_i32_17 : i32 to vector<16x16xi32>
    %45 = arith.cmpi slt, %16, %44 : vector<16x16xi32>
    %46 = arith.andi %43, %45 : vector<16x16xi1>
    %c1 = arith.constant 1 : index
    %47 = memref.load %arg1[%c1] : memref<2xi32, #tpu.memory_space<smem>>
    %c8_i32_18 = arith.constant 8 : i32
    %48 = arith.addi %c8_i32_18, %47 : i32
    %49 = vector.broadcast %48 : i32 to vector<16x16xi32>
    %50 = arith.cmpi slt, %16, %49 : vector<16x16xi32>
    %51 = arith.andi %46, %50 : vector<16x16xi1>
    %cst_19 = arith.constant 0.000000e+00 : f32
    %52 = vector.broadcast %cst_19 : f32 to vector<16x16xf32>
    %53 = arith.select %51, %52, %35 : vector<16x16xi1>, vector<16x16xf32>
    %c0_20 = arith.constant 0 : index
    %c0_21 = arith.constant 0 : index
    %c0_22 = arith.constant 0 : index
    %54 = vector.load %arg5[%c0_20, %c0_21, %c0_22] : memref<1x256x256xbf16, #tpu.memory_space<vmem>>, vector<1x256x256xbf16>
    %55 = vector.shape_cast %54 : vector<1x256x256xbf16> to vector<256x256xbf16>
    %cst_23 = arith.constant 0.000000e+00 : f32
    %56 = vector.broadcast %cst_23 : f32 to vector<16x256xf32>
    %57 = vector.extract_strided_slice %12 {offsets = [0, 0], sizes = [16, 64], strides = [1, 1]} : vector<16x256xbf16> to vector<16x64xbf16>
    %58 = vector.extract_strided_slice %13 {offsets = [0, 0], sizes = [16, 64], strides = [1, 1]} : vector<16x256xbf16> to vector<16x64xbf16>
    %59 = vector.extract_strided_slice %14 {offsets = [0, 0], sizes = [16, 64], strides = [1, 1]} : vector<16x256xbf16> to vector<16x64xbf16>
    %60 = tpu.transpose %58, [1, 0] : vector<16x64xbf16> -> vector<64x16xbf16>
    %cst_24 = arith.constant dense<0.000000e+00> : vector<16x16xf32>
    %61 = tpu.matmul %57, %60, %cst_24 {dimension_numbers = #tpu.dot_dimension_numbers<[1], [0], [0], [1], [0, 0, 1, 1], [], []>} : vector<16x64xbf16>, vector<64x16xbf16>, vector<16x16xf32> -> vector<16x16xf32>
    %cst_25 = arith.constant 1.250000e-01 : f32
    %62 = vector.broadcast %cst_25 : f32 to vector<16x16xf32>
    %63 = arith.mulf %61, %62 : vector<16x16xf32>
    %64 = arith.addf %63, %53 : vector<16x16xf32>
    %cst_26 = arith.constant dense<0xFF800000> : vector<16xf32>
    %65 = vector.multi_reduction <maximumf>, %64, %cst_26 [1] : vector<16x16xf32> to vector<16xf32>
    %66 = vector.shape_cast %65 : vector<16xf32> to vector<16x1xf32>
    %67 = vector.broadcast %66 : vector<16x1xf32> to vector<16x16xf32>
    %68 = arith.subf %64, %67 : vector<16x16xf32>
    %69 = math.exp %68 : vector<16x16xf32>
    %cst_27 = arith.constant dense<0.000000e+00> : vector<16xf32>
    %70 = vector.multi_reduction <add>, %69, %cst_27 [1] : vector<16x16xf32> to vector<16xf32>
    %71 = vector.shape_cast %70 : vector<16xf32> to vector<16x1xf32>
    %72 = tpu.reciprocal %71 {approx = true} : vector<16x1xf32> -> vector<16x1xf32>
    %73 = vector.broadcast %72 : vector<16x1xf32> to vector<16x16xf32>
    %74 = arith.mulf %69, %73 : vector<16x16xf32>
    %75 = arith.truncf %74 : vector<16x16xf32> to vector<16x16xbf16>
    %cst_28 = arith.constant dense<0.000000e+00> : vector<16x64xf32>
    %76 = tpu.matmul %75, %59, %cst_28 {dimension_numbers = #tpu.dot_dimension_numbers<[1], [0], [0], [1], [0, 0, 1, 1], [], []>} : vector<16x16xbf16>, vector<16x64xbf16>, vector<16x64xf32> -> vector<16x64xf32>
    %77 = arith.truncf %76 : vector<16x64xf32> to vector<16x64xbf16>
    %78 = vector.extract_strided_slice %55 {offsets = [0, 0], sizes = [64, 256], strides = [1, 1]} : vector<256x256xbf16> to vector<64x256xbf16>
    %cst_29 = arith.constant dense<0.000000e+00> : vector<16x256xf32>
    %79 = tpu.matmul %77, %78, %cst_29 {dimension_numbers = #tpu.dot_dimension_numbers<[1], [0], [0], [1], [0, 0, 1, 1], [], []>} : vector<16x64xbf16>, vector<64x256xbf16>, vector<16x256xf32> -> vector<16x256xf32>
    %80 = arith.addf %56, %79 : vector<16x256xf32>
    %81 = vector.extract_strided_slice %12 {offsets = [0, 64], sizes = [16, 64], strides = [1, 1]} : vector<16x256xbf16> to vector<16x64xbf16>
    %82 = vector.extract_strided_slice %13 {offsets = [0, 64], sizes = [16, 64], strides = [1, 1]} : vector<16x256xbf16> to vector<16x64xbf16>
    %83 = vector.extract_strided_slice %14 {offsets = [0, 64], sizes = [16, 64], strides = [1, 1]} : vector<16x256xbf16> to vector<16x64xbf16>
    %84 = tpu.transpose %82, [1, 0] : vector<16x64xbf16> -> vector<64x16xbf16>
    %cst_30 = arith.constant dense<0.000000e+00> : vector<16x16xf32>
    %85 = tpu.matmul %81, %84, %cst_30 {dimension_numbers = #tpu.dot_dimension_numbers<[1], [0], [0], [1], [0, 0, 1, 1], [], []>} : vector<16x64xbf16>, vector<64x16xbf16>, vector<16x16xf32> -> vector<16x16xf32>
    %cst_31 = arith.constant 1.250000e-01 : f32
    %86 = vector.broadcast %cst_31 : f32 to vector<16x16xf32>
    %87 = arith.mulf %85, %86 : vector<16x16xf32>
    %88 = arith.addf %87, %53 : vector<16x16xf32>
    %cst_32 = arith.constant dense<0xFF800000> : vector<16xf32>
    %89 = vector.multi_reduction <maximumf>, %88, %cst_32 [1] : vector<16x16xf32> to vector<16xf32>
    %90 = vector.shape_cast %89 : vector<16xf32> to vector<16x1xf32>
    %91 = vector.broadcast %90 : vector<16x1xf32> to vector<16x16xf32>
    %92 = arith.subf %88, %91 : vector<16x16xf32>
    %93 = math.exp %92 : vector<16x16xf32>
    %cst_33 = arith.constant dense<0.000000e+00> : vector<16xf32>
    %94 = vector.multi_reduction <add>, %93, %cst_33 [1] : vector<16x16xf32> to vector<16xf32>
    %95 = vector.shape_cast %94 : vector<16xf32> to vector<16x1xf32>
    %96 = tpu.reciprocal %95 {approx = true} : vector<16x1xf32> -> vector<16x1xf32>
    %97 = vector.broadcast %96 : vector<16x1xf32> to vector<16x16xf32>
    %98 = arith.mulf %93, %97 : vector<16x16xf32>
    %99 = arith.truncf %98 : vector<16x16xf32> to vector<16x16xbf16>
    %cst_34 = arith.constant dense<0.000000e+00> : vector<16x64xf32>
    %100 = tpu.matmul %99, %83, %cst_34 {dimension_numbers = #tpu.dot_dimension_numbers<[1], [0], [0], [1], [0, 0, 1, 1], [], []>} : vector<16x16xbf16>, vector<16x64xbf16>, vector<16x64xf32> -> vector<16x64xf32>
    %101 = arith.truncf %100 : vector<16x64xf32> to vector<16x64xbf16>
    %102 = vector.extract_strided_slice %55 {offsets = [64, 0], sizes = [64, 256], strides = [1, 1]} : vector<256x256xbf16> to vector<64x256xbf16>
    %cst_35 = arith.constant dense<0.000000e+00> : vector<16x256xf32>
    %103 = tpu.matmul %101, %102, %cst_35 {dimension_numbers = #tpu.dot_dimension_numbers<[1], [0], [0], [1], [0, 0, 1, 1], [], []>} : vector<16x64xbf16>, vector<64x256xbf16>, vector<16x256xf32> -> vector<16x256xf32>
    %104 = arith.addf %80, %103 : vector<16x256xf32>
    %105 = vector.extract_strided_slice %12 {offsets = [0, 128], sizes = [16, 64], strides = [1, 1]} : vector<16x256xbf16> to vector<16x64xbf16>
    %106 = vector.extract_strided_slice %13 {offsets = [0, 128], sizes = [16, 64], strides = [1, 1]} : vector<16x256xbf16> to vector<16x64xbf16>
    %107 = vector.extract_strided_slice %14 {offsets = [0, 128], sizes = [16, 64], strides = [1, 1]} : vector<16x256xbf16> to vector<16x64xbf16>
    %108 = tpu.transpose %106, [1, 0] : vector<16x64xbf16> -> vector<64x16xbf16>
    %cst_36 = arith.constant dense<0.000000e+00> : vector<16x16xf32>
    %109 = tpu.matmul %105, %108, %cst_36 {dimension_numbers = #tpu.dot_dimension_numbers<[1], [0], [0], [1], [0, 0, 1, 1], [], []>} : vector<16x64xbf16>, vector<64x16xbf16>, vector<16x16xf32> -> vector<16x16xf32>
    %cst_37 = arith.constant 1.250000e-01 : f32
    %110 = vector.broadcast %cst_37 : f32 to vector<16x16xf32>
    %111 = arith.mulf %109, %110 : vector<16x16xf32>
    %112 = arith.addf %111, %53 : vector<16x16xf32>
    %cst_38 = arith.constant dense<0xFF800000> : vector<16xf32>
    %113 = vector.multi_reduction <maximumf>, %112, %cst_38 [1] : vector<16x16xf32> to vector<16xf32>
    %114 = vector.shape_cast %113 : vector<16xf32> to vector<16x1xf32>
    %115 = vector.broadcast %114 : vector<16x1xf32> to vector<16x16xf32>
    %116 = arith.subf %112, %115 : vector<16x16xf32>
    %117 = math.exp %116 : vector<16x16xf32>
    %cst_39 = arith.constant dense<0.000000e+00> : vector<16xf32>
    %118 = vector.multi_reduction <add>, %117, %cst_39 [1] : vector<16x16xf32> to vector<16xf32>
    %119 = vector.shape_cast %118 : vector<16xf32> to vector<16x1xf32>
    %120 = tpu.reciprocal %119 {approx = true} : vector<16x1xf32> -> vector<16x1xf32>
    %121 = vector.broadcast %120 : vector<16x1xf32> to vector<16x16xf32>
    %122 = arith.mulf %117, %121 : vector<16x16xf32>
    %123 = arith.truncf %122 : vector<16x16xf32> to vector<16x16xbf16>
    %cst_40 = arith.constant dense<0.000000e+00> : vector<16x64xf32>
    %124 = tpu.matmul %123, %107, %cst_40 {dimension_numbers = #tpu.dot_dimension_numbers<[1], [0], [0], [1], [0, 0, 1, 1], [], []>} : vector<16x16xbf16>, vector<16x64xbf16>, vector<16x64xf32> -> vector<16x64xf32>
    %125 = arith.truncf %124 : vector<16x64xf32> to vector<16x64xbf16>
    %126 = vector.extract_strided_slice %55 {offsets = [128, 0], sizes = [64, 256], strides = [1, 1]} : vector<256x256xbf16> to vector<64x256xbf16>
    %cst_41 = arith.constant dense<0.000000e+00> : vector<16x256xf32>
    %127 = tpu.matmul %125, %126, %cst_41 {dimension_numbers = #tpu.dot_dimension_numbers<[1], [0], [0], [1], [0, 0, 1, 1], [], []>} : vector<16x64xbf16>, vector<64x256xbf16>, vector<16x256xf32> -> vector<16x256xf32>
    %128 = arith.addf %104, %127 : vector<16x256xf32>
    %129 = vector.extract_strided_slice %12 {offsets = [0, 192], sizes = [16, 64], strides = [1, 1]} : vector<16x256xbf16> to vector<16x64xbf16>
    %130 = vector.extract_strided_slice %13 {offsets = [0, 192], sizes = [16, 64], strides = [1, 1]} : vector<16x256xbf16> to vector<16x64xbf16>
    %131 = vector.extract_strided_slice %14 {offsets = [0, 192], sizes = [16, 64], strides = [1, 1]} : vector<16x256xbf16> to vector<16x64xbf16>
    %132 = tpu.transpose %130, [1, 0] : vector<16x64xbf16> -> vector<64x16xbf16>
    %cst_42 = arith.constant dense<0.000000e+00> : vector<16x16xf32>
    %133 = tpu.matmul %129, %132, %cst_42 {dimension_numbers = #tpu.dot_dimension_numbers<[1], [0], [0], [1], [0, 0, 1, 1], [], []>} : vector<16x64xbf16>, vector<64x16xbf16>, vector<16x16xf32> -> vector<16x16xf32>
    %cst_43 = arith.constant 1.250000e-01 : f32
    %134 = vector.broadcast %cst_43 : f32 to vector<16x16xf32>
    %135 = arith.mulf %133, %134 : vector<16x16xf32>
    %136 = arith.addf %135, %53 : vector<16x16xf32>
    %cst_44 = arith.constant dense<0xFF800000> : vector<16xf32>
    %137 = vector.multi_reduction <maximumf>, %136, %cst_44 [1] : vector<16x16xf32> to vector<16xf32>
    %138 = vector.shape_cast %137 : vector<16xf32> to vector<16x1xf32>
    %139 = vector.broadcast %138 : vector<16x1xf32> to vector<16x16xf32>
    %140 = arith.subf %136, %139 : vector<16x16xf32>
    %141 = math.exp %140 : vector<16x16xf32>
    %cst_45 = arith.constant dense<0.000000e+00> : vector<16xf32>
    %142 = vector.multi_reduction <add>, %141, %cst_45 [1] : vector<16x16xf32> to vector<16xf32>
    %143 = vector.shape_cast %142 : vector<16xf32> to vector<16x1xf32>
    %144 = tpu.reciprocal %143 {approx = true} : vector<16x1xf32> -> vector<16x1xf32>
    %145 = vector.broadcast %144 : vector<16x1xf32> to vector<16x16xf32>
    %146 = arith.mulf %141, %145 : vector<16x16xf32>
    %147 = arith.truncf %146 : vector<16x16xf32> to vector<16x16xbf16>
    %cst_46 = arith.constant dense<0.000000e+00> : vector<16x64xf32>
    %148 = tpu.matmul %147, %131, %cst_46 {dimension_numbers = #tpu.dot_dimension_numbers<[1], [0], [0], [1], [0, 0, 1, 1], [], []>} : vector<16x16xbf16>, vector<16x64xbf16>, vector<16x64xf32> -> vector<16x64xf32>
    %149 = arith.truncf %148 : vector<16x64xf32> to vector<16x64xbf16>
    %150 = vector.extract_strided_slice %55 {offsets = [192, 0], sizes = [64, 256], strides = [1, 1]} : vector<256x256xbf16> to vector<64x256xbf16>
    %cst_47 = arith.constant dense<0.000000e+00> : vector<16x256xf32>
    %151 = tpu.matmul %149, %150, %cst_47 {dimension_numbers = #tpu.dot_dimension_numbers<[1], [0], [0], [1], [0, 0, 1, 1], [], []>} : vector<16x64xbf16>, vector<64x256xbf16>, vector<16x256xf32> -> vector<16x256xf32>
    %152 = arith.addf %128, %151 : vector<16x256xf32>
    %c0_48 = arith.constant 0 : index
    %c0_49 = arith.constant 0 : index
    %c0_50 = arith.constant 0 : index
    %153 = vector.load %arg6[%c0_48, %c0_49, %c0_50] : memref<1x1x256xf32, #tpu.memory_space<vmem>>, vector<1x1x256xf32>
    %154 = vector.shape_cast %153 : vector<1x1x256xf32> to vector<1x256xf32>
    %155 = vector.broadcast %154 : vector<1x256xf32> to vector<16x256xf32>
    %156 = arith.addf %152, %155 : vector<16x256xf32>
    %157 = arith.extf %3 : vector<16x256xbf16> to vector<16x256xf32>
    %158 = arith.addf %157, %156 : vector<16x256xf32>
    %cst_51 = arith.constant dense<0.000000e+00> : vector<16xf32>
    %159 = vector.multi_reduction <add>, %158, %cst_51 [1] : vector<16x256xf32> to vector<16xf32>
    %160 = vector.shape_cast %159 : vector<16xf32> to vector<16x1xf32>
    %cst_52 = arith.constant 2.560000e+02 : f32
    %161 = vector.broadcast %cst_52 : f32 to vector<16x1xf32>
    %162 = arith.divf %160, %161 : vector<16x1xf32>
    %163 = vector.broadcast %162 : vector<16x1xf32> to vector<16x256xf32>
    %164 = arith.subf %158, %163 : vector<16x256xf32>
    %165 = arith.mulf %164, %164 : vector<16x256xf32>
    %cst_53 = arith.constant dense<0.000000e+00> : vector<16xf32>
    %166 = vector.multi_reduction <add>, %165, %cst_53 [1] : vector<16x256xf32> to vector<16xf32>
    %167 = vector.shape_cast %166 : vector<16xf32> to vector<16x1xf32>
    %cst_54 = arith.constant 2.560000e+02 : f32
    %168 = vector.broadcast %cst_54 : f32 to vector<16x1xf32>
    %169 = arith.divf %167, %168 : vector<16x1xf32>
    %170 = vector.broadcast %162 : vector<16x1xf32> to vector<16x256xf32>
    %171 = arith.subf %158, %170 : vector<16x256xf32>
    %cst_55 = arith.constant 9.99999974E-6 : f32
    %172 = vector.broadcast %cst_55 : f32 to vector<16x1xf32>
    %173 = arith.addf %169, %172 : vector<16x1xf32>
    %174 = math.rsqrt %173 : vector<16x1xf32>
    %175 = vector.broadcast %174 : vector<16x1xf32> to vector<16x256xf32>
    %176 = arith.mulf %171, %175 : vector<16x256xf32>
    %c0_56 = arith.constant 0 : index
    %c0_57 = arith.constant 0 : index
    %c0_58 = arith.constant 0 : index
    %177 = vector.load %arg7[%c0_56, %c0_57, %c0_58] : memref<1x1x256xf32, #tpu.memory_space<vmem>>, vector<1x1x256xf32>
    %178 = vector.shape_cast %177 : vector<1x1x256xf32> to vector<1x256xf32>
    %179 = vector.broadcast %178 : vector<1x256xf32> to vector<16x256xf32>
    %180 = arith.mulf %176, %179 : vector<16x256xf32>
    %c0_59 = arith.constant 0 : index
    %c0_60 = arith.constant 0 : index
    %c0_61 = arith.constant 0 : index
    %181 = vector.load %arg8[%c0_59, %c0_60, %c0_61] : memref<1x1x256xf32, #tpu.memory_space<vmem>>, vector<1x1x256xf32>
    %182 = vector.shape_cast %181 : vector<1x1x256xf32> to vector<1x256xf32>
    %183 = vector.broadcast %182 : vector<1x256xf32> to vector<16x256xf32>
    %184 = arith.addf %180, %183 : vector<16x256xf32>
    %185 = arith.truncf %184 : vector<16x256xf32> to vector<16x256xbf16>
    %c0_62 = arith.constant 0 : index
    %c0_63 = arith.constant 0 : index
    %c0_64 = arith.constant 0 : index
    %186 = vector.load %arg9[%c0_62, %c0_63, %c0_64] : memref<1x256x512xbf16, #tpu.memory_space<vmem>>, vector<1x256x512xbf16>
    %187 = vector.shape_cast %186 : vector<1x256x512xbf16> to vector<256x512xbf16>
    %cst_65 = arith.constant dense<0.000000e+00> : vector<16x512xf32>
    %188 = tpu.matmul %185, %187, %cst_65 {dimension_numbers = #tpu.dot_dimension_numbers<[1], [0], [0], [1], [0, 0, 1, 1], [], []>} : vector<16x256xbf16>, vector<256x512xbf16>, vector<16x512xf32> -> vector<16x512xf32>
    %c0_66 = arith.constant 0 : index
    %c0_67 = arith.constant 0 : index
    %c0_68 = arith.constant 0 : index
    %189 = vector.load %arg10[%c0_66, %c0_67, %c0_68] : memref<1x1x512xf32, #tpu.memory_space<vmem>>, vector<1x1x512xf32>
    %190 = vector.shape_cast %189 : vector<1x1x512xf32> to vector<1x512xf32>
    %191 = vector.broadcast %190 : vector<1x512xf32> to vector<16x512xf32>
    %192 = arith.addf %188, %191 : vector<16x512xf32>
    %cst_69 = arith.constant 0.000000e+00 : f32
    %193 = vector.broadcast %cst_69 : f32 to vector<16x512xf32>
    %194 = arith.maximumf %192, %193 : vector<16x512xf32>
    %195 = arith.truncf %194 : vector<16x512xf32> to vector<16x512xbf16>
    %c0_70 = arith.constant 0 : index
    %c0_71 = arith.constant 0 : index
    %c0_72 = arith.constant 0 : index
    %196 = vector.load %arg11[%c0_70, %c0_71, %c0_72] : memref<1x512x256xbf16, #tpu.memory_space<vmem>>, vector<1x512x256xbf16>
    %197 = vector.shape_cast %196 : vector<1x512x256xbf16> to vector<512x256xbf16>
    %cst_73 = arith.constant dense<0.000000e+00> : vector<16x256xf32>
    %198 = tpu.matmul %195, %197, %cst_73 {dimension_numbers = #tpu.dot_dimension_numbers<[1], [0], [0], [1], [0, 0, 1, 1], [], []>} : vector<16x512xbf16>, vector<512x256xbf16>, vector<16x256xf32> -> vector<16x256xf32>
    %c0_74 = arith.constant 0 : index
    %c0_75 = arith.constant 0 : index
    %c0_76 = arith.constant 0 : index
    %199 = vector.load %arg12[%c0_74, %c0_75, %c0_76] : memref<1x1x256xf32, #tpu.memory_space<vmem>>, vector<1x1x256xf32>
    %200 = vector.shape_cast %199 : vector<1x1x256xf32> to vector<1x256xf32>
    %201 = vector.broadcast %200 : vector<1x256xf32> to vector<16x256xf32>
    %202 = arith.addf %198, %201 : vector<16x256xf32>
    %203 = arith.addf %184, %202 : vector<16x256xf32>
    %cst_77 = arith.constant dense<0.000000e+00> : vector<16xf32>
    %204 = vector.multi_reduction <add>, %203, %cst_77 [1] : vector<16x256xf32> to vector<16xf32>
    %205 = vector.shape_cast %204 : vector<16xf32> to vector<16x1xf32>
    %cst_78 = arith.constant 2.560000e+02 : f32
    %206 = vector.broadcast %cst_78 : f32 to vector<16x1xf32>
    %207 = arith.divf %205, %206 : vector<16x1xf32>
    %208 = vector.broadcast %207 : vector<16x1xf32> to vector<16x256xf32>
    %209 = arith.subf %203, %208 : vector<16x256xf32>
    %210 = arith.mulf %209, %209 : vector<16x256xf32>
    %cst_79 = arith.constant dense<0.000000e+00> : vector<16xf32>
    %211 = vector.multi_reduction <add>, %210, %cst_79 [1] : vector<16x256xf32> to vector<16xf32>
    %212 = vector.shape_cast %211 : vector<16xf32> to vector<16x1xf32>
    %cst_80 = arith.constant 2.560000e+02 : f32
    %213 = vector.broadcast %cst_80 : f32 to vector<16x1xf32>
    %214 = arith.divf %212, %213 : vector<16x1xf32>
    %215 = vector.broadcast %207 : vector<16x1xf32> to vector<16x256xf32>
    %216 = arith.subf %203, %215 : vector<16x256xf32>
    %cst_81 = arith.constant 9.99999974E-6 : f32
    %217 = vector.broadcast %cst_81 : f32 to vector<16x1xf32>
    %218 = arith.addf %214, %217 : vector<16x1xf32>
    %219 = math.rsqrt %218 : vector<16x1xf32>
    %220 = vector.broadcast %219 : vector<16x1xf32> to vector<16x256xf32>
    %221 = arith.mulf %216, %220 : vector<16x256xf32>
    %c0_82 = arith.constant 0 : index
    %c0_83 = arith.constant 0 : index
    %c0_84 = arith.constant 0 : index
    %222 = vector.load %arg13[%c0_82, %c0_83, %c0_84] : memref<1x1x256xf32, #tpu.memory_space<vmem>>, vector<1x1x256xf32>
    %223 = vector.shape_cast %222 : vector<1x1x256xf32> to vector<1x256xf32>
    %224 = vector.broadcast %223 : vector<1x256xf32> to vector<16x256xf32>
    %225 = arith.mulf %221, %224 : vector<16x256xf32>
    %c0_85 = arith.constant 0 : index
    %c0_86 = arith.constant 0 : index
    %c0_87 = arith.constant 0 : index
    %226 = vector.load %arg14[%c0_85, %c0_86, %c0_87] : memref<1x1x256xf32, #tpu.memory_space<vmem>>, vector<1x1x256xf32>
    %227 = vector.shape_cast %226 : vector<1x1x256xf32> to vector<1x256xf32>
    %228 = vector.broadcast %227 : vector<1x256xf32> to vector<16x256xf32>
    %229 = arith.addf %225, %228 : vector<16x256xf32>
    %230 = arith.truncf %229 : vector<16x256xf32> to vector<16x256xbf16>
    %c0_88 = arith.constant 0 : index
    %c0_89 = arith.constant 0 : index
    %231 = vector.load %arg20[%c0_88, %c0_89] : memref<16x256xbf16, #tpu.memory_space<vmem>>, vector<16x256xbf16>
    tpu.vector_store %arg20[%c0_88, %c0_89], %230 {strides = array<i32>} : memref<16x256xbf16, #tpu.memory_space<vmem>>, vector<16x256xbf16>,
    %c1_i32 = arith.constant 1 : i32
    %232 = arith.cmpi eq, %arg0, %c1_i32 : i32
    %233 = arith.extui %232 : i1 to i32
    %c0_i32_90 = arith.constant 0 : i32
    %234 = arith.cmpi ne, %233, %c0_i32_90 : i32
    scf.if %234 {
      %235 = vector.extract_strided_slice %229 {offsets = [0, 0], sizes = [1, 256], strides = [1, 1]} : vector<16x256xf32> to vector<1x256xf32>
      %236 = vector.extract_strided_slice %229 {offsets = [8, 0], sizes = [1, 256], strides = [1, 1]} : vector<16x256xf32> to vector<1x256xf32>
      %237 = tpu.concatenate %235, %236 in 0 : vector<1x256xf32>, vector<1x256xf32> -> vector<2x256xf32>
      %238 = arith.truncf %237 : vector<2x256xf32> to vector<2x256xbf16>
      %c0_91 = arith.constant 0 : index
      %c0_92 = arith.constant 0 : index
      %239 = vector.load %arg15[%c0_91, %c0_92] : memref<256x256xbf16, #tpu.memory_space<vmem>>, vector<256x256xbf16>
      %cst_93 = arith.constant dense<0.000000e+00> : vector<2x256xf32>
      %240 = tpu.matmul %238, %239, %cst_93 {dimension_numbers = #tpu.dot_dimension_numbers<[1], [0], [0], [1], [0, 0, 1, 1], [], []>} : vector<2x256xbf16>, vector<256x256xbf16>, vector<2x256xf32> -> vector<2x256xf32>
      %c0_94 = arith.constant 0 : index
      %c0_95 = arith.constant 0 : index
      %241 = vector.load %arg16[%c0_94, %c0_95] : memref<1x256xf32, #tpu.memory_space<vmem>>, vector<1x256xf32>
      %242 = vector.broadcast %241 : vector<1x256xf32> to vector<2x256xf32>
      %243 = arith.addf %240, %242 : vector<2x256xf32>
      %244 = math.tanh %243 : vector<2x256xf32>
      %245 = arith.truncf %244 : vector<2x256xf32> to vector<2x256xbf16>
      %c0_96 = arith.constant 0 : index
      %c0_97 = arith.constant 0 : index
      %246 = vector.load %arg17[%c0_96, %c0_97] : memref<256x128xbf16, #tpu.memory_space<vmem>>, vector<256x128xbf16>
      %cst_98 = arith.constant dense<0.000000e+00> : vector<2x128xf32>
      %247 = tpu.matmul %245, %246, %cst_98 {dimension_numbers = #tpu.dot_dimension_numbers<[1], [0], [0], [1], [0, 0, 1, 1], [], []>} : vector<2x256xbf16>, vector<256x128xbf16>, vector<2x128xf32> -> vector<2x128xf32>
      %c0_99 = arith.constant 0 : index
      %c0_100 = arith.constant 0 : index
      %248 = vector.load %arg18[%c0_99, %c0_100] : memref<1x128xf32, #tpu.memory_space<vmem>>, vector<1x128xf32>
      %249 = vector.broadcast %248 : vector<1x128xf32> to vector<2x128xf32>
      %250 = arith.addf %247, %249 : vector<2x128xf32>
      %c0_101 = arith.constant 0 : index
      %c0_102 = arith.constant 0 : index
      %251 = vector.load %arg19[%c0_101, %c0_102] : memref<2x128xf32, #tpu.memory_space<vmem>>, vector<2x128xf32>
      tpu.vector_store %arg19[%c0_101, %c0_102], %250 {strides = array<i32>} : memref<2x128xf32, #tpu.memory_space<vmem>>, vector<2x128xf32>,
    } else {
    }
    return
  }
  func.func @transform_0(%arg0: i32, %arg1: memref<2xi32, #tpu.memory_space<smem>>) -> (i32, i32) {
    %c0_i32 = arith.constant 0 : i32
    %c0_i32_0 = arith.constant 0 : i32
    %c0_i32_1 = arith.constant 0 : i32
    return %c0_i32, %c0_i32_0 : i32, i32
  }
  func.func @transform_1(%arg0: i32, %arg1: memref<2xi32, #tpu.memory_space<smem>>) -> (i32, i32, i32) {
    %c0_i32 = arith.constant 0 : i32
    %c0_i32_0 = arith.constant 0 : i32
    %c0_i32_1 = arith.constant 0 : i32
    return %arg0, %c0_i32, %c0_i32_0 : i32, i32, i32
  }
  func.func @transform_2(%arg0: i32, %arg1: memref<2xi32, #tpu.memory_space<smem>>) -> (i32, i32, i32) {
    %c0_i32 = arith.constant 0 : i32
    %c0_i32_0 = arith.constant 0 : i32
    %c0_i32_1 = arith.constant 0 : i32
    return %arg0, %c0_i32, %c0_i32_0 : i32, i32, i32
  }
  func.func @transform_3(%arg0: i32, %arg1: memref<2xi32, #tpu.memory_space<smem>>) -> (i32, i32, i32) {
    %c0_i32 = arith.constant 0 : i32
    %c0_i32_0 = arith.constant 0 : i32
    %c0_i32_1 = arith.constant 0 : i32
    return %arg0, %c0_i32, %c0_i32_0 : i32, i32, i32
  }
  func.func @transform_4(%arg0: i32, %arg1: memref<2xi32, #tpu.memory_space<smem>>) -> (i32, i32, i32) {
    %c0_i32 = arith.constant 0 : i32
    %c0_i32_0 = arith.constant 0 : i32
    %c0_i32_1 = arith.constant 0 : i32
    return %arg0, %c0_i32, %c0_i32_0 : i32, i32, i32
  }
  func.func @transform_5(%arg0: i32, %arg1: memref<2xi32, #tpu.memory_space<smem>>) -> (i32, i32, i32) {
    %c0_i32 = arith.constant 0 : i32
    %c0_i32_0 = arith.constant 0 : i32
    %c0_i32_1 = arith.constant 0 : i32
    return %arg0, %c0_i32, %c0_i32_0 : i32, i32, i32
  }
  func.func @transform_6(%arg0: i32, %arg1: memref<2xi32, #tpu.memory_space<smem>>) -> (i32, i32, i32) {
    %c0_i32 = arith.constant 0 : i32
    %c0_i32_0 = arith.constant 0 : i32
    %c0_i32_1 = arith.constant 0 : i32
    return %arg0, %c0_i32, %c0_i32_0 : i32, i32, i32
  }
  func.func @transform_7(%arg0: i32, %arg1: memref<2xi32, #tpu.memory_space<smem>>) -> (i32, i32, i32) {
    %c0_i32 = arith.constant 0 : i32
    %c0_i32_0 = arith.constant 0 : i32
    %c0_i32_1 = arith.constant 0 : i32
    return %arg0, %c0_i32, %c0_i32_0 : i32, i32, i32
  }
  func.func @transform_8(%arg0: i32, %arg1: memref<2xi32, #tpu.memory_space<smem>>) -> (i32, i32, i32) {
    %c0_i32 = arith.constant 0 : i32
    %c0_i32_0 = arith.constant 0 : i32
    %c0_i32_1 = arith.constant 0 : i32
    return %arg0, %c0_i32, %c0_i32_0 : i32, i32, i32
  }
  func.func @transform_9(%arg0: i32, %arg1: memref<2xi32, #tpu.memory_space<smem>>) -> (i32, i32, i32) {
    %c0_i32 = arith.constant 0 : i32
    %c0_i32_0 = arith.constant 0 : i32
    %c0_i32_1 = arith.constant 0 : i32
    return %arg0, %c0_i32, %c0_i32_0 : i32, i32, i32
  }
  func.func @transform_10(%arg0: i32, %arg1: memref<2xi32, #tpu.memory_space<smem>>) -> (i32, i32, i32) {
    %c0_i32 = arith.constant 0 : i32
    %c0_i32_0 = arith.constant 0 : i32
    %c0_i32_1 = arith.constant 0 : i32
    return %arg0, %c0_i32, %c0_i32_0 : i32, i32, i32
  }
  func.func @transform_11(%arg0: i32, %arg1: memref<2xi32, #tpu.memory_space<smem>>) -> (i32, i32, i32) {
    %c0_i32 = arith.constant 0 : i32
    %c0_i32_0 = arith.constant 0 : i32
    %c0_i32_1 = arith.constant 0 : i32
    return %arg0, %c0_i32, %c0_i32_0 : i32, i32, i32
  }
  func.func @transform_12(%arg0: i32, %arg1: memref<2xi32, #tpu.memory_space<smem>>) -> (i32, i32, i32) {
    %c0_i32 = arith.constant 0 : i32
    %c0_i32_0 = arith.constant 0 : i32
    %c0_i32_1 = arith.constant 0 : i32
    return %arg0, %c0_i32, %c0_i32_0 : i32, i32, i32
  }
  func.func @transform_13(%arg0: i32, %arg1: memref<2xi32, #tpu.memory_space<smem>>) -> (i32, i32) {
    %c0_i32 = arith.constant 0 : i32
    %c0_i32_0 = arith.constant 0 : i32
    %c0_i32_1 = arith.constant 0 : i32
    return %c0_i32, %c0_i32_0 : i32, i32
  }
  func.func @transform_14(%arg0: i32, %arg1: memref<2xi32, #tpu.memory_space<smem>>) -> (i32, i32) {
    %c0_i32 = arith.constant 0 : i32
    %c0_i32_0 = arith.constant 0 : i32
    %c0_i32_1 = arith.constant 0 : i32
    return %c0_i32, %c0_i32_0 : i32, i32
  }
  func.func @transform_15(%arg0: i32, %arg1: memref<2xi32, #tpu.memory_space<smem>>) -> (i32, i32) {
    %c0_i32 = arith.constant 0 : i32
    %c0_i32_0 = arith.constant 0 : i32
    %c0_i32_1 = arith.constant 0 : i32
    return %c0_i32, %c0_i32_0 : i32, i32
  }
  func.func @transform_16(%arg0: i32, %arg1: memref<2xi32, #tpu.memory_space<smem>>) -> (i32, i32) {
    %c0_i32 = arith.constant 0 : i32
    %c0_i32_0 = arith.constant 0 : i32
    %c0_i32_1 = arith.constant 0 : i32
    return %c0_i32, %c0_i32_0 : i32, i32
  }
  func.func @transform_17(%arg0: i32, %arg1: memref<2xi32, #tpu.memory_space<smem>>) -> (i32, i32) {
    %c0_i32 = arith.constant 0 : i32
    %c0_i32_0 = arith.constant 0 : i32
    %c0_i32_1 = arith.constant 0 : i32
    return %c0_i32, %c0_i32_0 : i32, i32
  }
}

</mosaic_0001>

<bundles_post_ra>
// kernel: tpu_custom_call.1
= control target key start
LH: loop header
LB: loop body
LE: loop exit
PB: predicated region body
PF: predicated region fallthrough
CT: control target
= control target key end

     0   :  { %s6881_s0 = inlined_call_operand.hbm [shape: s32[2], index: 0, kind: input, shape index: {}]   ;;  %s6882_s1 = inlined_call_operand.hbm [shape: bf16[16,256], index: 1, kind: input, shape index: {}]   ;;  %s6883_s2 = inlined_call_operand.hbm [shape: bf16[2,256,768], index: 2, kind: input, shape index: {}]   ;;  %s6884_s3 = inlined_call_operand.hbm [shape: f32[2,1,768], index: 3, kind: input, shape index: {}]   ;;  %s6885_s4 = inlined_call_operand.hbm [shape: bf16[2,256,256], index: 4, kind: input, shape index: {}]   ;;  %s6886_s5 = inlined_call_operand.vmem [shape: f32[2,1,256], index: 5, kind: input, shape index: {}]   ;;  %s6887_s6 = inlined_call_operand.vmem [shape: f32[2,1,256], index: 6, kind: input, shape index: {}]   ;;  %s6888_s7 = inlined_call_operand.vmem [shape: f32[2,1,256], index: 7, kind: input, shape index: {}]   ;;  %s6889_s8 = inlined_call_operand.hbm [shape: bf16[2,256,512], index: 8, kind: input, shape index: {}]   ;;  %s6890_s9 = inlined_call_operand.vmem [shape: f32[2,1,512], index: 9, kind: input, shape index: {}]   ;;  %s6891_s10 = inlined_call_operand.hbm [shape: bf16[2,512,256], index: 10, kind: input, shape index: {}]   ;;  %s6892_s11 = inlined_call_operand.vmem [shape: f32[2,1,256], index: 11, kind: input, shape index: {}]   ;;  %s6893_s12 = inlined_call_operand.vmem [shape: f32[2,1,256], index: 12, kind: input, shape index: {}]   ;;  %s6894_s13 = inlined_call_operand.vmem [shape: f32[2,1,256], index: 13, kind: input, shape index: {}]   ;;  %s6895_s14 = inlined_call_operand.hbm [shape: bf16[256,256], index: 14, kind: input, shape index: {}]   ;;  %s6896_s15 = inlined_call_operand.vmem [shape: f32[1,256], index: 15, kind: input, shape index: {}]   ;;  %s6897_s16 = inlined_call_operand.hbm [shape: bf16[256,128], index: 16, kind: input, shape index: {}]   ;;  %s6898_s17 = inlined_call_operand.vmem [shape: f32[1,128], index: 17, kind: input, shape index: {}]   ;;  %s6899_s18 = inlined_call_operand.hbm [shape: f32[2,128], index: 18, kind: output, shape index: {}]  }
   0x1   :  { %6928 = sst [smem:[#allocation32_spill]] %s6881_s0 }
   0x2   :  { %6929 = sst [smem:[#allocation33_spill]] %s6882_s1  ;;  %s6946_s29 = sld [smem:[#allocation32_spill]] }
   0x3   :  { %6930 = sst [smem:[#allocation34_spill]] %s6883_s2 }
   0x4   :  { %6931 = sst [smem:[#allocation35_spill]] %s6884_s3 }
   0x5   :  { %6932 = sst [smem:[#allocation36_spill]] %s6885_s4 }
   0x6   :  { %6933 = sst [smem:[#allocation37_spill]] %s6886_s5 }
   0x7   :  { %6934 = sst [smem:[#allocation38_spill]] %s6887_s6 }
   0x8   :  { %6935 = sst [smem:[#allocation39_spill]] %s6888_s7 }
   0x9   :  { %6936 = sst [smem:[#allocation40_spill]] %s6889_s8 }
   0xa   :  { %6937 = sst [smem:[#allocation41_spill]] %s6890_s9 }
   0xb   :  { %6938 = sst [smem:[#allocation42_spill]] %s6891_s10 }
   0xc   :  { %6939 = sst [smem:[#allocation43_spill]] %s6892_s11 }
   0xd   :  { %6940 = sst [smem:[#allocation44_spill]] %s6893_s12  ;;  %s5492_s12 = scalar_lea.hbm %s6946_s29, 16 }
   0xe   :  { %6941 = sst [smem:[#allocation45_spill]] %s6894_s13  ;;  %p5493_p0 = scmp.ne.s32.totalorder %s6946_s29, %s5492_s12 }
   0xf   :  { %6942 = sst [smem:[#allocation46_spill]] %s6895_s14  ;;  %p5496_p1 = scmp.lt.u32.totalorder %s5492_s12, %s6946_s29 }
  0x10   :  { %6943 = sst [smem:[#allocation47_spill]] %s6896_s15 }
  0x11   :  { %6944 = sst [smem:[#allocation48_spill]] %s6898_s17  ;;  %p5498_p2 = pnand %p5496_p1, %p5493_p0 }
  0x12   :  { %6945 = sst [smem:[#allocation49_spill]] %s6899_s18 }
  0x13   :  { %5501 = shalt.err (!%p5498_p2)  }
  0x14   :  { %s5824_s20 = smov [#allocation4]  }
  0x15   :  { %24 = dma.hbm_to_smem %s6946_s29, 16, %s5824_s20, [#allocation3] }
  0x16   :  { %5778 = dma.done.wait [#allocation3], 16 }
  0x17   :  { %5779 = vsyncadd [#allocation3], 4294967280 }
  0x18   :  { %26 = sfence }
  0x19   :  { %27 = vsyncpa [#allocation6], 0 }
  0x1a   :  { %28 = vsyncpa [#allocation9], 0 }
  0x1b   :  { %30 = vsyncpa [#allocation9 + $0x1], 0 }
  0x1c   :  { %31 = vsyncpa [#allocation12], 0 }
  0x1d   :  { %33 = vsyncpa [#allocation12 + $0x1], 0 }
  0x1e   :  { %34 = vsyncpa [#allocation15], 0 }
  0x1f   :  { %36 = vsyncpa [#allocation15 + $0x1], 0 }
  0x20   :  { %37 = vsyncpa [#allocation18], 0 }
  0x21   :  { %38 = vsyncpa [#allocation7], 0  ;;  %s5954_s12 = smov 0   ;;  %s5956_s2 = smov 0  }
  0x22   :  { %s5958_s23 = smov 0   ;;  %s5960_s24 = smov 0  }
  0x23 LB: > { %6947 = sst [smem:[#allocation28_spill]] %s5818_s23  ;;  %s5973_s25 = sadd.s32 4294967295, %s5822_s24   ;;  %s5822_s24 = sphi %s5960_s24, %s7002_s24   ;;  %s5818_s23 = sphi %s5958_s23, %s7004_s23   ;;  %s5814_s2 = sphi %s5956_s2, %s7006_s2   ;;  %s5810_s12 = sphi %s5954_s12, %s7005_s12  }
  0x24   : > { %s5976_s26 = sadd.s32 1, %s5822_s24   ;;  %s72_s28 = sadd.s32 1, %s5818_s23 }
  0x25   : > { %6948 = sst [smem:[#allocation29_spill]] %s5976_s26  ;;  %s69_s27 = ssub.s32 %s5822_s24, %s5976_s26 }
  0x26   : > { %p70_p3 = scmp.eq.s32.totalorder %s69_s27, 0  ;;  %p79_p4 = scmp.ne.s32.totalorder %s5818_s23, %s5814_s2 }
  0x27   : > { %p80_p5 = scmp.eq.s32.totalorder %s5822_s24, 0  ;;  %p85_p6 = scmp.ne.s32.totalorder %s5814_s2, %s5810_s12 }
  0x28   : > { %s5986_s29 = scalar_select %p70_p3, %s5818_s23, %s72_s28  }
  0x29   : > { %p5988_p7 = por %p80_p5, %p79_p4  ;;  %p6907_p8 = scmp.eq.s32.totalorder %s5973_s25, 0 }
  0x2a   : > { %6949 = sst [smem:[#allocation30_spill]] %s5986_s29  ;;  %p4413_p9 = scmp.ge.s32.totalorder %s5822_s24, 1 }
  0x2b   : > { %s6950_s30 = scalar_select %p5988_p7, 1, 0 }
  0x2c   : > { %p487_p10 = scmp.lt.s32.totalorder %s5822_s24, 3  ;;  %p5997_p11 = por %p6907_p8, %p85_p6 }
  0x2d   : > { %s5825_s1 = smov [#allocation16]   ;;  %s6016_s22 = sand.u32 1, %s5822_s24  }
  0x2e   : > { %s6951_s0 = scalar_select %p5997_p11, 1, 0 }
  0x2f   : > { %p6002_p13 = pnand %p4413_p9, %p487_p10  ;;  %s512_s20 = sshll.u32 %s5825_s1, 4  ;;  %s513_s20 = int_to_ptr.vmem [resolvable:$true] %s512_s20 }
  0x30   : > { %6952 = sst [smem:[#allocation31_spill]] %s6951_s0  ;;  %s6019_s12 = sand.u32 1, %s5818_s23  }
  0x31   : > { %s6953_s19 = scalar_select %p6002_p13, 1, 0 }
  0x32   : > { %p4910_p0 = pneg %p6002_p13  ;;  %s6955_s14 = sld [smem:[#allocation46_spill]] }
  0x34   : > { %p6010_p1 = pnand %p4910_p0, %p6907_p8 }
  0x36   : > { %s6954_s21 = scalar_select %p6010_p1, 1, 0 }
  0x37   : > { %p6029_p4 = pneg %p6010_p1 }
  0x38   : > { %s5502_s29 = scalar_lea.hbm %s6955_s14, 4096 }
  0x39   : > { %p5503_p3 = scmp.ne.s32.totalorder %s6955_s14, %s5502_s29  ;;  %p5509_p9 = scmp.lt.u32.totalorder %s5502_s29, %s6955_s14 }
  0x3a   : > { %s6956_s1 = scalar_select %p6029_p4, 1, 0 }
  0x3b   : > { %p5505_p5 = pnand %p6029_p4, %p5503_p3 }
  0x3d   : > { %p5506_p6 = pneg %p5505_p5 }
  0x3f   : > { %p5511_p10 = pnand %p5509_p9, %p5506_p6 }
  0x41   : > { %5514 = shalt.err (!%p5511_p10)
}
  0x42   : > { %s5515_s27 = scalar_lea.vmem %s513_s20, 4096  ;;  %p5523_p2 = scmp.lt.s32.totalorder %s513_s20, %s513_s20 }
  0x43   : > { %p5516_p0 = scmp.ne.s32.totalorder %s513_s20, %s5515_s27  ;;  %p5524_p11 = scmp.lt.s32.totalorder %s5515_s27, %s5515_s27 }
  0x45   : > { %p5518_p12 = pnand %p5516_p0, %p6029_p4  ;;  %p5525_p13 = por %p5524_p11, %p5523_p2 }
  0x47   : > { %p5519_p8 = pneg %p5518_p12 }
  0x49   : > { %p5526_p7 = pnand %p5525_p13, %p5519_p8 }
  0x4b   : > { %5529 = shalt.err (!%p5526_p7)
}
  0x4c   : > { %s6910_s18 = smov 128   ;;  %s6912_s17 = smov 8  }
  0x4d   : > { %4916 = dma.hbm_to_vmem [thread:$0]  (!%p6010_p1), %s6955_s14, 4096, %s513_s20, [#allocation15], %s6910_s18, %s6910_s18, %s6912_s17  }
  0x4e   : > { %s4878_s29 = smul.u32 768, %s6019_s12  ;;  %p6957_p11 = scmp.ne.s32.totalorder %s6950_s30, 0 }
  0x4f   : > { %p6958_p8 = scmp.lt.s32.totalorder %s5822_s24, 2  ;;  %s4879_s27 = smul.u32 12288, %s5822_s24 }
  0x50   : > { %s6960_s11 = sld [smem:[#allocation34_spill]]  ;;  %s549_s23 = scalar_lea.vmem [#allocation8], %s4878_s29 }
  0x51   : > { %p6053_p7 = pnand %p6958_p8, %p6957_p11  ;;  %s556_s20 = sshll.u32 %s549_s23, 4  ;;  %s6063_s20 = int_to_ptr.vmem [resolvable:$true] %s556_s20 }
  0x52   : > { %s6919_s30 = scalar_lea.sflag [#allocation9], %s6016_s22 }
  0x53   : > { %s6959_s28 = scalar_select %p6053_p7, 1, 0 }
  0x54   : > { %p6070_p13 = pneg %p6053_p7 }
  0x56   : > { %s6061_s9 = scalar_lea.hbm %s6960_s11, %s4879_s27  ;;  %s5535_s27 = scalar_lea.hbm %s6960_s11, 24576 }
  0x57   : > { %s5530_s26 = scalar_lea.hbm %s6061_s9, 12288  ;;  %p5536_p5 = scmp.lt.u32.totalorder %s6061_s9, %s6960_s11 }
  0x58   : > { %p5531_p12 = scmp.ne.s32.totalorder %s6061_s9, %s5530_s26  ;;  %p5537_p6 = scmp.lt.u32.totalorder %s5535_s27, %s5530_s26 }
  0x59   : > { %s6961_s18 = scalar_select %p6070_p13, 1, 0 }
  0x5a   : > { %p5533_p2 = pnand %p6070_p13, %p5531_p12  ;;  %p5538_p9 = por %p5537_p6, %p5536_p5 }
  0x5b   : > { %p5539_p10 = scmp.lt.u32.totalorder %s5530_s26, %s6061_s9 }
  0x5c   : > { %p5534_p3 = pneg %p5533_p2 }
  0x5d   : > { %p5540_p0 = por %p5539_p10, %p5538_p9 }
  0x5f   : > { %p5541_p11 = pnand %p5540_p0, %p5534_p3 }
  0x61   : > { %5544 = shalt.err (!%p5541_p11)
}
  0x62   : > { %s5545_s17 = scalar_lea.vmem %s6063_s20, 12288  ;;  %s5828_s13 = smov [#allocation8]  }
  0x63   : > { %p5546_p8 = scmp.ne.s32.totalorder %s6063_s20, %s5545_s17  ;;  %s5550_s15 = sshll.u32 %s5828_s13, 4  ;;  %s5551_s15 = int_to_ptr.vmem [resolvable:$false] %s5550_s15 }
  0x64   : > { %s5552_s29 = scalar_lea.vmem %s5551_s15, 24576  ;;  %p5553_p1 = scmp.lt.s32.totalorder %s6063_s20, %s5551_s15 }
  0x65   : > { %p5548_p12 = pnand %p5546_p8, %p6070_p13  ;;  %p5554_p4 = scmp.lt.s32.totalorder %s5552_s29, %s5545_s17 }
  0x67   : > { %p5549_p2 = pneg %p5548_p12  ;;  %p5555_p5 = por %p5554_p4, %p5553_p1 }
  0x69   : > { %p5556_p6 = pnand %p5555_p5, %p5549_p2 }
  0x6b   : > { %5559 = shalt.err (!%p5556_p6)
}
  0x6c   : > { %s5829_s26 = smov 384   ;;  %s5830_s27 = smov 24  }
  0x6d   : > { %4923 = dma.hbm_to_vmem [thread:$0]  (!%p6053_p7), %s6061_s9, 12288, %s6063_s20, %s6919_s30, %s5829_s26, %s5829_s26, %s5830_s27  }
  0x6e   : > { %s4420_s23 = sshll.u32 %s6019_s12, 8  ;;  %s4769_s13 = sshll.u32 %s5822_s24, 12 }
  0x6f   : > { %s6962_s4 = sld [smem:[#allocation36_spill]]  ;;  %s589_s11 = scalar_lea.vmem [#allocation11], %s4420_s23 }
  0x70   : > { %s596_s14 = sshll.u32 %s589_s11, 4  ;;  %s6926_s7 = scalar_lea.sflag [#allocation12], %s6016_s22  ;;  %s6102_s14 = int_to_ptr.vmem [resolvable:$true] %s596_s14 }
  0x75   : > { %s6100_s29 = scalar_lea.hbm %s6962_s4, %s4769_s13  ;;  %s5565_s26 = scalar_lea.hbm %s6962_s4, 8192 }
  0x76   : > { %s5560_s6 = scalar_lea.hbm %s6100_s29, 4096  ;;  %p5566_p9 = scmp.lt.u32.totalorder %s6100_s29, %s6962_s4 }
  0x77   : > { %p5561_p1 = scmp.ne.s32.totalorder %s6100_s29, %s5560_s6  ;;  %p5567_p10 = scmp.lt.u32.totalorder %s5565_s26, %s5560_s6 }
  0x78   : > { %p5569_p11 = scmp.lt.u32.totalorder %s5560_s6, %s6100_s29 }
  0x79   : > { %p5563_p4 = pnand %p5561_p1, %p6070_p13  ;;  %p5568_p0 = por %p5567_p10, %p5566_p9 }
  0x7b   : > { %p5564_p3 = pneg %p5563_p4  ;;  %p5570_p8 = por %p5569_p11, %p5568_p0 }
  0x7d   : > { %p5571_p12 = pnand %p5570_p8, %p5564_p3 }
  0x7f   : > { %5574 = shalt.err (!%p5571_p12)
}
  0x80   : > { %s5575_s11 = scalar_lea.vmem %s6102_s14, 4096  ;;  %s5831_s23 = smov [#allocation11]  }
  0x81   : > { %p5576_p2 = scmp.ne.s32.totalorder %s6102_s14, %s5575_s11  ;;  %s5580_s15 = sshll.u32 %s5831_s23, 4  ;;  %s5581_s15 = int_to_ptr.vmem [resolvable:$false] %s5580_s15 }
  0x82   : > { %s5582_s17 = scalar_lea.vmem %s5581_s15, 8192  ;;  %p5583_p1 = scmp.lt.s32.totalorder %s6102_s14, %s5581_s15 }
  0x83   : > { %p5578_p5 = pnand %p5576_p2, %p6070_p13  ;;  %p5584_p4 = scmp.lt.s32.totalorder %s5582_s17, %s5575_s11 }
  0x85   : > { %p5579_p6 = pneg %p5578_p5  ;;  %p5585_p9 = por %p5584_p4, %p5583_p1 }
  0x87   : > { %p5586_p10 = pnand %p5585_p9, %p5579_p6 }
  0x89   : > { %5589 = shalt.err (!%p5586_p10)
}
  0x8a   : > { %s6963_s6 = smov 8   ;;  %s6964_s9 = smov 128  }
  0x8b   : > { %4929 = dma.hbm_to_vmem [thread:$0]  (!%p6053_p7), %s6100_s29, 4096, %s6102_s14, %s6926_s7, %s6964_s9, %s6964_s9, %s6963_s6  }
  0x8c   : > { %s5832_s20 = smov [#allocation5]   ;;  %s5833_s27 = smov [#allocation17]  }
  0x8d   : > { %s499_s26 = sshll.u32 %s5832_s20, 4  ;;  %s528_s13 = sshll.u32 %s5833_s27, 4  ;;  %s500_s26 = int_to_ptr.vmem [resolvable:$true] %s499_s26  ;;  %s529_s13 = int_to_ptr.vmem [resolvable:$true] %s528_s13 }
  0x8e   : > { %s6965_s15 = sld [smem:[#allocation33_spill]]  ;;  %p6966_p0 = scmp.ne.s32.totalorder %s6956_s1, 0 }
  0x94   : > { %s5590_s17 = scalar_lea.hbm %s6965_s15, 256 }
  0x95   : > { %p5591_p3 = scmp.ne.s32.totalorder %s6965_s15, %s5590_s17  ;;  %p5597_p12 = scmp.lt.u32.totalorder %s5590_s17, %s6965_s15 }
  0x97   : > { %p5593_p11 = pnand %p5591_p3, %p6966_p0 }
  0x99   : > { %p5594_p8 = pneg %p5593_p11 }
  0x9b   : > { %p5599_p2 = pnand %p5597_p12, %p5594_p8 }
  0x9d   : > { %5602 = shalt.err (!%p5599_p2)
}
  0x9e   : > { %s5603_s14 = scalar_lea.vmem %s500_s26, 256  ;;  %p5611_p4 = scmp.lt.s32.totalorder %s500_s26, %s500_s26 }
  0x9f   : > { %p5604_p5 = scmp.ne.s32.totalorder %s500_s26, %s5603_s14  ;;  %p5612_p9 = scmp.lt.s32.totalorder %s5603_s14, %s5603_s14 }
  0xa1   : > { %p5606_p6 = pnand %p5604_p5, %p6966_p0  ;;  %p5613_p10 = por %p5612_p9, %p5611_p4 }
  0xa3   : > { %p5607_p1 = pneg %p5606_p6 }
  0xa5   : > { %p5614_p7 = pnand %p5613_p10, %p5607_p1 }
  0xa7   : > { %5617 = shalt.err (!%p5614_p7)
}
  0xa8   : > { %p6967_p3 = scmp.ne.s32.totalorder %s6954_s21, 0  ;;  %s4880_s0 = smul.u32 6, %s6019_s12 }
  0xa9   : > { %s5618_s20 = scalar_lea.hbm %s6897_s16, 2048 }
  0xaa   : > { %4913 = dma.hbm_to_vmem [thread:$0]  (!%p6967_p3), %s6965_s15, 256, %s500_s26, [#allocation6], %s6964_s9, %s6964_s9, %s6963_s6  }
  0xab   : > { %p5619_p7 = scmp.ne.s32.totalorder %s6897_s16, %s5618_s20  ;;  %p5625_p12 = scmp.lt.u32.totalorder %s5618_s20, %s6897_s16 }
  0xad   : > { %p5621_p11 = pnand %p5619_p7, %p6966_p0 }
  0xaf   : > { %p5622_p8 = pneg %p5621_p11 }
  0xb1   : > { %p5627_p2 = pnand %p5625_p12, %p5622_p8 }
  0xb3   : > { %5630 = shalt.err (!%p5627_p2)
}
  0xb4   : > { %s5631_s26 = scalar_lea.vmem %s529_s13, 2048  ;;  %p5639_p4 = scmp.lt.s32.totalorder %s529_s13, %s529_s13 }
  0xb5   : > { %p5632_p5 = scmp.ne.s32.totalorder %s529_s13, %s5631_s26  ;;  %p5640_p9 = scmp.lt.s32.totalorder %s5631_s26, %s5631_s26 }
  0xb7   : > { %p5634_p6 = pnand %p5632_p5, %p6966_p0  ;;  %p5641_p10 = por %p5640_p9, %p5639_p4 }
  0xb9   : > { %p5635_p1 = pneg %p5634_p6 }
  0xbb   : > { %p5642_p13 = pnand %p5641_p10, %p5635_p1 }
  0xbd   : > { %5645 = shalt.err (!%p5642_p13)
}
  0xbe   : > { %s5834_s14 = smov 64   ;;  %s5835_s4 = smov 4  }
  0xbf   : > { %4919 = dma.hbm_to_vmem [thread:$0]  (!%p6967_p3), %s6897_s16, 2048, %s529_s13, [#allocation18], %s5834_s14, %s5834_s14, %s5835_s4  }
  0xc0   : > { %s4881_s29 = smul.u32 96, %s5822_s24  ;;  %s570_s1 = scalar_lea.vmem [#allocation10], %s4880_s0 }
  0xc1   : > { %s578_s20 = sshll.u32 %s570_s1, 4  ;;  %s4423_s27 = sshll.u32 %s6019_s12, 9  ;;  %s579_s20 = int_to_ptr.vmem [resolvable:$true] %s578_s20 }
  0xc2   : > { %s6968_s3 = sld [smem:[#allocation35_spill]]  ;;  %p6969_p0 = scmp.ne.s32.totalorder %s6961_s18, 0 }
  0xc8   : > { %s576_s17 = scalar_lea.hbm %s6968_s3, %s4881_s29  ;;  %s5651_s15 = scalar_lea.hbm %s6968_s3, 192 }
  0xc9   : > { %s5646_s26 = scalar_lea.hbm %s576_s17, 96  ;;  %p5652_p3 = scmp.lt.u32.totalorder %s576_s17, %s6968_s3 }
  0xca   : > { %p5647_p13 = scmp.ne.s32.totalorder %s576_s17, %s5646_s26  ;;  %p5653_p8 = scmp.lt.u32.totalorder %s5651_s15, %s5646_s26 }
  0xcb   : > { %p5655_p2 = scmp.lt.u32.totalorder %s5646_s26, %s576_s17 }
  0xcc   : > { %p5649_p7 = pnand %p5647_p13, %p6969_p0  ;;  %p5654_p12 = por %p5653_p8, %p5652_p3 }
  0xce   : > { %p5650_p11 = pneg %p5649_p7  ;;  %p5656_p5 = por %p5655_p2, %p5654_p12 }
  0xd0   : > { %p5657_p6 = pnand %p5656_p5, %p5650_p11 }
  0xd2   : > { %5660 = shalt.err (!%p5657_p6)
}
  0xd3   : > { %s5661_s0 = scalar_lea.vmem %s579_s20, 96  ;;  %s5836_s14 = smov [#allocation10]  }
  0xd4   : > { %p5662_p1 = scmp.ne.s32.totalorder %s579_s20, %s5661_s0  ;;  %s5666_s4 = sshll.u32 %s5836_s14, 4  ;;  %s5667_s4 = int_to_ptr.vmem [resolvable:$false] %s5666_s4 }
  0xd5   : > { %s5668_s7 = scalar_lea.vmem %s5667_s4, 192  ;;  %p5669_p10 = scmp.lt.s32.totalorder %s579_s20, %s5667_s4 }
  0xd6   : > { %p5664_p4 = pnand %p5662_p1, %p6969_p0  ;;  %p5670_p13 = scmp.lt.s32.totalorder %s5668_s7, %s5661_s0 }
  0xd8   : > { %p5665_p9 = pneg %p5664_p4  ;;  %p5671_p7 = por %p5670_p13, %p5669_p10 }
  0xda   : > { %p5672_p3 = pnand %p5671_p7, %p5665_p9 }
  0xdc   : > { %5675 = shalt.err (!%p5672_p3)
}
  0xdd   : > { %p6970_p8 = scmp.ne.s32.totalorder %s6959_s28, 0  ;;  %s6971_s15 = scalar_lea.sflag [#allocation9], %s6016_s22 }
  0xde   : > { %s4770_s30 = sshll.u32 %s5822_s24, 13  ;;  %s6972_s8 = sld [smem:[#allocation40_spill]] }
  0xdf   : > { %4926 = dma.hbm_to_vmem [thread:$0]  (!%p6970_p8), %s576_s17, 96, %s579_s20, %s6971_s15  }
  0xe0   : > { %s631_s23 = scalar_lea.vmem [#allocation13], %s4423_s27 }
  0xe1   : > { %s638_s26 = sshll.u32 %s631_s23, 4  ;;  %s6200_s26 = int_to_ptr.vmem [resolvable:$true] %s638_s26 }
  0xe4   : > { %s6196_s11 = scalar_lea.hbm %s6972_s8, %s4770_s30  ;;  %s5681_s5 = scalar_lea.hbm %s6972_s8, 16384 }
  0xe5   : > { %s5676_s21 = scalar_lea.hbm %s6196_s11, 8192  ;;  %p5682_p5 = scmp.lt.u32.totalorder %s6196_s11, %s6972_s8 }
  0xe6   : > { %p5677_p11 = scmp.ne.s32.totalorder %s6196_s11, %s5676_s21  ;;  %p5683_p6 = scmp.lt.u32.totalorder %s5681_s5, %s5676_s21 }
  0xe7   : > { %p5685_p4 = scmp.lt.u32.totalorder %s5676_s21, %s6196_s11 }
  0xe8   : > { %p5679_p12 = pnand %p5677_p11, %p6969_p0  ;;  %p5684_p1 = por %p5683_p6, %p5682_p5 }
  0xea   : > { %p5680_p2 = pneg %p5679_p12  ;;  %p5686_p9 = por %p5685_p4, %p5684_p1 }
  0xec   : > { %p5687_p10 = pnand %p5686_p9, %p5680_p2 }
  0xee   : > { %5690 = shalt.err (!%p5687_p10)
}
  0xef   : > { %s5691_s14 = scalar_lea.vmem %s6200_s26, 8192  ;;  %s5837_s4 = smov [#allocation13]  }
  0xf0   : > { %p5692_p13 = scmp.ne.s32.totalorder %s6200_s26, %s5691_s14  ;;  %s5696_s7 = sshll.u32 %s5837_s4, 4  ;;  %s5697_s7 = int_to_ptr.vmem [resolvable:$false] %s5696_s7 }
  0xf1   : > { %s5698_s15 = scalar_lea.vmem %s5697_s7, 16384  ;;  %p5699_p11 = scmp.lt.s32.totalorder %s6200_s26, %s5697_s7 }
  0xf2   : > { %p5694_p7 = pnand %p5692_p13, %p6969_p0  ;;  %p5700_p12 = scmp.lt.s32.totalorder %s5698_s15, %s5691_s14 }
  0xf4   : > { %p5695_p3 = pneg %p5694_p7  ;;  %p5701_p5 = por %p5700_p12, %p5699_p11 }
  0xf6   : > { %p5702_p6 = pnand %p5701_p5, %p5695_p3 }
  0xf8   : > { %5705 = shalt.err (!%p5702_p6)
}
  0xf9   : > { %s5838_s29 = smov 256   ;;  %s5839_s1 = smov 16  }
  0xfa   : > { %s6973_s23 = scalar_lea.sflag [#allocation12], %s6016_s22  ;;  %s6974_s10 = sld [smem:[#allocation42_spill]] }
  0xfb   : > { %4932 = dma.hbm_to_vmem [thread:$0]  (!%p6970_p8), %s6196_s11, 8192, %s6200_s26, %s6973_s23, %s5838_s29, %s5838_s29, %s5839_s1  }
  0xfc   : > { %s659_s5 = scalar_lea.vmem [#allocation14], %s4423_s27  ;;  %s656_s0 = scalar_lea.sflag [#allocation15], %s6016_s22 }
  0xfd   : > { %s666_s13 = sshll.u32 %s659_s5, 4  ;;  %s6234_s13 = int_to_ptr.vmem [resolvable:$true] %s666_s13 }
 0x100   : > { %s6230_s17 = scalar_lea.hbm %s6974_s10, %s4770_s30  ;;  %s5711_s30 = scalar_lea.hbm %s6974_s10, 16384 }
 0x101   : > { %s5706_s14 = scalar_lea.hbm %s6230_s17, 8192  ;;  %p5712_p9 = scmp.lt.u32.totalorder %s6230_s17, %s6974_s10 }
 0x102   : > { %p5707_p2 = scmp.ne.s32.totalorder %s6230_s17, %s5706_s14  ;;  %p5713_p10 = scmp.lt.u32.totalorder %s5711_s30, %s5706_s14 }
 0x103   : > { %p5715_p7 = scmp.lt.u32.totalorder %s5706_s14, %s6230_s17 }
 0x104   : > { %p5709_p1 = pnand %p5707_p2, %p6969_p0  ;;  %p5714_p13 = por %p5713_p10, %p5712_p9 }
 0x106   : > { %p5710_p4 = pneg %p5709_p1  ;;  %p5716_p3 = por %p5715_p7, %p5714_p13 }
 0x108   : > { %p5717_p11 = pnand %p5716_p3, %p5710_p4 }
 0x10a   : > { %5720 = shalt.err (!%p5717_p11)
}
 0x10b   : > { %s5721_s27 = scalar_lea.vmem %s6234_s13, 8192  ;;  %s5840_s4 = smov [#allocation14]  }
 0x10c   : > { %p5722_p12 = scmp.ne.s32.totalorder %s6234_s13, %s5721_s27  ;;  %s5726_s7 = sshll.u32 %s5840_s4, 4  ;;  %s5727_s7 = int_to_ptr.vmem [resolvable:$false] %s5726_s7 }
 0x10d   : > { %s5728_s15 = scalar_lea.vmem %s5727_s7, 16384  ;;  %p5729_p2 = scmp.lt.s32.totalorder %s6234_s13, %s5727_s7 }
 0x10e   : > { %p5724_p5 = pnand %p5722_p12, %p6969_p0  ;;  %p5730_p1 = scmp.lt.s32.totalorder %s5728_s15, %s5721_s27 }
 0x110   : > { %p5725_p6 = pneg %p5724_p5  ;;  %p5731_p9 = por %p5730_p1, %p5729_p2 }
 0x112   : > { %p5732_p10 = pnand %p5731_p9, %p5725_p6 }
 0x114   : > { %5735 = shalt.err (!%p5732_p10)
}
 0x115   : > { %4935 = dma.hbm_to_vmem [thread:$0]  (!%p6970_p8), %s6230_s17, 8192, %s6234_s13, %s656_s0, %s6964_s9, %s6964_s9, %s6963_s6  }
 0x116   : > { %p6975_p0 = scmp.ne.s32.totalorder %s6953_s19, 0 }
 0x117   : > { %p6976_p4 = scmp.eq.s32.totalorder (!%p6975_p0), %s5973_s25, 0 }
 0x118   : > { %699 = sbr.rel (%p6975_p0) target bundleno = 4098 (0x1002), region = 88 }
 0x11f   : > { %5781 = dma.done.wait (%p6976_p4), [#allocation6], 256   ;;  %p6977_p13 = pmov %p6976_p4 }
 0x120   : > { %s6978_s18 = sld [smem:[#allocation31_spill]]  ;;  %s705_s28 = sand.u32 1, %s5973_s25  }
 0x121   : > { %5783 = vsyncadd (%p6977_p13), [#allocation6], 4294967040  ;;  %s707_s29 = sand.u32 1, %s5814_s2   ;;  %s706_s23 = scalar_lea.sflag [#allocation9], %s705_s28 }
 0x122   : > { %s4882_s1 = smul.u32 768, %s707_s29 }
 0x124   : > { %s6271_s22 = scalar_lea.vmem [#allocation8], %s4882_s1 }
 0x126   : > { %p6979_p7 = scmp.ne.s32.totalorder %s6978_s18, 0 }
 0x128   : > { %5785 = dma.done.wait (%p6979_p7), %s706_s23, 12384  }
 0x129   : > { %5787 = vsyncadd (%p6979_p7), %s706_s23, 4294954912  ;;  %s4883_s19 = smul.u32 6, %s707_s29  ;;  %s4431_s6 = sshll.u32 %s707_s29, 8 }
 0x12a   : > { %s724_s21 = scalar_lea.sflag [#allocation12], %s705_s28  ;;  %s6279_s20 = scalar_lea.vmem [#allocation11], %s4431_s6 }
 0x12b   : > { %s6277_s9 = scalar_lea.vmem [#allocation10], %s4883_s19 }
 0x12c   : > { %5789 = dma.done.wait (%p6979_p7), %s724_s21, 12288  }
 0x12d   : > { %5791 = vsyncadd (%p6979_p7), %s724_s21, 4294955008  ;;  %s4432_s17 = sshll.u32 %s707_s29, 9  ;;  %s742_s13 = scalar_lea.sflag [#allocation15], %s705_s28 }
 0x12e   : > { %s6285_s5 = scalar_lea.vmem [#allocation13], %s4432_s17  ;;  %s6287_s0 = scalar_lea.vmem [#allocation14], %s4432_s17 }
 0x12f   : > { %5793 = dma.done.wait (%p6979_p7), %s742_s13, 8192  }
 0x130   : > { %5795 = vsyncadd (%p6979_p7), %s742_s13, 4294959104  ;;  %p6980_p8 = pmov %p6976_p4 }
 0x131   : > { %p6981_p3 = pmov %p6976_p4 }
 0x132   : > { %5797 = dma.done.wait (%p6980_p8), [#allocation15], 4096  }
 0x133   : > { %5799 = vsyncadd (%p6981_p3), [#allocation15], 4294963200  ;;  %p6982_p11 = pmov %p6981_p3 }
 0x134   : > { %p6983_p12 = pmov %p6981_p3 }
 0x135   : > { %5801 = dma.done.wait (%p6982_p11), [#allocation18], 2048  }
 0x136   : > { %5803 = vsyncadd (%p6983_p12), [#allocation18], 4294965248  ;;  %p847_p5 = scmp.lt.s32.totalorder %s5973_s25, 1  ;;  %s6985_s15 = sld [smem:[#allocation38_spill]] }
 0x137   : > { %s6986_s1 = sld [smem:[#allocation39_spill]]  ;;  %s6987_s21 = sld [smem:[#allocation41_spill]] }
 0x138   : > { %s848_s14 = scalar_select %p847_p5, %s5973_s25, 1 }
 0x139   : > { %s6989_s26 = sld [smem:[#allocation44_spill]]  ;;  %s6990_s7 = sld [smem:[#allocation45_spill]] }
 0x13a   : > { %s6303_s24 = sshll.u32 %s848_s14, 1  ;;  %s4439_s11 = sshll.u32 %s848_s14, 2 }
 0x13b   : > { %s6988_s14 = sld [smem:[#allocation43_spill]]  ;;  %p6991_p6 = scmp.ne.s32.totalorder %s5973_s25, 0 }
 0x13c   : > { %s854_s18 = scalar_lea.vmem %s6985_s15, %s6303_s24  ;;  %v4995_v0 = vld [vmem:[#allocation5] ss:$8 sps:$4 sm:$0xff] (!%p6991_p6)   ;;  %v4997_v1 = vld [vmem:[#allocation5 + $0x4] ss:$8 sps:$4 sm:$0xff] (!%p6991_p6)  }
 0x13d   : > { %s858_s23 = scalar_lea.vmem %s6986_s1, %s6303_s24  ;;  %s6320_s17 = scalar_lea.vmem %s6987_s21, %s4439_s11  ;;  %892 = vst [vmem:[#allocation2] sm:$0xff] (!%p6991_p6), %v4995_v0  ;;  %893 = vst [vmem:[#allocation2 + $0x8] sm:$0xff] (!%p6991_p6), %v4997_v1 }
 0x13e   : > { %879 = sbr.rel (%p6991_p6) target bundleno = 325 (0x145), region = 124 }
 0x13f   : > { %s870_s12 = scalar_lea.vmem %s6989_s26, %s6303_s24  ;;  %s874_s15 = scalar_lea.vmem %s6990_s7, %s6303_s24 }
 0x141   : > { %s866_s8 = scalar_lea.vmem %s6988_s14, %s6303_s24 }
 0x145 PF: > { %v4998_v2 = vld [vmem:[%s6271_s22 + $0x4] ss:$24 sps:$4 sm:$0xff]   ;;  %v5000_v3 = vld [vmem:[%s6271_s22] ss:$24 sps:$4 sm:$0xff]   ;;  %v5001_v4 = vld [vmem:[%s6271_s22 + $0x34] ss:$24 sps:$4 sm:$0xff]  }
 0x146   : > { %1504 = vmatprep.subr.bf16.mxu1 %v4998_v2  ;;  %v5003_v5 = vld [vmem:[%s6271_s22 + $0x30] ss:$24 sps:$4 sm:$0xff]   ;;  %v5004_v6 = vld [vmem:[%s6271_s22 + $0x64] ss:$24 sps:$4 sm:$0xff]   ;;  %v5006_v7 = vld [vmem:[%s6271_s22 + $0x60] ss:$24 sps:$4 sm:$0xff]  }
 0x147   : > { %1505 = vmatpush1.bf16.msra.mxu1 %v5000_v3  ;;  %v5007_v8 = vld [vmem:[%s6271_s22 + $0x94] ss:$24 sps:$4 sm:$0xff]   ;;  %v5009_v9 = vld [vmem:[%s6271_s22 + $0x90] ss:$24 sps:$4 sm:$0xff]   ;;  %v5010_v10 = vld [vmem:[%s6271_s22 + $0xc4] ss:$24 sps:$4 sm:$0xff]  }
 0x148   : > { %1506 = vmatprep.subr.bf16.mxu1 %v5001_v4  ;;  %v5012_v11 = vld [vmem:[%s6271_s22 + $0xc0] ss:$24 sps:$4 sm:$0xff]   ;;  %v5013_v12 = vld [vmem:[%s6271_s22 + $0xf4] ss:$24 sps:$4 sm:$0xff]   ;;  %v5015_v13 = vld [vmem:[%s6271_s22 + $0xf0] ss:$24 sps:$4 sm:$0xff]  }
 0x149   : > { %v5016_v14 = vld [vmem:[%s6271_s22 + $0x124] ss:$24 sps:$4 sm:$0xff]   ;;  %v895_v15 = vld [vmem:[#allocation2 + $0x8] sm:$0xff]  ;;  %v5018_v16 = vld [vmem:[%s6271_s22 + $0x120] ss:$24 sps:$4 sm:$0xff]   ;;  %vm5842_vm0 = vmmov 0  }
 0x14a   : > { %1536 = vmatprep.mubr.bf16.mxu1 %v895_v15  ;;  %1622 = vmatprep.mubr.bf16.mxu0 %v895_v15  ;;  %v5019_v17 = vld [vmem:[%s6271_s22 + $0x154] ss:$24 sps:$4 sm:$0xff]   ;;  %v5021_v18 = vld [vmem:[%s6271_s22 + $0x150] ss:$24 sps:$4 sm:$0xff]   ;;  %v5022_v19 = vld [vmem:[%s6271_s22 + $0x184] ss:$24 sps:$4 sm:$0xff]  }
 0x14b   : > { %1507 = vmatpush1.bf16.msra.mxu1 %v5003_v5  ;;  %v5024_v20 = vld [vmem:[%s6271_s22 + $0x180] ss:$24 sps:$4 sm:$0xff]   ;;  %v5025_v21 = vld [vmem:[%s6271_s22 + $0x1b4] ss:$24 sps:$4 sm:$0xff]   ;;  %v5027_v22 = vld [vmem:[%s6271_s22 + $0x1b0] ss:$24 sps:$4 sm:$0xff]  }
 0x14c   : > { %1508 = vmatprep.subr.bf16.mxu1 %v5004_v6  ;;  %v5028_v23 = vld [vmem:[%s6271_s22 + $0x1e4] ss:$24 sps:$4 sm:$0xff]   ;;  %v5030_v24 = vld [vmem:[%s6271_s22 + $0x1e0] ss:$24 sps:$4 sm:$0xff]   ;;  %v5031_v25 = vld [vmem:[%s6271_s22 + $0x214] ss:$24 sps:$4 sm:$0xff]  }
 0x14d   : > { %v5033_v26 = vld [vmem:[%s6271_s22 + $0x210] ss:$24 sps:$4 sm:$0xff]   ;;  %v5034_v27 = vld [vmem:[%s6271_s22 + $0x244] ss:$24 sps:$4 sm:$0xff]   ;;  %v5036_v28 = vld [vmem:[%s6271_s22 + $0x240] ss:$24 sps:$4 sm:$0xff]  }
 0x14e   : > { %v5037_v29 = vld [vmem:[%s6271_s22 + $0x274] ss:$24 sps:$4 sm:$0xff]   ;;  %v5039_v30 = vld [vmem:[%s6271_s22 + $0x270] ss:$24 sps:$4 sm:$0xff]   ;;  %v5040_v31 = vld [vmem:[%s6271_s22 + $0x2a4] ss:$24 sps:$4 sm:$0xff]  }
 0x14f   : > { %1509 = vmatpush1.bf16.msra.mxu1 %v5006_v7  ;;  %v5042_v32 = vld [vmem:[%s6271_s22 + $0x2a0] ss:$24 sps:$4 sm:$0xff]   ;;  %v5043_v33 = vld [vmem:[%s6271_s22 + $0x2d4] ss:$24 sps:$4 sm:$0xff]   ;;  %v5045_v34 = vld [vmem:[%s6271_s22 + $0x2d0] ss:$24 sps:$4 sm:$0xff]  }
 0x150   : > { %1510 = vmatprep.subr.bf16.mxu1 %v5007_v8  ;;  %v5048_v35 = vld [vmem:[%s6271_s22 + $0xc] ss:$24 sps:$4 sm:$0xff]   ;;  %v5046_v37 = vld [vmem:[%s6271_s22 + $0x8] ss:$24 sps:$4 sm:$0xff]   ;;  %v5051_v38 = vld [vmem:[%s6271_s22 + $0x3c] ss:$24 sps:$4 sm:$0xff]  }
 0x151   : > { %v6369_v36 = vld [vmem:[#allocation2] sm:$0xff]  ;;  %v5049_v39 = vld [vmem:[%s6271_s22 + $0x38] ss:$24 sps:$4 sm:$0xff]   ;;  %v5057_v42 = vld [vmem:[%s6271_s22 + $0x9c] ss:$24 sps:$4 sm:$0xff]   ;;  %vm1715_vm1 = vcmask 523264  }
 0x152   : > { %v5054_v40 = vld [vmem:[%s6271_s22 + $0x6c] ss:$24 sps:$4 sm:$0xff]   ;;  %v5052_v41 = vld [vmem:[%s6271_s22 + $0x68] ss:$24 sps:$4 sm:$0xff]   ;;  %v5055_v43 = vld [vmem:[%s6271_s22 + $0x98] ss:$24 sps:$4 sm:$0xff]  }
 0x153   : > { %1511 = vmatpush1.bf16.msra.mxu1 %v5009_v9  ;;  %v5060_v44 = vld [vmem:[%s6271_s22 + $0xcc] ss:$24 sps:$4 sm:$0xff]   ;;  %v5058_v45 = vld [vmem:[%s6271_s22 + $0xc8] ss:$24 sps:$4 sm:$0xff]   ;;  %v5063_v46 = vld [vmem:[%s6271_s22 + $0xfc] ss:$24 sps:$4 sm:$0xff]  }
 0x154   : > { %1512 = vmatprep.subr.bf16.mxu1 %v5010_v10  ;;  %v5061_v47 = vld [vmem:[%s6271_s22 + $0xf8] ss:$24 sps:$4 sm:$0xff]   ;;  %v5066_v48 = vld [vmem:[%s6271_s22 + $0x12c] ss:$24 sps:$4 sm:$0xff]   ;;  %v5064_v49 = vld [vmem:[%s6271_s22 + $0x128] ss:$24 sps:$4 sm:$0xff]  }
 0x155   : > { %v5069_v50 = vld [vmem:[%s6271_s22 + $0x15c] ss:$24 sps:$4 sm:$0xff]   ;;  %v5067_v51 = vld [vmem:[%s6271_s22 + $0x158] ss:$24 sps:$4 sm:$0xff]   ;;  %v5072_v52 = vld [vmem:[%s6271_s22 + $0x18c] ss:$24 sps:$4 sm:$0xff]  }
 0x156   : > { %v5070_v53 = vld [vmem:[%s6271_s22 + $0x188] ss:$24 sps:$4 sm:$0xff]   ;;  %v5075_v54 = vld [vmem:[%s6271_s22 + $0x1bc] ss:$24 sps:$4 sm:$0xff]   ;;  %v5073_v55 = vld [vmem:[%s6271_s22 + $0x1b8] ss:$24 sps:$4 sm:$0xff]  }
 0x157   : > { %1513 = vmatpush1.bf16.msra.mxu1 %v5012_v11  ;;  %v5078_v56 = vld [vmem:[%s6271_s22 + $0x1ec] ss:$24 sps:$4 sm:$0xff]   ;;  %v5076_v57 = vld [vmem:[%s6271_s22 + $0x1e8] ss:$24 sps:$4 sm:$0xff]   ;;  %v5081_v58 = vld [vmem:[%s6271_s22 + $0x21c] ss:$24 sps:$4 sm:$0xff]  }
 0x158   : > { %1514 = vmatprep.subr.bf16.mxu1 %v5013_v12  ;;  %v5079_v59 = vld [vmem:[%s6271_s22 + $0x218] ss:$24 sps:$4 sm:$0xff]   ;;  %v5084_v60 = vld [vmem:[%s6271_s22 + $0x24c] ss:$24 sps:$4 sm:$0xff]   ;;  %v5082_v61 = vld [vmem:[%s6271_s22 + $0x248] ss:$24 sps:$4 sm:$0xff]  }
 0x159   : > { %v5087_v62 = vld [vmem:[%s6271_s22 + $0x27c] ss:$24 sps:$4 sm:$0xff]   ;;  %v5085_v63 = vld [vmem:[%s6271_s22 + $0x278] ss:$24 sps:$4 sm:$0xff]   ;;  %v5090_v0 = vld [vmem:[%s6271_s22 + $0x2ac] ss:$24 sps:$4 sm:$0xff]  }
 0x15a   : > { %v5088_v1 = vld [vmem:[%s6271_s22 + $0x2a8] ss:$24 sps:$4 sm:$0xff]   ;;  %v5093_v2 = vld [vmem:[%s6271_s22 + $0x2dc] ss:$24 sps:$4 sm:$0xff]   ;;  %v5091_v3 = vld [vmem:[%s6271_s22 + $0x2d8] ss:$24 sps:$4 sm:$0xff]  }
 0x15b   : > { %1515 = vmatpush1.bf16.msra.mxu1 %v5015_v13  ;;  %v5094_v4 = vld [vmem:[%s6271_s22 + $0x14] ss:$24 sps:$4 sm:$0xff]   ;;  %v5096_v5 = vld [vmem:[%s6271_s22 + $0x10] ss:$24 sps:$4 sm:$0xff]   ;;  %v5097_v6 = vld [vmem:[%s6271_s22 + $0x44] ss:$24 sps:$4 sm:$0xff]  }
 0x15c   : > { %1516 = vmatprep.subr.bf16.mxu1 %v5016_v14  ;;  %1590 = vmatprep.subr.bf16.mxu0 %v5094_v4  ;;  %v5099_v7 = vld [vmem:[%s6271_s22 + $0x40] ss:$24 sps:$4 sm:$0xff]   ;;  %v5100_v8 = vld [vmem:[%s6271_s22 + $0x74] ss:$24 sps:$4 sm:$0xff]   ;;  %v5102_v9 = vld [vmem:[%s6271_s22 + $0x70] ss:$24 sps:$4 sm:$0xff]  }
 0x15d   : > { %1591 = vmatpush1.bf16.msra.mxu0 %v5096_v5  ;;  %v5103_v10 = vld [vmem:[%s6271_s22 + $0xa4] ss:$24 sps:$4 sm:$0xff]   ;;  %v5105_v11 = vld [vmem:[%s6271_s22 + $0xa0] ss:$24 sps:$4 sm:$0xff]   ;;  %v5106_v12 = vld [vmem:[%s6271_s22 + $0xd4] ss:$24 sps:$4 sm:$0xff]  }
 0x15e   : > { %1592 = vmatprep.subr.bf16.mxu0 %v5097_v6  ;;  %v5108_v13 = vld [vmem:[%s6271_s22 + $0xd0] ss:$24 sps:$4 sm:$0xff]   ;;  %v5109_v14 = vld [vmem:[%s6271_s22 + $0x104] ss:$24 sps:$4 sm:$0xff]   ;;  %s4542_s3 = sld [smem:[#allocation4 + $0x1]]  ;;  %s1656_s10 = sld [smem:[#allocation4]] }
 0x15f   : > { %1517 = vmatpush1.bf16.msra.mxu1 %v5018_v16  ;;  %v5112_v16 = vld [vmem:[%s6271_s22 + $0x134] ss:$24 sps:$4 sm:$0xff]   ;;  %vm1767_vm10 = vcmask 130048   ;;  %s6992_s28 = sld [smem:[#allocation37_spill]]  ;;  %p4715_p2 = scmp.ne.s32.totalorder %s5973_s25, 1 }
 0x160   : > { %1518 = vmatprep.subr.bf16.mxu1 %v5019_v17  ;;  %v5114_v17 = vld [vmem:[%s6271_s22 + $0x130] ss:$24 sps:$4 sm:$0xff]   ;;  %vm3724_vm11 = vcmask (!%p4715_p2), 1040384   ;;  %s6999_s4 = sld [smem:[#allocation47_spill]] (!%p4715_p2) }
 0x161   : > { %1593 = vmatpush1.bf16.msra.mxu0 %v5099_v7 }
 0x162   : > { %1594 = vmatprep.subr.bf16.mxu0 %v5100_v8 }
 0x163   : > { %1519 = vmatpush1.bf16.msra.mxu1 %v5021_v18  ;;  %v5115_v18 = vld [vmem:[%s6271_s22 + $0x164] ss:$24 sps:$4 sm:$0xff]  }
 0x164   : > { %1520 = vmatprep.subr.bf16.mxu1 %v5022_v19  ;;  %v5117_v19 = vld [vmem:[%s6271_s22 + $0x160] ss:$24 sps:$4 sm:$0xff]  }
 0x165   : > { %1595 = vmatpush1.bf16.msra.mxu0 %v5102_v9  ;;  %s6993_s29 = scalar_lea.vmem %s6992_s28, %s6303_s24 }
 0x166   : > { %1596 = vmatprep.subr.bf16.mxu0 %v5103_v10 }
 0x167   : > { %1521 = vmatpush1.bf16.msra.mxu1 %v5024_v20  ;;  %v5118_v20 = vld [vmem:[%s6271_s22 + $0x194] ss:$24 sps:$4 sm:$0xff]  }
 0x168   : > { %1522 = vmatprep.subr.bf16.mxu1 %v5025_v21  ;;  %v5120_v21 = vld [vmem:[%s6271_s22 + $0x190] ss:$24 sps:$4 sm:$0xff]  }
 0x169   : > { %1597 = vmatpush1.bf16.msra.mxu0 %v5105_v11 }
 0x16a   : > { %1598 = vmatprep.subr.bf16.mxu0 %v5106_v12 }
 0x16b   : > { %1523 = vmatpush1.bf16.msra.mxu1 %v5027_v22  ;;  %v5121_v22 = vld [vmem:[%s6271_s22 + $0x1c4] ss:$24 sps:$4 sm:$0xff]  }
 0x16c   : > { %1524 = vmatprep.subr.bf16.mxu1 %v5028_v23  ;;  %v5123_v23 = vld [vmem:[%s6271_s22 + $0x1c0] ss:$24 sps:$4 sm:$0xff]  }
 0x16d   : > { %1599 = vmatpush1.bf16.msra.mxu0 %v5108_v13 }
 0x16e   : > { %1600 = vmatprep.subr.bf16.mxu0 %v5109_v14 }
 0x16f   : > { %1525 = vmatpush1.bf16.msra.mxu1 %v5030_v24  ;;  %v5124_v24 = vld [vmem:[%s6271_s22 + $0x1f4] ss:$24 sps:$4 sm:$0xff]  }
 0x170   : > { %1526 = vmatprep.subr.bf16.mxu1 %v5031_v25  ;;  %v5126_v25 = vld [vmem:[%s6271_s22 + $0x1f0] ss:$24 sps:$4 sm:$0xff]  }
 0x173   : > { %1527 = vmatpush1.bf16.msra.mxu1 %v5033_v26  ;;  %v5127_v26 = vld [vmem:[%s6271_s22 + $0x224] ss:$24 sps:$4 sm:$0xff]  }
 0x174   : > { %1528 = vmatprep.subr.bf16.mxu1 %v5034_v27  ;;  %v5129_v27 = vld [vmem:[%s6271_s22 + $0x220] ss:$24 sps:$4 sm:$0xff]  }
 0x177   : > { %1529 = vmatpush1.bf16.msra.mxu1 %v5036_v28  ;;  %v5130_v28 = vld [vmem:[%s6271_s22 + $0x254] ss:$24 sps:$4 sm:$0xff]  }
 0x178   : > { %1530 = vmatprep.subr.bf16.mxu1 %v5037_v29  ;;  %v5132_v29 = vld [vmem:[%s6271_s22 + $0x250] ss:$24 sps:$4 sm:$0xff]  }
 0x17b   : > { %1531 = vmatpush1.bf16.msra.mxu1 %v5039_v30  ;;  %v5133_v30 = vld [vmem:[%s6271_s22 + $0x284] ss:$24 sps:$4 sm:$0xff]  }
 0x17c   : > { %1532 = vmatprep.subr.bf16.mxu1 %v5040_v31  ;;  %v5135_v31 = vld [vmem:[%s6271_s22 + $0x280] ss:$24 sps:$4 sm:$0xff]  }
 0x17f   : > { %1533 = vmatpush1.bf16.msra.mxu1 %v5042_v32  ;;  %v5136_v32 = vld [vmem:[%s6271_s22 + $0x2b4] ss:$24 sps:$4 sm:$0xff]  }
 0x180   : > { %1534 = vmatprep.subr.bf16.mxu1 %v5043_v33  ;;  %v5138_v33 = vld [vmem:[%s6271_s22 + $0x2b0] ss:$24 sps:$4 sm:$0xff]  }
 0x183   : > { %1535 = vmatpush1.bf16.msra.mxu1 %v5045_v34  ;;  %v5139_v34 = vld [vmem:[%s6271_s22 + $0x2e4] ss:$24 sps:$4 sm:$0xff]  }
 0x184   : > { %1547 = vmatprep.subr.bf16.mxu1 %v5048_v35  ;;  %v5141_v35 = vld [vmem:[%s6271_s22 + $0x2e0] ss:$24 sps:$4 sm:$0xff]  }
 0x186   : > { %1537 = vmatmul.mubr.bf16.vlgmr.msra.gmra.mrb[0].mxu1 %v6369_v36 }
 0x187   : > { %1548 = vmatpush1.bf16.msra.mxu1 %v5046_v37  ;;  %1579 = vmatprep.mubr.bf16.mxu1 %v895_v15  ;;  %v5111_v15 = vld [vmem:[%s6271_s22 + $0x100] ss:$24 sps:$4 sm:$0xff]   ;;  %v5841_v37 = vmov 0.0   ;;  %s1676_s22 = sadd.s32 8, %s4542_s3  ;;  %s7000_s3 = sld [smem:[#allocation48_spill]] (!%p4715_p2) }
 0x188   : > { %1549 = vmatprep.subr.bf16.mxu1 %v5051_v38  ;;  %1601 = vmatpush1.bf16.msra.mxu0 %v5111_v15  ;;  %v994_v38 = vlaneseq }
 0x189   : > { %1602 = vmatprep.subr.bf16.mxu0 %v5112_v16 }
 0x18b   : > { %1550 = vmatpush1.bf16.msra.mxu1 %v5049_v39  ;;  %v6443_v39 = vshrl.u32 %v994_v38, 7 }
 0x18c   : > { %1551 = vmatprep.subr.bf16.mxu1 %v5054_v40  ;;  %1603 = vmatpush1.bf16.msra.mxu0 %v5114_v17 }
 0x18d   : > { %1604 = vmatprep.subr.bf16.mxu0 %v5115_v18  ;;  %v6446_v40 = vsub.s32 0, %v6443_v39  ;;  %v1012_v6 = vsub.s32 4, %v6443_v39  ;;  %v1016_v7 = vsub.s32 5, %v6443_v39 }
 0x18f   : > { %1552 = vmatpush1.bf16.msra.mxu1 %v5052_v41  ;;  %v992_v41 = vld [vmem:[%s6277_s9] sm:$0x3f]  ;;  %s5844_s9 = smov 64  }
 0x190   : > { %1553 = vmatprep.subr.bf16.mxu1 %v5057_v42  ;;  %1605 = vmatpush1.bf16.msra.mxu0 %v5117_v19  ;;  %v997_v42 = vrot.slane %v992_v41, %v6446_v40  ;;  %v1013_v8 = vrot.slane %v992_v41, %v1012_v6  ;;  %v1017_v9 = vrot.slane %v992_v41, %v1016_v7 }
 0x191   : > { %1606 = vmatprep.subr.bf16.mxu0 %v5118_v20  ;;  %v1643_v20 = vand.u32 127, %v994_v38 }
 0x193   : > { %1554 = vmatpush1.bf16.msra.mxu1 %v5055_v43  ;;  %vm1669_vm2 = vcmp.ge.s32.totalorder %v1643_v20, 8  ;;  %vm1672_vm3 = vcmp.lt.s32.totalorder %v1643_v20, 16  ;;  %vm1653_vm4 = vcmp.lt.s32.totalorder %v1643_v20, 8 }
 0x194   : > { %1555 = vmatprep.subr.bf16.mxu1 %v5060_v44  ;;  %1607 = vmatpush1.bf16.msra.mxu0 %v5120_v21  ;;  %v1657_v21 = vstv %s1656_s10  ;;  %vm1674_vm6 = vmand %vm1669_vm2, %vm1672_vm3 }
 0x195   : > { %1608 = vmatprep.subr.bf16.mxu0 %v5121_v22  ;;  %v1677_v22 = vstv %s1676_s22  ;;  %vm1658_vm5 = vcmp.lt.s32.totalorder %v1643_v20, %v1657_v21 }
 0x196   : > { %vm1678_vm7 = vcmp.lt.s32.totalorder %v1643_v20, %v1677_v22  ;;  %vm1659_vm8 = vmand %vm1653_vm4, %vm1658_vm5 }
 0x197   : > { %1556 = vmatpush1.bf16.msra.mxu1 %v5058_v45  ;;  %vm1680_vm9 = vmand %vm1674_vm6, %vm1678_vm7 }
 0x198   : > { %1557 = vmatprep.subr.bf16.mxu1 %v5063_v46  ;;  %1609 = vmatpush1.bf16.msra.mxu0 %v5123_v23 }
 0x199   : > { %1610 = vmatprep.subr.bf16.mxu0 %v5124_v24  ;;  %v5843_v24 = vmov -1000000.0  }
 0x19b   : > { %1558 = vmatpush1.bf16.msra.mxu1 %v5061_v47 }
 0x19c   : > { %1559 = vmatprep.subr.bf16.mxu1 %v5066_v48  ;;  %1611 = vmatpush1.bf16.msra.mxu0 %v5126_v25  ;;  %v6487_v25 = vsel %vm1659_vm8, 0.0, %v5843_v24 }
 0x19d   : > { %1612 = vmatprep.subr.bf16.mxu0 %v5127_v26 }
 0x19f   : > { %1560 = vmatpush1.bf16.msra.mxu1 %v5064_v49 }
 0x1a0   : > { %1561 = vmatprep.subr.bf16.mxu1 %v5069_v50  ;;  %1613 = vmatpush1.bf16.msra.mxu0 %v5129_v27 }
 0x1a1   : > { %1614 = vmatprep.subr.bf16.mxu0 %v5130_v28 }
 0x1a3   : > { %1562 = vmatpush1.bf16.msra.mxu1 %v5067_v51 }
 0x1a4   : > { %1563 = vmatprep.subr.bf16.mxu1 %v5072_v52  ;;  %1615 = vmatpush1.bf16.msra.mxu0 %v5132_v29  ;;  %v6489_v29 = vsel %vm1680_vm9, 0.0, %v5843_v24 }
 0x1a5   : > { %1616 = vmatprep.subr.bf16.mxu0 %v5133_v30 }
 0x1a7   : > { %1564 = vmatpush1.bf16.msra.mxu1 %v5070_v53 }
 0x1a8   : > { %1565 = vmatprep.subr.bf16.mxu1 %v5075_v54  ;;  %1617 = vmatpush1.bf16.msra.mxu0 %v5135_v31  ;;  %v1004_v54 = vsub.s32 2, %v6443_v39 }
 0x1a9   : > { %1618 = vmatprep.subr.bf16.mxu0 %v5136_v32 }
 0x1ab   : > { %1566 = vmatpush1.bf16.msra.mxu1 %v5073_v55  ;;  %v1008_v55 = vsub.s32 3, %v6443_v39 }
 0x1ac   : > { %1567 = vmatprep.subr.bf16.mxu1 %v5078_v56  ;;  %1619 = vmatpush1.bf16.msra.mxu0 %v5138_v33  ;;  %v1005_v56 = vrot.slane %v992_v41, %v1004_v54 }
 0x1ad   : > { %1620 = vmatprep.subr.bf16.mxu0 %v5139_v34 }
 0x1af   : > { %1568 = vmatpush1.bf16.msra.mxu1 %v5076_v57 }
 0x1b0   : > { %1569 = vmatprep.subr.bf16.mxu1 %v5081_v58  ;;  %1621 = vmatpush1.bf16.msra.mxu0 %v5141_v35  ;;  %v1009_v58 = vrot.slane %v992_v41, %v1008_v55 }
 0x1b1   : > { %4810 = vmatprep.subr.bf16.mxu0 %v5841_v37 }
 0x1b3   : > { %1570 = vmatpush1.bf16.msra.mxu1 %v5079_v59  ;;  %1623 = vmatmul.mubr.bf16.vlgmr.msra.gmra.mrb[0].mxu0 %v6369_v36 }
 0x1b4   : > { %1571 = vmatprep.subr.bf16.mxu1 %v5084_v60  ;;  %4812 = vmatprep.mubr.msk.bf16.mxu0 %vm5842_vm0, %v5841_v37 }
 0x1b7   : > { %1572 = vmatpush1.bf16.msra.mxu1 %v5082_v61 }
 0x1b8   : > { %1573 = vmatprep.subr.bf16.mxu1 %v5087_v62 }
 0x1bb   : > { %1574 = vmatpush1.bf16.msra.mxu1 %v5085_v63 }
 0x1bc   : > { %1575 = vmatprep.subr.bf16.mxu1 %v5090_v0 }
 0x1bf   : > { %1576 = vmatpush1.bf16.msra.mxu1 %v5088_v1 }
 0x1c0   : > { %1577 = vmatprep.subr.bf16.mxu1 %v5093_v2 }
 0x1c3   : > { %1578 = vmatpush1.bf16.msra.mxu1 %v5091_v3 }
 0x1c4   : > { %4816 = vmatprep.subr.bf16.mxu1 %v5841_v37 }
 0x1c6   : > { %1580 = vmatmul.mubr.bf16.vlgmr.msra.gmra.mrb[4].mxu1 %v6369_v36  ;;  %v6450_v36 = vsub.s32 1, %v6443_v39 }
 0x1c7   : > { %4818 = vmatprep.mubr.msk.bf16.mxu1 %vm5842_vm0, %v5841_v37 }
 0x1c8   : > { %v1001_v44 = vrot.slane %v992_v41, %v6450_v36 }
 0x259   : > { %v1538_v43 = vpop.f32.mrb[0].mxu1 }
 0x25a   : > { %v1539_v45 = vadd.f32 %v1538_v43, %v997_v42  ;;  %v1540_v46 = vpop.f32.mrb[1].mxu1 }
 0x25b   : > { %v1542_v47 = vpop.f32.mrb[2].mxu1  ;;  %v1541_v50 = vadd.f32 %v1540_v46, %v1001_v44 }
 0x25c   : > { %v1543_v48 = vadd.f32 %v1542_v47, %v997_v42  ;;  %v1544_v49 = vpop.f32.mrb[3].mxu1 }
 0x25d   : > { %v1545_v51 = vadd.f32 %v1544_v49, %v1001_v44 }
 0x25e   : > { %v6454_v52 = vpack.c.bf16 %v1543_v48, %v1539_v45 }
 0x25f   : > { %v6456_v53 = vpack.c.bf16 %v1545_v51, %v1541_v50 }
 0x286   : > { %v1624_v10 = vpop.f32.mrb[0].mxu0 }
 0x287   : > { %v1625_v11 = vadd.f32 %v1624_v10, %v1013_v8  ;;  %v1626_v12 = vpop.f32.mrb[1].mxu0 }
 0x288   : > { %v1627_v13 = vadd.f32 %v1626_v12, %v1017_v9  ;;  %v1628_v14 = vpop.f32.mrb[2].mxu0 }
 0x289   : > { %v1629_v15 = vadd.f32 %v1628_v14, %v1013_v8  ;;  %v1630_v16 = vpop.f32.mrb[3].mxu0 }
 0x28a   : > { %v1631_v17 = vadd.f32 %v1630_v16, %v1017_v9 }
 0x28b   : > { %v6481_v18 = vpack.c.bf16 %v1629_v15, %v1625_v11 }
 0x28c   : > { %v6483_v19 = vpack.c.bf16 %v1631_v17, %v1627_v13 }
 0x28d   : > { %4817 = vmatpush3.bf16.msra.mxu1 %v6481_v18 }
 0x28e   : > { %4822 = vmatprep.subr.bf16.mxu1 %v5841_v37 }
 0x299   : > { %v1581_v57 = vpop.f32.mrb[4].mxu1 }
 0x29a   : > { %v1583_v59 = vpop.f32.mrb[5].mxu1  ;;  %v1582_v61 = vadd.f32 %v1581_v57, %v1005_v56 }
 0x29b   : > { %v1585_v60 = vpop.f32.mrb[6].mxu1  ;;  %v1584_v0 = vadd.f32 %v1583_v59, %v1009_v58 }
 0x29c   : > { %v1586_v62 = vadd.f32 %v1585_v60, %v1005_v56  ;;  %v1587_v63 = vpop.f32.mrb[7].mxu1 }
 0x29d   : > { %v1588_v1 = vadd.f32 %v1587_v63, %v1009_v58 }
 0x29e   : > { %v1635_v2 = vpack.c.bf16 %v1586_v62, %v1582_v61 }
 0x29f   : > { %v6464_v3 = vpack.c.bf16 %v1588_v1, %v1584_v0 }
 0x2a0   : > { %v1720_v4 = vsel %vm1715_vm1, %v1635_v2, 0 }
 0x2a1   : > { %4811 = vmatpush3.bf16.xpose.msra.mxu0 %v1720_v4  ;;  %v2141_v5 = vsel %vm1715_vm1, %v6464_v3, 0 }
 0x2a2   : > { %4834 = vmatprep.subr.bf16.mxu0 %v5841_v37 }
 0x2a8   : > { %4813 = vmatmul.mubr.msk.bf16.vlgmr.msra.gmra.mrb[4].mxu0 %vm1715_vm1, %v6454_v52 }
 0x2a9   : > { %4835 = vmatpush3.bf16.xpose.msra.mxu0 %v2141_v5  ;;  %4836 = vmatprep.mubr.msk.bf16.mxu0 %vm5842_vm0, %v5841_v37 }
 0x2aa   : > { %4846 = vmatprep.subr.bf16.mxu0 %v5841_v37 }
 0x2b0   : > { %4837 = vmatmul.mubr.msk.bf16.vlgmr.msra.gmra.mrb[8].mxu0 %vm1715_vm1, %v6456_v53 }
 0x2b1   : > { %4848 = vmatprep.mubr.msk.bf16.mxu0 %vm5842_vm0, %v5841_v37 }
 0x37b   : > { %v1756_v23 = vpop.f32.mrb[4].mxu0 }
 0x37c   : > { %v1763_v26 = vmul.f32 0.125, %v1756_v23  ;;  %v4814_v27 = vpop.f32.mrb[5].mxu0 }
 0x37d   : > { %v1759_v28 = vpop.f32.mrb[6].mxu0 }
 0x37e   : > { %v1764_v30 = vmul.f32 0.125, %v1759_v28  ;;  %v4815_v31 = vpop.f32.mrb[7].mxu0  ;;  %v1765_v32 = vadd.f32 %v1763_v26, %v6487_v25 }
 0x380   : > { %v1768_v33 = vsel %vm1767_vm10, %v1765_v32, -inf  ;;  %v1766_v34 = vadd.f32 %v1764_v30, %v6489_v29 }
 0x381   : > { %1769 = vmax.xlane.f32.xlu0 %v1768_v33 }
 0x382   : > { %v1771_v41 = vsel %vm1767_vm10, %v1766_v34, -inf }
 0x383   : > { %v2177_v35 = vpop.f32.mrb[8].mxu0 }
 0x384   : > { %v4838_v38 = vpop.f32.mrb[9].mxu0  ;;  %v2184_v20 = vmul.f32 0.125, %v2177_v35 }
 0x385   : > { %1772 = vmax.xlane.f32.xlu0 %v1771_v41  ;;  %v6495_v42 = vpop.f32.mrb[10].mxu0 }
 0x386   : > { %v4839_v43 = vpop.f32.mrb[11].mxu0  ;;  %v2185_v27 = vmul.f32 0.125, %v6495_v42  ;;  %v2186_v30 = vadd.f32 %v2184_v20, %v6487_v25 }
 0x388   : > { %v2187_v33 = vadd.f32 %v2185_v27, %v6489_v29 }
 0x38a   : > { %v2191_v35 = vsel %vm1767_vm10, %v2187_v33, -inf }
 0x39b   : > { %1840 = vrot.lane.b32.xlu0 %v1635_v2, %s5844_s9 }
 0x40e   : > { %v1770_v44 = vpop.xlane.xlu0 %1769 }
 0x40f   : > { %v1774_v45 = vsub.f32 %v1765_v32, %v1770_v44  ;;  %v2188_v32 = vsel %vm1767_vm10, %v2186_v30, -inf }
 0x411   : > { %v1776_v46 = vmul.f32 1.442695, %v1774_v45 }
 0x412   : > { %v1773_v47 = vpop.xlane.xlu0 %1772 }
 0x413   : > { %5382 = vpow2.f32 %v1776_v46  ;;  %v1775_v48 = vsub.f32 %v1766_v34, %v1773_v47 }
 0x415   : > { %v1778_v49 = vmul.f32 1.442695, %v1775_v48 }
 0x416   : > { %v1841_v2 = vpop.permute.xlu0 %1840 }
 0x417   : > { %5384 = vpow2.f32 %v1778_v49  ;;  %v1846_v4 = vsel %vm1715_vm1, %v1841_v2, 0 }
 0x41d   : > { %v5383_v50 = vpop.eup %5382 }
 0x41e   : > { %v1780_v51 = vsel %vm1767_vm10, %v5383_v50, 0.0 }
 0x41f   : > { %1781 = vadd.xlane.f32.xlu1 %v1780_v51 }
 0x421   : > { %v5385_v56 = vpop.eup %5384 }
 0x422   : > { %v1783_v57 = vsel %vm1767_vm10, %v5385_v56, 0.0 }
 0x423   : > { %1784 = vadd.xlane.f32.xlu1 %v1783_v57 }
 0x434   : > { %1837 = vrot.lane.b32.xlu1 %v6454_v52, %s5844_s9 }
 0x438   : > { %2350 = vrot.lane.b32.xlu1 %v6464_v3, %s5844_s9 }
 0x43c   : > { %2347 = vrot.lane.b32.xlu1 %v6456_v53, %s5844_s9 }
 0x4ac   : > { %v1782_v58 = vpop.xlane.xlu1 %1781 }
 0x4ad   : > { %5386 = vrcp.f32 %v1782_v58 }
 0x4b0   : > { %v1785_v59 = vpop.xlane.xlu1 %1784 }
 0x4b1   : > { %5388 = vrcp.f32 %v1785_v59 }
 0x4b4   : > { %v1838_v60 = vpop.permute.xlu1 %1837 }
 0x4b7   : > { %v5387_v62 = vpop.eup %5386 }
 0x4b8   : > { %v2351_v61 = vpop.permute.xlu1 %2350  ;;  %v1788_v52 = vmul.f32 %v5387_v62, %v5383_v50 }
 0x4b9   : > { %v2356_v63 = vsel %vm1715_vm1, %v2351_v61, 0 }
 0x4ba   : > { %4847 = vmatpush3.bf16.xpose.msra.mxu0 %v2356_v63 }
 0x4bb   : > { %v5389_v0 = vpop.eup %5388  ;;  %4852 = vmatprep.subr.bf16.mxu0 %v5841_v37 }
 0x4bc   : > { %v1789_v1 = vmul.f32 %v5389_v0, %v5385_v56  ;;  %v2348_v53 = vpop.permute.xlu1 %2347 }
 0x4be   : > { %v1790_v3 = vpack.c.bf16 %v1789_v1, %v1788_v52 }
 0x4c0   : > { %4819 = vmatmul.mubr.msk.bf16.vlgmr.msra.gmra.mrb[8].mxu1 %vm1767_vm10, %v1790_v3 }
 0x4c1   : > { %4823 = vmatpush3.bf16.xpose.msra.mxu1 %v1846_v4  ;;  %4849 = vmatmul.mubr.msk.bf16.vlgmr.msra.gmra.mrb[12].mxu0 %vm1715_vm1, %v2348_v53 }
 0x4c2   : > { %4824 = vmatprep.mubr.msk.bf16.mxu1 %vm5842_vm0, %v5841_v37  ;;  %4828 = vmatprep.subr.bf16.mxu1 %v5841_v37 }
 0x4c3   : > { %4854 = vmatprep.mubr.msk.bf16.mxu0 %vm5842_vm0, %v5841_v37 }
 0x4c8   : > { %4825 = vmatmul.mubr.msk.bf16.vlgmr.msra.gmra.mrb[12].mxu1 %vm1715_vm1, %v1838_v60 }
 0x4c9   : > { %4830 = vmatprep.mubr.msk.bf16.mxu1 %vm5842_vm0, %v5841_v37 }
 0x593   : > { %v6519_v5 = vpop.f32.mrb[8].mxu1 }
 0x594   : > { %v4820_v6 = vpop.f32.mrb[9].mxu1  ;;  %v2392_v7 = vpop.f32.mrb[12].mxu0 }
 0x595   : > { %v6521_v8 = vpop.f32.mrb[10].mxu1  ;;  %v4850_v9 = vpop.f32.mrb[13].mxu0  ;;  %v2399_v31 = vmul.f32 0.125, %v2392_v7 }
 0x596   : > { %v1835_v10 = vpack.c.bf16 %v6521_v8, %v6519_v5  ;;  %v4821_v11 = vpop.f32.mrb[11].mxu1  ;;  %v2395_v12 = vpop.f32.mrb[14].mxu0  ;;  %v5174_v5 = vld [vmem:[%s6279_s20 + $0xa4] ss:$8 sps:$4 sm:$0xff]   ;;  %v5172_v8 = vld [vmem:[%s6279_s20 + $0xa0] ss:$8 sps:$4 sm:$0xff]  }
 0x597   : > { %v4851_v13 = vpop.f32.mrb[15].mxu0  ;;  %v2400_v34 = vmul.f32 0.125, %v2395_v12  ;;  %v2401_v38 = vadd.f32 %v2399_v31, %v6487_v25 }
 0x599   : > { %v2403_v41 = vsel %vm1767_vm10, %v2401_v38, -inf  ;;  %v2402_v42 = vadd.f32 %v2400_v34, %v6489_v29 }
 0x59b   : > { %v1882_v14 = vpop.f32.mrb[12].mxu1  ;;  %v2406_v43 = vsel %vm1767_vm10, %v2402_v42, -inf }
 0x59c   : > { %v1889_v15 = vmul.f32 0.125, %v1882_v14  ;;  %v4826_v16 = vpop.f32.mrb[13].mxu1 }
 0x59d   : > { %v1885_v17 = vpop.f32.mrb[14].mxu1  ;;  %v5144_v16 = vld [vmem:[%s6279_s20 + $0x44] ss:$8 sps:$4 sm:$0xff]  }
 0x59e   : > { %v1890_v21 = vmul.f32 0.125, %v1885_v17  ;;  %v4827_v22 = vpop.f32.mrb[15].mxu1  ;;  %v1891_v23 = vadd.f32 %v1889_v15, %v6487_v25 }
 0x5a0   : > { %v1893_v24 = vsel %vm1767_vm10, %v1891_v23, -inf  ;;  %v1892_v26 = vadd.f32 %v1890_v21, %v6489_v29 }
 0x5a1   : > { %1894 = vmax.xlane.f32.xlu0 %v1893_v24  ;;  %v5142_v24 = vld [vmem:[%s6279_s20 + $0x40] ss:$8 sps:$4 sm:$0xff]  }
 0x5a2   : > { %v1896_v28 = vsel %vm1767_vm10, %v1892_v26, -inf }
 0x5a3   : > { %1897 = vmax.xlane.f32.xlu1 %v1896_v28  ;;  %v5147_v28 = vld [vmem:[%s6279_s20 + $0x54] ss:$8 sps:$4 sm:$0xff]  }
 0x5a7   : > { %2189 = vmax.xlane.f32.xlu1 %v2188_v32  ;;  %v5145_v32 = vld [vmem:[%s6279_s20 + $0x50] ss:$8 sps:$4 sm:$0xff]  }
 0x5ab   : > { %2192 = vmax.xlane.f32.xlu1 %v2191_v35 }
 0x5af   : > { %2404 = vmax.xlane.f32.xlu1 %v2403_v41 }
 0x5b3   : > { %2407 = vmax.xlane.f32.xlu1 %v2406_v43 }
 0x62e   : > { %v1895_v44 = vpop.xlane.xlu0 %1894 }
 0x62f   : > { %v1899_v45 = vsub.f32 %v1891_v23, %v1895_v44 }
 0x630   : > { %v1898_v46 = vpop.xlane.xlu1 %1897 }
 0x631   : > { %v1901_v47 = vmul.f32 1.442695, %v1899_v45  ;;  %v1900_v48 = vsub.f32 %v1892_v26, %v1898_v46 }
 0x633   : > { %5390 = vpow2.f32 %v1901_v47  ;;  %v1903_v49 = vmul.f32 1.442695, %v1900_v48 }
 0x634   : > { %v2190_v50 = vpop.xlane.xlu1 %2189 }
 0x635   : > { %5392 = vpow2.f32 %v1903_v49  ;;  %v2194_v51 = vsub.f32 %v2186_v30, %v2190_v50  ;;  %v5153_v49 = vld [vmem:[%s6279_s20 + $0x74] ss:$8 sps:$4 sm:$0xff]   ;;  %v5151_v50 = vld [vmem:[%s6279_s20 + $0x70] ss:$8 sps:$4 sm:$0xff]  }
 0x637   : > { %v2196_v25 = vmul.f32 1.442695, %v2194_v51  ;;  %v5156_v51 = vld [vmem:[%s6279_s20 + $0x4] ss:$8 sps:$4 sm:$0xff]  }
 0x638   : > { %v2193_v56 = vpop.xlane.xlu1 %2192 }
 0x639   : > { %5394 = vpow2.f32 %v2196_v25  ;;  %v2195_v57 = vsub.f32 %v2187_v33, %v2193_v56  ;;  %v5845_v25 = vmov 0  }
 0x63b   : > { %v2198_v58 = vmul.f32 1.442695, %v2195_v57 }
 0x63c   : > { %v2405_v29 = vpop.xlane.xlu1 %2404 }
 0x63d   : > { %v5391_v59 = vpop.eup %5390  ;;  %5396 = vpow2.f32 %v2198_v58  ;;  %v2409_v7 = vsub.f32 %v2401_v38, %v2405_v29  ;;  %v5150_v38 = vld [vmem:[%s6279_s20 + $0x64] ss:$8 sps:$4 sm:$0xff]   ;;  %v5154_v29 = vld [vmem:[%s6279_s20] ss:$8 sps:$4 sm:$0xff]  }
 0x63e   : > { %v1905_v60 = vsel %vm1767_vm10, %v5391_v59, 0.0 }
 0x63f   : > { %v5393_v61 = vpop.eup %5392  ;;  %1906 = vadd.xlane.f32.xlu0 %v1905_v60  ;;  %v2411_v9 = vmul.f32 1.442695, %v2409_v7 }
 0x640   : > { %v2408_v62 = vpop.xlane.xlu1 %2407  ;;  %v1908_v0 = vsel %vm1767_vm10, %v5393_v61, 0.0 }
 0x641   : > { %v2410_v63 = vsub.f32 %v2402_v42, %v2408_v62  ;;  %v5148_v42 = vld [vmem:[%s6279_s20 + $0x60] ss:$8 sps:$4 sm:$0xff]   ;;  %v5157_v62 = vld [vmem:[%s6279_s20 + $0x10] ss:$8 sps:$4 sm:$0xff]  }
 0x643   : > { %v5395_v52 = vpop.eup %5394  ;;  %v2413_v1 = vmul.f32 1.442695, %v2410_v63  ;;  %1909 = vadd.xlane.f32.xlu0 %v1908_v0  ;;  %v5162_v63 = vld [vmem:[%s6279_s20 + $0x24] ss:$8 sps:$4 sm:$0xff]   ;;  %v5160_v0 = vld [vmem:[%s6279_s20 + $0x20] ss:$8 sps:$4 sm:$0xff]  }
 0x644   : > { %v2200_v2 = vsel %vm1767_vm10, %v5395_v52, 0.0 }
 0x645   : > { %5398 = vpow2.f32 %v2413_v1  ;;  %2201 = vadd.xlane.f32.xlu1 %v2200_v2  ;;  %v5163_v1 = vld [vmem:[%s6279_s20 + $0x30] ss:$8 sps:$4 sm:$0xff]   ;;  %v5168_v2 = vld [vmem:[%s6279_s20 + $0x84] ss:$8 sps:$4 sm:$0xff]  }
 0x646   : > { %5400 = vpow2.f32 %v2411_v9  ;;  %v5177_v9 = vld [vmem:[%s6279_s20 + $0xb4] ss:$8 sps:$4 sm:$0xff]  }
 0x647   : > { %v5397_v3 = vpop.eup %5396 }
 0x648   : > { %v2203_v4 = vsel %vm1767_vm10, %v5397_v3, 0.0 }
 0x649   : > { %2204 = vadd.xlane.f32.xlu1 %v2203_v4  ;;  %v5171_v4 = vld [vmem:[%s6279_s20 + $0x94] ss:$8 sps:$4 sm:$0xff]  }
 0x64f   : > { %v5399_v53 = vpop.eup %5398 }
 0x650   : > { %v2418_v6 = vsel %vm1767_vm10, %v5399_v53, 0.0  ;;  %v5401_v11 = vpop.eup %5400 }
 0x651   : > { %2419 = vadd.xlane.f32.xlu1 %v2418_v6  ;;  %v2415_v12 = vsel %vm1767_vm10, %v5401_v11, 0.0 }
 0x659   : > { %1917 = vrot.lane.b32.xlu0 %v6481_v18, %s5844_s9 }
 0x662   : > { %2427 = vrot.lane.b32.xlu1 %v6483_v19, %s5844_s9 }
 0x678   : > { %2416 = vadd.xlane.f32.xlu0 %v2415_v12  ;;  %v5180_v12 = vld [vmem:[%s6279_s20 + $0xc4] ss:$8 sps:$4 sm:$0xff]  }
 0x6cc   : > { %v1907_v13 = vpop.xlane.xlu0 %1906 }
 0x6cd   : > { %5402 = vrcp.f32 %v1907_v13 }
 0x6d0   : > { %v1910_v14 = vpop.xlane.xlu0 %1909 }
 0x6d1   : > { %5404 = vrcp.f32 %v1910_v14 }
 0x6d2   : > { %v2202_v15 = vpop.xlane.xlu1 %2201 }
 0x6d3   : > { %5406 = vrcp.f32 %v2202_v15 }
 0x6d4   : > { %v1918_v17 = vpop.permute.xlu0 %1917 }
 0x6d5   : > { %4829 = vmatpush3.bf16.msra.mxu1 %v1918_v17 }
 0x6d6   : > { %v2205_v18 = vpop.xlane.xlu1 %2204  ;;  %2008 = vmatprep.subr.bf16.mxu1 %v5144_v16  ;;  %v5178_v16 = vld [vmem:[%s6279_s20 + $0xc0] ss:$8 sps:$4 sm:$0xff]  }
 0x6d7   : > { %5408 = vrcp.f32 %v2205_v18  ;;  %v5403_v20 = vpop.eup %5402 }
 0x6d8   : > { %v1913_v22 = vmul.f32 %v5403_v20, %v5391_v59  ;;  %v5183_v20 = vld [vmem:[%s6279_s20 + $0xd4] ss:$8 sps:$4 sm:$0xff]  }
 0x6db   : > { %v5405_v21 = vpop.eup %5404 }
 0x6dc   : > { %v1914_v23 = vmul.f32 %v5405_v21, %v5393_v61  ;;  %v5159_v61 = vld [vmem:[%s6279_s20 + $0x14] ss:$8 sps:$4 sm:$0xff]   ;;  %v5181_v21 = vld [vmem:[%s6279_s20 + $0xd0] ss:$8 sps:$4 sm:$0xff]  }
 0x6dd   : > { %v5407_v30 = vpop.eup %5406 }
 0x6de   : > { %v2420_v26 = vpop.xlane.xlu1 %2419  ;;  %v1915_v27 = vpack.c.bf16 %v1914_v23, %v1913_v22  ;;  %v2208_v33 = vmul.f32 %v5407_v30, %v5395_v52  ;;  %v5165_v52 = vld [vmem:[%s6279_s20 + $0x34] ss:$8 sps:$4 sm:$0xff]   ;;  %v5186_v22 = vld [vmem:[%s6279_s20 + $0xe4] ss:$8 sps:$4 sm:$0xff]   ;;  %v5184_v23 = vld [vmem:[%s6279_s20 + $0xe0] ss:$8 sps:$4 sm:$0xff]  }
 0x6df   : > { %5410 = vrcp.f32 %v2420_v26  ;;  %v5187_v26 = vld [vmem:[%s6279_s20 + $0xf0] ss:$8 sps:$4 sm:$0xff]  }
 0x6e0   : > { %4831 = vmatmul.mubr.msk.bf16.vlgmr.msra.gmra.mrb[16].mxu1 %vm1767_vm10, %v1915_v27  ;;  %v2565_v27 = vld [vmem:[%s6993_s29] sm:$0x3] }
 0x6e1   : > { %v5409_v31 = vpop.eup %5408  ;;  %2009 = vmatpush1.bf16.msra.mxu1 %v5142_v24  ;;  %2040 = vmatprep.mubr.bf16.mxu1 %v5845_v25  ;;  %v5189_v24 = vld [vmem:[%s6279_s20 + $0xf4] ss:$8 sps:$4 sm:$0xff]   ;;  %v2574_v30 = vrot.slane %v2565_v27, %v6450_v36 }
 0x6e2   : > { %v2209_v34 = vmul.f32 %v5409_v31, %v5397_v3  ;;  %v2428_v35 = vpop.permute.xlu1 %2427  ;;  %2010 = vmatprep.subr.bf16.mxu1 %v5147_v28  ;;  %v5166_v3 = vld [vmem:[%s6279_s20 + $0x80] ss:$8 sps:$4 sm:$0xff]   ;;  %v2570_v28 = vrot.slane %v2565_v27, %v6446_v40  ;;  %v5422_v31 = vld [vmem:[#allocation2] sm:$0xff] }
 0x6e3   : > { %4853 = vmatpush3.bf16.msra.mxu0 %v2428_v35 }
 0x6e4   : > { %v2210_v41 = vpack.c.bf16 %v2209_v34, %v2208_v33  ;;  %v5423_v34 = vld [vmem:[#allocation2 + $0x8] sm:$0xff] }
 0x6e5   : > { %2011 = vmatpush1.bf16.msra.mxu1 %v5145_v32  ;;  %v2581_v32 = vunpack.c.l.bf16 %v5422_v31  ;;  %v2582_v35 = vunpack.c.l.bf16 %v5423_v34 }
 0x6e6   : > { %2012 = vmatprep.subr.bf16.mxu1 %v5150_v38 }
 0x6e9   : > { %2013 = vmatpush1.bf16.msra.mxu1 %v5148_v42  ;;  %v5411_v44 = vpop.eup %5410  ;;  %v2583_v42 = vunpack.c.h.bf16 %v5422_v31 }
 0x6ea   : > { %v2424_v46 = vmul.f32 %v5411_v44, %v5399_v53  ;;  %2014 = vmatprep.subr.bf16.mxu1 %v5153_v49  ;;  %v5169_v53 = vld [vmem:[%s6279_s20 + $0x90] ss:$8 sps:$4 sm:$0xff]  }
 0x6ed   : > { %2015 = vmatpush1.bf16.msra.mxu1 %v5151_v50 }
 0x6ee   : > { %2094 = vmatprep.subr.bf16.mxu1 %v5156_v51 }
 0x705   : > { %v2417_v43 = vpop.xlane.xlu0 %2416 }
 0x706   : > { %5412 = vrcp.f32 %v2417_v43 }
 0x710   : > { %v5413_v45 = vpop.eup %5412 }
 0x711   : > { %v2423_v47 = vmul.f32 %v5413_v45, %v5401_v11  ;;  %v5175_v11 = vld [vmem:[%s6279_s20 + $0xb0] ss:$8 sps:$4 sm:$0xff]   ;;  %v2584_v45 = vunpack.c.h.bf16 %v5423_v34 }
 0x713   : > { %v2425_v48 = vpack.c.bf16 %v2424_v46, %v2423_v47 }
 0x715   : > { %4855 = vmatmul.mubr.msk.bf16.vlgmr.msra.gmra.mrb[16].mxu0 %vm1767_vm10, %v2425_v48 }
 0x7b3   : > { %v1957_v56 = vpop.f32.mrb[16].mxu1 }
 0x7b4   : > { %v4832_v57 = vpop.f32.mrb[17].mxu1 }
 0x7b5   : > { %v1960_v58 = vpop.f32.mrb[18].mxu1 }
 0x7b6   : > { %v1964_v59 = vpack.c.bf16 %v1960_v58, %v1957_v56  ;;  %v4833_v60 = vpop.f32.mrb[19].mxu1  ;;  %v5190_v58 = vld [vmem:[%s6285_s5] ss:$16 sps:$4 sm:$0xff]  }
 0x7b7   : > { %v5195_v60 = vld [vmem:[%s6285_s5 + $0xc] ss:$16 sps:$4 sm:$0xff]  }
 0x7b8   : > { %4555 = vmatmul.mubr.msk.bf16.vlgmr.msra.gmra.mrb[20].mxu1 %vm1715_vm1, %v1964_v59  ;;  %v5193_v59 = vld [vmem:[%s6285_s5 + $0x8] ss:$16 sps:$4 sm:$0xff]  }
 0x7b9   : > { %2095 = vmatpush1.bf16.msra.mxu1 %v5154_v29  ;;  %2126 = vmatprep.mubr.bf16.mxu1 %v5845_v25  ;;  %v5192_v29 = vld [vmem:[%s6285_s5 + $0x4] ss:$16 sps:$4 sm:$0xff]  }
 0x7ba   : > { %2096 = vmatprep.subr.bf16.mxu1 %v5159_v61  ;;  %v5198_v61 = vld [vmem:[%s6285_s5 + $0x24] ss:$16 sps:$4 sm:$0xff]   ;;  %3062 = vmatprep.subr.bf16.mxu0 %v5192_v29  ;;  %v5256_v29 = vld [vmem:[%s6285_s5 + $0x160] ss:$16 sps:$4 sm:$0xff]  }
 0x7bb   : > { %3063 = vmatpush1.bf16.msra.mxu0 %v5190_v58  ;;  %v5261_v58 = vld [vmem:[%s6285_s5 + $0x16c] ss:$16 sps:$4 sm:$0xff]  }
 0x7bc   : > { %3064 = vmatprep.subr.bf16.mxu0 %v5198_v61  ;;  %v5267_v61 = vld [vmem:[%s6285_s5 + $0x18c] ss:$16 sps:$4 sm:$0xff]  }
 0x7bd   : > { %2097 = vmatpush1.bf16.msra.mxu1 %v5157_v62  ;;  %v5201_v62 = vld [vmem:[%s6285_s5 + $0x2c] ss:$16 sps:$4 sm:$0xff]  }
 0x7be   : > { %2098 = vmatprep.subr.bf16.mxu1 %v5162_v63  ;;  %v5196_v63 = vld [vmem:[%s6285_s5 + $0x20] ss:$16 sps:$4 sm:$0xff]  }
 0x7bf   : > { %3065 = vmatpush1.bf16.msra.mxu0 %v5196_v63  ;;  %v5265_v63 = vld [vmem:[%s6285_s5 + $0x188] ss:$16 sps:$4 sm:$0xff]  }
 0x7c1   : > { %2099 = vmatpush1.bf16.msra.mxu1 %v5160_v0  ;;  %v5199_v0 = vld [vmem:[%s6285_s5 + $0x28] ss:$16 sps:$4 sm:$0xff]  }
 0x7c2   : > { %2100 = vmatprep.subr.bf16.mxu1 %v5165_v52  ;;  %v5204_v52 = vld [vmem:[%s6285_s5 + $0x44] ss:$16 sps:$4 sm:$0xff]  }
 0x7c3   : > { %3066 = vmatprep.subr.bf16.mxu0 %v5204_v52  ;;  %v5273_v52 = vld [vmem:[%s6285_s5 + $0x1ac] ss:$16 sps:$4 sm:$0xff]  }
 0x7c5   : > { %2101 = vmatpush1.bf16.msra.mxu1 %v5163_v1  ;;  %v5207_v1 = vld [vmem:[%s6285_s5 + $0x4c] ss:$16 sps:$4 sm:$0xff]  }
 0x7c6   : > { %4840 = vmatprep.subr.bf16.mxu1 %v5841_v37 }
 0x7c8   : > { %4564 = vmatmul.mubr.msk.bf16.vlgmr.msra.gmra.mrb[20].mxu1 %vm1715_vm1, %v1835_v10 }
 0x7c9   : > { %4841 = vmatpush3.bf16.msra.mxu1 %v6483_v19  ;;  %4842 = vmatprep.mubr.msk.bf16.mxu1 %vm5842_vm0, %v5841_v37 }
 0x7ca   : > { %2299 = vmatprep.subr.bf16.mxu1 %v5168_v2  ;;  %v5202_v2 = vld [vmem:[%s6285_s5 + $0x40] ss:$16 sps:$4 sm:$0xff]  }
 0x7cb   : > { %3067 = vmatpush1.bf16.msra.mxu0 %v5202_v2  ;;  %v5271_v2 = vld [vmem:[%s6285_s5 + $0x1a8] ss:$16 sps:$4 sm:$0xff]  }
 0x7d0   : > { %4843 = vmatmul.mubr.msk.bf16.vlgmr.msra.gmra.mrb[24].mxu1 %vm1767_vm10, %v2210_v41 }
 0x7d1   : > { %2300 = vmatpush1.bf16.msra.mxu1 %v5166_v3  ;;  %2331 = vmatprep.mubr.bf16.mxu1 %v5845_v25  ;;  %v5205_v3 = vld [vmem:[%s6285_s5 + $0x48] ss:$16 sps:$4 sm:$0xff]  }
 0x7d2   : > { %2301 = vmatprep.subr.bf16.mxu1 %v5171_v4  ;;  %v5210_v4 = vld [vmem:[%s6285_s5 + $0x64] ss:$16 sps:$4 sm:$0xff]  }
 0x7d3   : > { %3068 = vmatprep.subr.bf16.mxu0 %v5210_v4  ;;  %v5279_v4 = vld [vmem:[%s6285_s5 + $0x1cc] ss:$16 sps:$4 sm:$0xff]  }
 0x7d5   : > { %2302 = vmatpush1.bf16.msra.mxu1 %v5169_v53  ;;  %v5213_v53 = vld [vmem:[%s6285_s5 + $0x6c] ss:$16 sps:$4 sm:$0xff]  }
 0x7d6   : > { %2303 = vmatprep.subr.bf16.mxu1 %v5174_v5  ;;  %v5208_v5 = vld [vmem:[%s6285_s5 + $0x60] ss:$16 sps:$4 sm:$0xff]  }
 0x7d7   : > { %3069 = vmatpush1.bf16.msra.mxu0 %v5208_v5  ;;  %v5277_v5 = vld [vmem:[%s6285_s5 + $0x1c8] ss:$16 sps:$4 sm:$0xff]  }
 0x7d9   : > { %2304 = vmatpush1.bf16.msra.mxu1 %v5172_v8  ;;  %v5211_v8 = vld [vmem:[%s6285_s5 + $0x68] ss:$16 sps:$4 sm:$0xff]  }
 0x7da   : > { %2305 = vmatprep.subr.bf16.mxu1 %v5177_v9  ;;  %v5225_v9 = vld [vmem:[%s6285_s5 + $0xac] ss:$16 sps:$4 sm:$0xff]  }
 0x7dd   : > { %2306 = vmatpush1.bf16.msra.mxu1 %v5175_v11  ;;  %v5220_v11 = vld [vmem:[%s6285_s5 + $0xa0] ss:$16 sps:$4 sm:$0xff]  }
 0x7de   : > { %2518 = vmatprep.subr.bf16.mxu1 %v5180_v12  ;;  %v5223_v12 = vld [vmem:[%s6285_s5 + $0xa8] ss:$16 sps:$4 sm:$0xff]  }
 0x7e8   : > { %v2467_v19 = vpop.f32.mrb[16].mxu0 }
 0x7e9   : > { %v4856_v37 = vpop.f32.mrb[17].mxu0 }
 0x7ea   : > { %v2470_v10 = vpop.f32.mrb[18].mxu0  ;;  %v5219_v37 = vld [vmem:[%s6285_s5 + $0x8c] ss:$16 sps:$4 sm:$0xff]  }
 0x7eb   : > { %v2474_v6 = vpack.c.bf16 %v2470_v10, %v2467_v19  ;;  %v4857_v7 = vpop.f32.mrb[19].mxu0  ;;  %v5216_v19 = vld [vmem:[%s6285_s5 + $0x84] ss:$16 sps:$4 sm:$0xff]   ;;  %v5214_v10 = vld [vmem:[%s6285_s5 + $0x80] ss:$16 sps:$4 sm:$0xff]  }
 0x7ec   : > { %3070 = vmatprep.subr.bf16.mxu0 %v5216_v19  ;;  %v5222_v7 = vld [vmem:[%s6285_s5 + $0xa4] ss:$16 sps:$4 sm:$0xff]   ;;  %v5285_v19 = vld [vmem:[%s6285_s5 + $0x1ec] ss:$16 sps:$4 sm:$0xff]  }
 0x7ed   : > { %3071 = vmatpush1.bf16.msra.mxu0 %v5214_v10  ;;  %v5283_v10 = vld [vmem:[%s6285_s5 + $0x1e8] ss:$16 sps:$4 sm:$0xff]  }
 0x7ee   : > { %3072 = vmatprep.subr.bf16.mxu0 %v5222_v7 }
 0x7f1   : > { %3073 = vmatpush1.bf16.msra.mxu0 %v5220_v11 }
 0x8a3   : > { %v2248_v13 = vpop.f32.mrb[24].mxu1 }
 0x8a4   : > { %v4844_v14 = vpop.f32.mrb[25].mxu1 }
 0x8a5   : > { %v2251_v15 = vpop.f32.mrb[26].mxu1  ;;  %v5231_v14 = vld [vmem:[%s6285_s5 + $0xcc] ss:$16 sps:$4 sm:$0xff]  }
 0x8a6   : > { %v2255_v17 = vpack.c.bf16 %v2251_v15, %v2248_v13  ;;  %v4845_v18 = vpop.f32.mrb[27].mxu1  ;;  %v5228_v13 = vld [vmem:[%s6285_s5 + $0xc4] ss:$16 sps:$4 sm:$0xff]   ;;  %v5226_v15 = vld [vmem:[%s6285_s5 + $0xc0] ss:$16 sps:$4 sm:$0xff]  }
 0x8a7   : > { %3074 = vmatprep.subr.bf16.mxu0 %v5228_v13  ;;  %v5237_v18 = vld [vmem:[%s6285_s5 + $0xec] ss:$16 sps:$4 sm:$0xff]  }
 0x8a8   : > { %4575 = vmatmul.mubr.msk.bf16.vlgmr.msra.gmra.mrb[20].mxu1 %vm1715_vm1, %v2255_v17  ;;  %v5234_v17 = vld [vmem:[%s6285_s5 + $0xe4] ss:$16 sps:$4 sm:$0xff]   ;;  %3075 = vmatpush1.bf16.msra.mxu0 %v5226_v15 }
 0x8a9   : > { %2519 = vmatpush1.bf16.msra.mxu1 %v5178_v16  ;;  %2550 = vmatprep.mubr.bf16.mxu1 %v5845_v25  ;;  %v5229_v16 = vld [vmem:[%s6285_s5 + $0xc8] ss:$16 sps:$4 sm:$0xff]   ;;  %v2622_v15 = vld [vmem:[%s854_s18] sm:$0x3] }
 0x8aa   : > { %2520 = vmatprep.subr.bf16.mxu1 %v5183_v20  ;;  %v5232_v20 = vld [vmem:[%s6285_s5 + $0xe0] ss:$16 sps:$4 sm:$0xff]   ;;  %3076 = vmatprep.subr.bf16.mxu0 %v5234_v17 }
 0x8ac   : > { %3077 = vmatpush1.bf16.msra.mxu0 %v5232_v20  ;;  %v2627_v20 = vrot.slane %v2622_v15, %v6446_v40 }
 0x8ad   : > { %2521 = vmatpush1.bf16.msra.mxu1 %v5181_v21  ;;  %v5235_v21 = vld [vmem:[%s6285_s5 + $0xe8] ss:$16 sps:$4 sm:$0xff]  }
 0x8ae   : > { %2522 = vmatprep.subr.bf16.mxu1 %v5186_v22  ;;  %v5240_v22 = vld [vmem:[%s6285_s5 + $0x104] ss:$16 sps:$4 sm:$0xff]  }
 0x8af   : > { %3078 = vmatprep.subr.bf16.mxu0 %v5240_v22  ;;  %v2638_v22 = vld [vmem:[%s858_s23] sm:$0x3] }
 0x8b1   : > { %2523 = vmatpush1.bf16.msra.mxu1 %v5184_v23  ;;  %v5243_v23 = vld [vmem:[%s6285_s5 + $0x10c] ss:$16 sps:$4 sm:$0xff]  }
 0x8b2   : > { %2524 = vmatprep.subr.bf16.mxu1 %v5189_v24  ;;  %v5238_v24 = vld [vmem:[%s6285_s5 + $0x100] ss:$16 sps:$4 sm:$0xff]  }
 0x8b3   : > { %3079 = vmatpush1.bf16.msra.mxu0 %v5238_v24  ;;  %v2643_v24 = vrot.slane %v2638_v22, %v6446_v40 }
 0x8b5   : > { %2525 = vmatpush1.bf16.msra.mxu1 %v5187_v26  ;;  %v5241_v26 = vld [vmem:[%s6285_s5 + $0x108] ss:$16 sps:$4 sm:$0xff]  }
 0x8b6   : > { %3105 = vmatprep.subr.bf16.mxu1 %v5195_v60  ;;  %v5264_v60 = vld [vmem:[%s6285_s5 + $0x184] ss:$16 sps:$4 sm:$0xff]  }
 0x8b8   : > { %4586 = vmatmul.mubr.msk.bf16.vlgmr.msra.gmra.mrb[20].mxu1 %vm1715_vm1, %v2474_v6  ;;  %v5217_v6 = vld [vmem:[%s6285_s5 + $0x88] ss:$16 sps:$4 sm:$0xff]  }
 0x8b9   : > { %3106 = vmatpush1.bf16.msra.mxu1 %v5193_v59  ;;  %v5259_v59 = vld [vmem:[%s6285_s5 + $0x168] ss:$16 sps:$4 sm:$0xff]  }
 0x8ba   : > { %3107 = vmatprep.subr.bf16.mxu1 %v5201_v62  ;;  %v5262_v62 = vld [vmem:[%s6285_s5 + $0x180] ss:$16 sps:$4 sm:$0xff]  }
 0x8bd   : > { %3108 = vmatpush1.bf16.msra.mxu1 %v5199_v0  ;;  %v5270_v0 = vld [vmem:[%s6285_s5 + $0x1a4] ss:$16 sps:$4 sm:$0xff]  }
 0x8be   : > { %3109 = vmatprep.subr.bf16.mxu1 %v5207_v1  ;;  %v5268_v1 = vld [vmem:[%s6285_s5 + $0x1a0] ss:$16 sps:$4 sm:$0xff]  }
 0x8c1   : > { %3110 = vmatpush1.bf16.msra.mxu1 %v5205_v3  ;;  %v5276_v3 = vld [vmem:[%s6285_s5 + $0x1c4] ss:$16 sps:$4 sm:$0xff]  }
 0x8c2   : > { %3111 = vmatprep.subr.bf16.mxu1 %v5213_v53  ;;  %v5274_v53 = vld [vmem:[%s6285_s5 + $0x1c0] ss:$16 sps:$4 sm:$0xff]  }
 0x8c5   : > { %3112 = vmatpush1.bf16.msra.mxu1 %v5211_v8  ;;  %v5282_v8 = vld [vmem:[%s6285_s5 + $0x1e4] ss:$16 sps:$4 sm:$0xff]  }
 0x8c6   : > { %3113 = vmatprep.subr.bf16.mxu1 %v5219_v37  ;;  %v5280_v37 = vld [vmem:[%s6285_s5 + $0x1e0] ss:$16 sps:$4 sm:$0xff]  }
 0x8c9   : > { %3114 = vmatpush1.bf16.msra.mxu1 %v5217_v6  ;;  %v5288_v6 = vld [vmem:[%s6287_s0 + $0x4] ss:$8 sps:$4 sm:$0xff]  }
 0x8ca   : > { %3115 = vmatprep.subr.bf16.mxu1 %v5225_v9 }
 0x8cd   : > { %3116 = vmatpush1.bf16.msra.mxu1 %v5223_v12 }
 0x8ce   : > { %3117 = vmatprep.subr.bf16.mxu1 %v5231_v14 }
 0x8d1   : > { %3118 = vmatpush1.bf16.msra.mxu1 %v5229_v16 }
 0x8d2   : > { %3119 = vmatprep.subr.bf16.mxu1 %v5237_v18 }
 0x8d5   : > { %3120 = vmatpush1.bf16.msra.mxu1 %v5235_v21  ;;  %v2631_v21 = vrot.slane %v2622_v15, %v6450_v36 }
 0x8d6   : > { %3121 = vmatprep.subr.bf16.mxu1 %v5243_v23 }
 0x8d9   : > { %3122 = vmatpush1.bf16.msra.mxu1 %v5241_v26  ;;  %v2647_v26 = vrot.slane %v2638_v22, %v6450_v36 }
 0x98b   : > { %v2552_v33 = vpop.f32.mrb[20].mxu1 }
 0x98c   : > { %v2577_v38 = vadd.f32 %v2570_v28, %v2552_v33  ;;  %v2554_v41 = vpop.f32.mrb[21].mxu1 }
 0x98d   : > { %v2578_v43 = vadd.f32 %v2574_v30, %v2554_v41  ;;  %v2556_v44 = vpop.f32.mrb[22].mxu1 }
 0x98e   : > { %v6601_v46 = vadd.f32 %v2581_v32, %v2577_v38  ;;  %v2579_v47 = vadd.f32 %v2570_v28, %v2556_v44  ;;  %v2558_v48 = vpop.f32.mrb[23].mxu1 }
 0x98f   : > { %v6603_v49 = vadd.f32 %v2582_v35, %v2578_v43  ;;  %v2580_v50 = vadd.f32 %v2574_v30, %v2558_v48  ;;  %v5244_v48 = vld [vmem:[%s6285_s5 + $0x120] ss:$16 sps:$4 sm:$0xff]  }
 0x990   : > { %v6605_v51 = vadd.f32 %v2583_v42, %v2579_v47  ;;  %v5249_v47 = vld [vmem:[%s6285_s5 + $0x12c] ss:$16 sps:$4 sm:$0xff]  }
 0x991   : > { %v6607_v25 = vadd.f32 %v2584_v45, %v2580_v50  ;;  %v2589_v56 = vadd.f32 %v6603_v49, %v6601_v46  ;;  %3123 = vmatprep.subr.bf16.mxu1 %v5249_v47  ;;  %v5252_v50 = vld [vmem:[%s6285_s5 + $0x144] ss:$16 sps:$4 sm:$0xff]  }
 0x992   : > { %v5294_v47 = vld [vmem:[%s6287_s0 + $0x24] ss:$8 sps:$4 sm:$0xff]  }
 0x993   : > { %2590 = vadd.xlane.f32.xlu1 %v2589_v56  ;;  %v2592_v57 = vadd.f32 %v6607_v25, %v6605_v51  ;;  %v5253_v56 = vld [vmem:[%s6285_s5 + $0x148] ss:$16 sps:$4 sm:$0xff]  }
 0x995   : > { %2593 = vadd.xlane.f32.xlu0 %v2592_v57  ;;  %v5258_v57 = vld [vmem:[%s6285_s5 + $0x164] ss:$16 sps:$4 sm:$0xff]  }
 0xa20   : > { %v2591_v27 = vpop.xlane.xlu1 %2590 }
 0xa21   : > { %v2596_v28 = vmul.f32 0.00390625, %v2591_v27 }
 0xa22   : > { %v2594_v30 = vpop.xlane.xlu0 %2593 }
 0xa23   : > { %v6650_v31 = vsub.f32 %v6601_v46, %v2596_v28  ;;  %v6653_v32 = vsub.f32 %v6603_v49, %v2596_v28  ;;  %v2597_v33 = vmul.f32 0.00390625, %v2594_v30  ;;  %v5246_v46 = vld [vmem:[%s6285_s5 + $0x124] ss:$16 sps:$4 sm:$0xff]   ;;  %v5247_v49 = vld [vmem:[%s6285_s5 + $0x128] ss:$16 sps:$4 sm:$0xff]  }
 0xa24   : > { %3080 = vmatprep.subr.bf16.mxu0 %v5246_v46  ;;  %3124 = vmatpush1.bf16.msra.mxu1 %v5247_v49  ;;  %v5289_v46 = vld [vmem:[%s6287_s0 + $0x10] ss:$8 sps:$4 sm:$0xff]   ;;  %v5297_v49 = vld [vmem:[%s6287_s0 + $0x34] ss:$8 sps:$4 sm:$0xff]  }
 0xa25   : > { %v6656_v34 = vsub.f32 %v6605_v51, %v2597_v33  ;;  %v6659_v35 = vsub.f32 %v6607_v25, %v2597_v33  ;;  %v2602_v38 = vmul.f32 %v6650_v31, %v6650_v31  ;;  %v2603_v41 = vmul.f32 %v6653_v32, %v6653_v32  ;;  %3081 = vmatpush1.bf16.msra.mxu0 %v5244_v48  ;;  %v5255_v51 = vld [vmem:[%s6285_s5 + $0x14c] ss:$16 sps:$4 sm:$0xff]   ;;  %v5250_v25 = vld [vmem:[%s6285_s5 + $0x140] ss:$16 sps:$4 sm:$0xff]  }
 0xa26   : > { %3082 = vmatprep.subr.bf16.mxu0 %v5252_v50  ;;  %3125 = vmatprep.subr.bf16.mxu1 %v5255_v51  ;;  %v5292_v48 = vld [vmem:[%s6287_s0 + $0x20] ss:$8 sps:$4 sm:$0xff]   ;;  %v5295_v50 = vld [vmem:[%s6287_s0 + $0x30] ss:$8 sps:$4 sm:$0xff]   ;;  %v5300_v51 = vld [vmem:[%s6287_s0 + $0x44] ss:$8 sps:$4 sm:$0xff]  }
 0xa27   : > { %v2606_v42 = vadd.f32 %v2603_v41, %v2602_v38  ;;  %v2604_v43 = vmul.f32 %v6656_v34, %v6656_v34  ;;  %v2605_v44 = vmul.f32 %v6659_v35, %v6659_v35 }
 0xa28   : > { %3126 = vmatpush1.bf16.msra.mxu1 %v5253_v56  ;;  %v5303_v56 = vld [vmem:[%s6287_s0 + $0x54] ss:$8 sps:$4 sm:$0xff]  }
 0xa29   : > { %2607 = vadd.xlane.f32.xlu0 %v2606_v42  ;;  %v2609_v45 = vadd.f32 %v2605_v44, %v2604_v43  ;;  %3083 = vmatpush1.bf16.msra.mxu0 %v5250_v25  ;;  %v5286_v44 = vld [vmem:[%s6287_s0] ss:$8 sps:$4 sm:$0xff]  }
 0xa2a   : > { %3084 = vmatprep.subr.bf16.mxu0 %v5258_v57  ;;  %3127 = vmatprep.subr.bf16.mxu1 %v5261_v58  ;;  %v5298_v25 = vld [vmem:[%s6287_s0 + $0x40] ss:$8 sps:$4 sm:$0xff]   ;;  %v5301_v57 = vld [vmem:[%s6287_s0 + $0x50] ss:$8 sps:$4 sm:$0xff]   ;;  %v5306_v58 = vld [vmem:[%s6287_s0 + $0x64] ss:$8 sps:$4 sm:$0xff]  }
 0xa2c   : > { %3128 = vmatpush1.bf16.msra.mxu1 %v5259_v59  ;;  %v5309_v59 = vld [vmem:[%s6287_s0 + $0x74] ss:$8 sps:$4 sm:$0xff]  }
 0xa2d   : > { %2610 = vadd.xlane.f32.xlu0 %v2609_v45  ;;  %3085 = vmatpush1.bf16.msra.mxu0 %v5256_v29  ;;  %v5291_v45 = vld [vmem:[%s6287_s0 + $0x14] ss:$8 sps:$4 sm:$0xff]   ;;  %v5304_v29 = vld [vmem:[%s6287_s0 + $0x60] ss:$8 sps:$4 sm:$0xff]  }
 0xa2e   : > { %3086 = vmatprep.subr.bf16.mxu0 %v5264_v60  ;;  %3129 = vmatprep.subr.bf16.mxu1 %v5267_v61  ;;  %v5307_v60 = vld [vmem:[%s6287_s0 + $0x70] ss:$8 sps:$4 sm:$0xff]   ;;  %v5312_v61 = vld [vmem:[%s6287_s0 + $0x84] ss:$8 sps:$4 sm:$0xff]  }
 0xa30   : > { %3130 = vmatpush1.bf16.msra.mxu1 %v5265_v63  ;;  %v5315_v63 = vld [vmem:[%s6287_s0 + $0x94] ss:$8 sps:$4 sm:$0xff]  }
 0xa31   : > { %3087 = vmatpush1.bf16.msra.mxu0 %v5262_v62  ;;  %3131 = vmatprep.subr.bf16.mxu1 %v5273_v52  ;;  %v5310_v62 = vld [vmem:[%s6287_s0 + $0x80] ss:$8 sps:$4 sm:$0xff]   ;;  %v5318_v52 = vld [vmem:[%s6287_s0 + $0xa4] ss:$8 sps:$4 sm:$0xff]  }
 0xa32   : > { %3088 = vmatprep.subr.bf16.mxu0 %v5270_v0  ;;  %v5313_v0 = vld [vmem:[%s6287_s0 + $0x90] ss:$8 sps:$4 sm:$0xff]  }
 0xa34   : > { %3132 = vmatpush1.bf16.msra.mxu1 %v5271_v2  ;;  %v5321_v2 = vld [vmem:[%s6287_s0 + $0xb4] ss:$8 sps:$4 sm:$0xff]  }
 0xa35   : > { %3089 = vmatpush1.bf16.msra.mxu0 %v5268_v1  ;;  %3133 = vmatprep.subr.bf16.mxu1 %v5279_v4  ;;  %v5316_v1 = vld [vmem:[%s6287_s0 + $0xa0] ss:$8 sps:$4 sm:$0xff]   ;;  %v5324_v4 = vld [vmem:[%s6287_s0 + $0xc4] ss:$8 sps:$4 sm:$0xff]  }
 0xa36   : > { %3090 = vmatprep.subr.bf16.mxu0 %v5276_v3  ;;  %v5319_v3 = vld [vmem:[%s6287_s0 + $0xb0] ss:$8 sps:$4 sm:$0xff]  }
 0xa38   : > { %3134 = vmatpush1.bf16.msra.mxu1 %v5277_v5  ;;  %v5327_v5 = vld [vmem:[%s6287_s0 + $0xd4] ss:$8 sps:$4 sm:$0xff]  }
 0xa39   : > { %3091 = vmatpush1.bf16.msra.mxu0 %v5274_v53  ;;  %3135 = vmatprep.subr.bf16.mxu1 %v5285_v19  ;;  %v5322_v53 = vld [vmem:[%s6287_s0 + $0xc0] ss:$8 sps:$4 sm:$0xff]   ;;  %v5330_v19 = vld [vmem:[%s6287_s0 + $0xe4] ss:$8 sps:$4 sm:$0xff]  }
 0xa3a   : > { %3092 = vmatprep.subr.bf16.mxu0 %v5282_v8  ;;  %v5325_v8 = vld [vmem:[%s6287_s0 + $0xd0] ss:$8 sps:$4 sm:$0xff]  }
 0xa3c   : > { %3136 = vmatpush1.bf16.msra.mxu1 %v5283_v10  ;;  %v5333_v10 = vld [vmem:[%s6287_s0 + $0xf4] ss:$8 sps:$4 sm:$0xff]  }
 0xa3d   : > { %3093 = vmatpush1.bf16.msra.mxu0 %v5280_v37  ;;  %v5328_v37 = vld [vmem:[%s6287_s0 + $0xe0] ss:$8 sps:$4 sm:$0xff]  }
 0xa3e   : > { %3556 = vmatprep.subr.bf16.mxu0 %v5288_v6  ;;  %v5331_v6 = vld [vmem:[%s6287_s0 + $0xf0] ss:$8 sps:$4 sm:$0xff]  }
 0xab6   : > { %v2608_v7 = vpop.xlane.xlu0 %2607 }
 0xab7   : > { %v2612_v9 = vmul.f32 0.00390625, %v2608_v7  ;;  %v5336_v7 = vld [vmem:[%s6287_s0 + $0x104] ss:$8 sps:$4 sm:$0xff]  }
 0xab9   : > { %v2614_v11 = vadd.f32 1e-05, %v2612_v9  ;;  %v2720_v9 = vld [vmem:[%s6320_s17] sm:$0xf] }
 0xaba   : > { %v2611_v12 = vpop.xlane.xlu0 %2610 }
 0xabb   : > { %5414 = vrsqrt.f32 %v2614_v11  ;;  %v2613_v13 = vmul.f32 0.00390625, %v2611_v12  ;;  %v2725_v11 = vrot.slane %v2720_v9, %v6446_v40  ;;  %v2733_v12 = vrot.slane %v2720_v9, %v1004_v54 }
 0xabd   : > { %v2615_v14 = vadd.f32 1e-05, %v2613_v13  ;;  %v2729_v13 = vrot.slane %v2720_v9, %v6450_v36 }
 0xabf   : > { %5416 = vrsqrt.f32 %v2615_v14  ;;  %v2737_v14 = vrot.slane %v2720_v9, %v1008_v55  ;;  %v5375_v9 = vld [vmem:[%s6287_s0 + $0x1d4] ss:$8 sps:$4 sm:$0xff]  }
 0xac5   : > { %v5415_v16 = vpop.eup %5414 }
 0xac6   : > { %v2618_v17 = vmul.f32 %v5415_v16, %v6650_v31  ;;  %v2619_v18 = vmul.f32 %v5415_v16, %v6653_v32 }
 0xac8   : > { %v2635_v30 = vmul.f32 %v2631_v21, %v2619_v18  ;;  %v2634_v31 = vmul.f32 %v2627_v20, %v2618_v17 }
 0xac9   : > { %v5417_v23 = vpop.eup %5416 }
 0xaca   : > { %v2620_v27 = vmul.f32 %v5417_v23, %v6656_v34  ;;  %v2621_v28 = vmul.f32 %v5417_v23, %v6659_v35  ;;  %v6716_v38 = vadd.f32 %v2647_v26, %v2635_v30  ;;  %v6720_v42 = vadd.f32 %v2643_v24, %v2634_v31 }
 0xacc   : > { %v2637_v32 = vmul.f32 %v2631_v21, %v2621_v28  ;;  %v2636_v33 = vmul.f32 %v2627_v20, %v2620_v27 }
 0xace   : > { %v6718_v41 = vadd.f32 %v2647_v26, %v2637_v32  ;;  %v6722_v43 = vadd.f32 %v2643_v24, %v2636_v33 }
 0xad0   : > { %v2655_v34 = vpack.c.bf16 %v6718_v41, %v6716_v38  ;;  %v2654_v35 = vpack.c.bf16 %v6722_v43, %v6720_v42 }
 0xad2   : > { %3094 = vmatprep.mubr.bf16.mxu0 %v2655_v34  ;;  %3137 = vmatprep.mubr.bf16.mxu1 %v2655_v34 }
 0xad3   : > { %3095 = vmatmul.mubr.bf16.vlgmr.msra.gmra.mrb[20].mxu0 %v2654_v35  ;;  %3138 = vmatmul.mubr.bf16.vlgmr.msra.gmra.mrb[28].mxu1 %v2654_v35 }
 0xad4   : > { %3557 = vmatpush1.bf16.msra.mxu0 %v5286_v44 }
 0xad5   : > { %3558 = vmatprep.subr.bf16.mxu0 %v5291_v45 }
 0xad8   : > { %3559 = vmatpush1.bf16.msra.mxu0 %v5289_v46 }
 0xad9   : > { %3560 = vmatprep.subr.bf16.mxu0 %v5294_v47 }
 0xadc   : > { %3561 = vmatpush1.bf16.msra.mxu0 %v5292_v48 }
 0xadd   : > { %3562 = vmatprep.subr.bf16.mxu0 %v5297_v49 }
 0xae0   : > { %3563 = vmatpush1.bf16.msra.mxu0 %v5295_v50 }
 0xae1   : > { %3564 = vmatprep.subr.bf16.mxu0 %v5300_v51  ;;  %v5334_v51 = vld [vmem:[%s6287_s0 + $0x100] ss:$8 sps:$4 sm:$0xff]  }
 0xae4   : > { %3565 = vmatpush1.bf16.msra.mxu0 %v5298_v25  ;;  %v5339_v25 = vld [vmem:[%s6287_s0 + $0x114] ss:$8 sps:$4 sm:$0xff]  }
 0xae5   : > { %3566 = vmatprep.subr.bf16.mxu0 %v5303_v56  ;;  %v5337_v56 = vld [vmem:[%s6287_s0 + $0x110] ss:$8 sps:$4 sm:$0xff]  }
 0xae8   : > { %3567 = vmatpush1.bf16.msra.mxu0 %v5301_v57  ;;  %v5342_v57 = vld [vmem:[%s6287_s0 + $0x124] ss:$8 sps:$4 sm:$0xff]  }
 0xae9   : > { %3568 = vmatprep.subr.bf16.mxu0 %v5306_v58  ;;  %v5340_v58 = vld [vmem:[%s6287_s0 + $0x120] ss:$8 sps:$4 sm:$0xff]  }
 0xaec   : > { %3569 = vmatpush1.bf16.msra.mxu0 %v5304_v29  ;;  %v5345_v29 = vld [vmem:[%s6287_s0 + $0x134] ss:$8 sps:$4 sm:$0xff]  }
 0xaed   : > { %3570 = vmatprep.subr.bf16.mxu0 %v5309_v59  ;;  %v5343_v59 = vld [vmem:[%s6287_s0 + $0x130] ss:$8 sps:$4 sm:$0xff]  }
 0xaf0   : > { %3571 = vmatpush1.bf16.msra.mxu0 %v5307_v60  ;;  %v5348_v60 = vld [vmem:[%s6287_s0 + $0x144] ss:$8 sps:$4 sm:$0xff]  }
 0xaf1   : > { %3572 = vmatprep.subr.bf16.mxu0 %v5312_v61  ;;  %v5346_v61 = vld [vmem:[%s6287_s0 + $0x140] ss:$8 sps:$4 sm:$0xff]  }
 0xaf4   : > { %3573 = vmatpush1.bf16.msra.mxu0 %v5310_v62  ;;  %v5351_v62 = vld [vmem:[%s6287_s0 + $0x154] ss:$8 sps:$4 sm:$0xff]  }
 0xaf5   : > { %3574 = vmatprep.subr.bf16.mxu0 %v5315_v63  ;;  %v5349_v63 = vld [vmem:[%s6287_s0 + $0x150] ss:$8 sps:$4 sm:$0xff]  }
 0xaf8   : > { %3575 = vmatpush1.bf16.msra.mxu0 %v5313_v0  ;;  %v5354_v0 = vld [vmem:[%s6287_s0 + $0x164] ss:$8 sps:$4 sm:$0xff]  }
 0xaf9   : > { %3576 = vmatprep.subr.bf16.mxu0 %v5318_v52  ;;  %v5352_v52 = vld [vmem:[%s6287_s0 + $0x160] ss:$8 sps:$4 sm:$0xff]  }
 0xafc   : > { %3577 = vmatpush1.bf16.msra.mxu0 %v5316_v1  ;;  %v5357_v1 = vld [vmem:[%s6287_s0 + $0x174] ss:$8 sps:$4 sm:$0xff]  }
 0xafd   : > { %3578 = vmatprep.subr.bf16.mxu0 %v5321_v2  ;;  %v5355_v2 = vld [vmem:[%s6287_s0 + $0x170] ss:$8 sps:$4 sm:$0xff]  }
 0xb00   : > { %3579 = vmatpush1.bf16.msra.mxu0 %v5319_v3  ;;  %v5360_v3 = vld [vmem:[%s6287_s0 + $0x184] ss:$8 sps:$4 sm:$0xff]  }
 0xb01   : > { %3580 = vmatprep.subr.bf16.mxu0 %v5324_v4  ;;  %v5358_v4 = vld [vmem:[%s6287_s0 + $0x180] ss:$8 sps:$4 sm:$0xff]  }
 0xb04   : > { %3581 = vmatpush1.bf16.msra.mxu0 %v5322_v53  ;;  %v5363_v53 = vld [vmem:[%s6287_s0 + $0x194] ss:$8 sps:$4 sm:$0xff]  }
 0xb05   : > { %3582 = vmatprep.subr.bf16.mxu0 %v5327_v5  ;;  %v5361_v5 = vld [vmem:[%s6287_s0 + $0x190] ss:$8 sps:$4 sm:$0xff]  }
 0xb08   : > { %3583 = vmatpush1.bf16.msra.mxu0 %v5325_v8  ;;  %v5366_v8 = vld [vmem:[%s6287_s0 + $0x1a4] ss:$8 sps:$4 sm:$0xff]  }
 0xb09   : > { %3584 = vmatprep.subr.bf16.mxu0 %v5330_v19  ;;  %v5364_v19 = vld [vmem:[%s6287_s0 + $0x1a0] ss:$8 sps:$4 sm:$0xff]  }
 0xb0c   : > { %3585 = vmatpush1.bf16.msra.mxu0 %v5328_v37  ;;  %v5369_v37 = vld [vmem:[%s6287_s0 + $0x1b4] ss:$8 sps:$4 sm:$0xff]  }
 0xb0d   : > { %3586 = vmatprep.subr.bf16.mxu0 %v5333_v10  ;;  %v5367_v10 = vld [vmem:[%s6287_s0 + $0x1b0] ss:$8 sps:$4 sm:$0xff]  }
 0xb10   : > { %3587 = vmatpush1.bf16.msra.mxu0 %v5331_v6  ;;  %v5372_v6 = vld [vmem:[%s6287_s0 + $0x1c4] ss:$8 sps:$4 sm:$0xff]  }
 0xb11   : > { %3599 = vmatprep.subr.bf16.mxu0 %v5336_v7  ;;  %v5370_v7 = vld [vmem:[%s6287_s0 + $0x1c0] ss:$8 sps:$4 sm:$0xff]  }
 0xba6   : > { %v3096_v15 = vpop.f32.mrb[20].mxu0  ;;  %v3139_v16 = vpop.f32.mrb[28].mxu1 }
 0xba7   : > { %v3097_v17 = vadd.f32 %v3096_v15, %v2725_v11  ;;  %v3140_v18 = vadd.f32 %v3139_v16, %v2733_v12  ;;  %v3098_v20 = vpop.f32.mrb[21].mxu0  ;;  %v3141_v21 = vpop.f32.mrb[29].mxu1  ;;  %v5379_v15 = vld [vmem:[%s6287_s0 + $0x1f0] ss:$8 sps:$4 sm:$0xff]   ;;  %v3224_v16 = vld [vmem:[%s866_s8] sm:$0x3] }
 0xba8   : > { %v3099_v22 = vadd.f32 %v3098_v20, %v2729_v13  ;;  %v3142_v23 = vadd.f32 %v3141_v21, %v2737_v14  ;;  %v3100_v24 = vpop.f32.mrb[22].mxu0  ;;  %v3143_v26 = vpop.f32.mrb[30].mxu1 }
 0xba9   : > { %v3101_v27 = vadd.f32 %v3100_v24, %v2725_v11  ;;  %v3144_v28 = vadd.f32 %v3143_v26, %v2733_v12  ;;  %v3102_v30 = vpop.f32.mrb[23].mxu0  ;;  %v3145_v54 = vpop.f32.mrb[31].mxu1  ;;  %v3148_v39 = vmax.f32 %v3097_v17, 0.0  ;;  %v3150_v55 = vmax.f32 %v3140_v18, 0.0  ;;  %v5373_v11 = vld [vmem:[%s6287_s0 + $0x1d0] ss:$8 sps:$4 sm:$0xff]  }
 0xbaa   : > { %v3103_v31 = vadd.f32 %v3102_v30, %v2729_v13  ;;  %v3146_v32 = vadd.f32 %v3145_v54, %v2737_v14  ;;  %v3149_v35 = vmax.f32 %v3099_v22, 0.0  ;;  %v3151_v44 = vmax.f32 %v3142_v23, 0.0  ;;  %v5378_v12 = vld [vmem:[%s6287_s0 + $0x1e4] ss:$8 sps:$4 sm:$0xff]   ;;  %v5376_v13 = vld [vmem:[%s6287_s0 + $0x1e0] ss:$8 sps:$4 sm:$0xff]  }
 0xbab   : > { %v3152_v33 = vmax.f32 %v3101_v27, 0.0  ;;  %v3154_v34 = vmax.f32 %v3144_v28, 0.0  ;;  %v5381_v14 = vld [vmem:[%s6287_s0 + $0x1f4] ss:$8 sps:$4 sm:$0xff]   ;;  %v3229_v17 = vrot.slane %v3224_v16, %v6446_v40  ;;  %v3233_v18 = vrot.slane %v3224_v16, %v6450_v36 }
 0xbac   : > { %v3153_v45 = vmax.f32 %v3103_v31, 0.0  ;;  %v3155_v46 = vmax.f32 %v3146_v32, 0.0  ;;  %v5427_v16 = vld [vmem:[#allocation16 + $0x14] ss:$8 sps:$4 sm:$0xff] (!%p4715_p2)  }
 0xbad   : > { %v3156_v47 = vpack.c.bf16 %v3152_v33, %v3148_v39  ;;  %v6767_v48 = vpack.c.bf16 %v3154_v34, %v3150_v55 }
 0xbae   : > { %v3157_v49 = vpack.c.bf16 %v3153_v45, %v3149_v35  ;;  %v3159_v50 = vpack.c.bf16 %v3155_v46, %v3151_v44 }
 0xbb0   : > { %3588 = vmatprep.mubr.bf16.mxu0 %v3157_v49 }
 0xbb1   : > { %3589 = vmatmul.mubr.bf16.vlgmr.msra.gmra.mrb[24].mxu0 %v3156_v47 }
 0xbb2   : > { %3600 = vmatpush1.bf16.msra.mxu0 %v5334_v51  ;;  %3631 = vmatprep.mubr.bf16.mxu0 %v3159_v50 }
 0xbb3   : > { %3601 = vmatprep.subr.bf16.mxu0 %v5339_v25 }
 0xbb6   : > { %3602 = vmatpush1.bf16.msra.mxu0 %v5337_v56 }
 0xbb7   : > { %3603 = vmatprep.subr.bf16.mxu0 %v5342_v57 }
 0xbba   : > { %3604 = vmatpush1.bf16.msra.mxu0 %v5340_v58 }
 0xbbb   : > { %3605 = vmatprep.subr.bf16.mxu0 %v5345_v29 }
 0xbbe   : > { %3606 = vmatpush1.bf16.msra.mxu0 %v5343_v59  ;;  %v3678_v59 = vld [vmem:[%s870_s12] sm:$0x3] }
 0xbbf   : > { %3607 = vmatprep.subr.bf16.mxu0 %v5348_v60 }
 0xbc2   : > { %3608 = vmatpush1.bf16.msra.mxu0 %v5346_v61  ;;  %v3683_v61 = vrot.slane %v3678_v59, %v6446_v40 }
 0xbc3   : > { %3609 = vmatprep.subr.bf16.mxu0 %v5351_v62  ;;  %v3687_v62 = vrot.slane %v3678_v59, %v6450_v36  ;;  %v5468_v59 = vld [vmem:[#allocation16 + $0xe0] ss:$8 sps:$4 sm:$0xff] (!%p4715_p2)  }
 0xbc6   : > { %3610 = vmatpush1.bf16.msra.mxu0 %v5349_v63  ;;  %v3694_v63 = vld [vmem:[%s874_s15] sm:$0x3] }
 0xbc7   : > { %3611 = vmatprep.subr.bf16.mxu0 %v5354_v0 }
 0xbca   : > { %3612 = vmatpush1.bf16.msra.mxu0 %v5352_v52 }
 0xbcb   : > { %3613 = vmatprep.subr.bf16.mxu0 %v5357_v1 }
 0xbce   : > { %3614 = vmatpush1.bf16.msra.mxu0 %v5355_v2  ;;  %v3699_v2 = vrot.slane %v3694_v63, %v6446_v40 }
 0xbcf   : > { %3615 = vmatprep.subr.bf16.mxu0 %v5360_v3  ;;  %v3703_v3 = vrot.slane %v3694_v63, %v6450_v36 }
 0xbd2   : > { %3616 = vmatpush1.bf16.msra.mxu0 %v5358_v4 }
 0xbd3   : > { %3617 = vmatprep.subr.bf16.mxu0 %v5363_v53 }
 0xbd6   : > { %3618 = vmatpush1.bf16.msra.mxu0 %v5361_v5 }
 0xbd7   : > { %3619 = vmatprep.subr.bf16.mxu0 %v5366_v8 }
 0xbda   : > { %3620 = vmatpush1.bf16.msra.mxu0 %v5364_v19 }
 0xbdb   : > { %3621 = vmatprep.subr.bf16.mxu0 %v5369_v37 }
 0xbde   : > { %3622 = vmatpush1.bf16.msra.mxu0 %v5367_v10 }
 0xbdf   : > { %3623 = vmatprep.subr.bf16.mxu0 %v5372_v6 }
 0xbe2   : > { %3624 = vmatpush1.bf16.msra.mxu0 %v5370_v7 }
 0xbe3   : > { %3625 = vmatprep.subr.bf16.mxu0 %v5375_v9 }
 0xbe6   : > { %3626 = vmatpush1.bf16.msra.mxu0 %v5373_v11 }
 0xbe7   : > { %3627 = vmatprep.subr.bf16.mxu0 %v5378_v12 }
 0xbea   : > { %3628 = vmatpush1.bf16.msra.mxu0 %v5376_v13  ;;  %v5424_v13 = vld [vmem:[#allocation16 + $0x4] ss:$8 sps:$4 sm:$0xff] (!%p4715_p2)  }
 0xbeb   : > { %3629 = vmatprep.subr.bf16.mxu0 %v5381_v14 }
 0xbee   : > { %3630 = vmatpush1.bf16.msra.mxu0 %v5379_v15  ;;  %v5426_v15 = vld [vmem:[#allocation16] ss:$8 sps:$4 sm:$0xff] (!%p4715_p2)  }
 0xbef   : > { %3933 = vmatprep.subr.bf16.mxu0 (!%p4715_p2), %v5424_v13 }
 0xbf1   : > { %3632 = vmatmul.mubr.bf16.vlgmr.msra.gmra.mrb[24].mxu0 %v6767_v48 }
 0xbf2   : > { %3934 = vmatpush1.bf16.msra.mxu0 (!%p4715_p2), %v5426_v15 }
 0xbf3   : > { %3935 = vmatprep.subr.bf16.mxu0 (!%p4715_p2), %v5427_v16 }
 0xcc4   : > { %v3633_v20 = vpop.f32.mrb[24].mxu0 }
 0xcc5   : > { %v4858_v21 = vadd.f32 %v3633_v20, %v3229_v17  ;;  %v3635_v22 = vpop.f32.mrb[25].mxu0 }
 0xcc6   : > { %v4859_v23 = vadd.f32 %v3635_v22, %v3233_v18  ;;  %v3637_v24 = vpop.f32.mrb[26].mxu0  ;;  %v5432_v22 = vld [vmem:[#allocation16 + $0x20] ss:$8 sps:$4 sm:$0xff] (!%p4715_p2)  }
 0xcc7   : > { %v3642_v26 = vadd.f32 %v4858_v21, %v6720_v42  ;;  %v4860_v27 = vadd.f32 %v3637_v24, %v3229_v17  ;;  %v3639_v28 = vpop.f32.mrb[27].mxu0  ;;  %v5430_v21 = vld [vmem:[#allocation16 + $0x24] ss:$8 sps:$4 sm:$0xff] (!%p4715_p2)   ;;  %v5435_v24 = vld [vmem:[#allocation16 + $0x30] ss:$8 sps:$4 sm:$0xff] (!%p4715_p2)  }
 0xcc8   : > { %v3643_v30 = vadd.f32 %v4859_v23, %v6716_v38  ;;  %v4861_v54 = vadd.f32 %v3639_v28, %v3233_v18  ;;  %v5429_v18 = vld [vmem:[#allocation16 + $0x10] ss:$8 sps:$4 sm:$0xff] (!%p4715_p2)   ;;  %v5433_v23 = vld [vmem:[#allocation16 + $0x34] ss:$8 sps:$4 sm:$0xff] (!%p4715_p2)  }
 0xcc9   : > { %v3644_v31 = vadd.f32 %v4860_v27, %v6722_v43  ;;  %3936 = vmatpush1.bf16.msra.mxu0 (!%p4715_p2), %v5429_v18  ;;  %v5438_v27 = vld [vmem:[#allocation16 + $0x40] ss:$8 sps:$4 sm:$0xff] (!%p4715_p2)   ;;  %v5439_v28 = vld [vmem:[#allocation16 + $0x54] ss:$8 sps:$4 sm:$0xff] (!%p4715_p2)  }
 0xcca   : > { %v3645_v32 = vadd.f32 %v4861_v54, %v6718_v41  ;;  %v3646_v39 = vadd.f32 %v3643_v30, %v3642_v26  ;;  %3937 = vmatprep.subr.bf16.mxu0 (!%p4715_p2), %v5430_v21  ;;  %v5442_v54 = vld [vmem:[#allocation16 + $0x64] ss:$8 sps:$4 sm:$0xff] (!%p4715_p2)  }
 0xccc   : > { %3647 = vadd.xlane.f32.xlu0 %v3646_v39  ;;  %v3649_v55 = vadd.f32 %v3645_v32, %v3644_v31  ;;  %v5472_v39 = vld [vmem:[#allocation17 + $0x40] sm:$0xff] (!%p4715_p2)  }
 0xccd   : > { %3938 = vmatpush1.bf16.msra.mxu0 (!%p4715_p2), %v5432_v22  ;;  %4788 = vmatprep.subr.bf16.mxu1 (!%p4715_p2), %v5472_v39 }
 0xcce   : > { %3939 = vmatprep.subr.bf16.mxu0 (!%p4715_p2), %v5433_v23 }
 0xcd0   : > { %3650 = vadd.xlane.f32.xlu0 %v3649_v55  ;;  %v5473_v55 = vld [vmem:[#allocation17] sm:$0xff] (!%p4715_p2)  }
 0xcd1   : > { %3940 = vmatpush1.bf16.msra.mxu0 (!%p4715_p2), %v5435_v24  ;;  %4789 = vmatpush3.bf16.msra.mxu1 (!%p4715_p2), %v5473_v55 }
 0xd59   : > { %v3648_v33 = vpop.xlane.xlu0 %3647 }
 0xd5a   : > { %v3652_v34 = vmul.f32 0.00390625, %v3648_v33  ;;  %v5474_v33 = vld [vmem:[#allocation17 + $0x48] sm:$0xff] (!%p4715_p2)  }
 0xd5b   : > { %4790 = vmatprep.subr.bf16.mxu1 (!%p4715_p2), %v5474_v33 }
 0xd5c   : > { %v3654_v35 = vsub.f32 %v3642_v26, %v3652_v34  ;;  %v3655_v44 = vsub.f32 %v3643_v30, %v3652_v34  ;;  %v5436_v26 = vld [vmem:[#allocation16 + $0x44] ss:$8 sps:$4 sm:$0xff] (!%p4715_p2)   ;;  %v5441_v30 = vld [vmem:[#allocation16 + $0x50] ss:$8 sps:$4 sm:$0xff] (!%p4715_p2)  }
 0xd5d   : > { %v3651_v45 = vpop.xlane.xlu0 %3650  ;;  %3941 = vmatprep.subr.bf16.mxu0 (!%p4715_p2), %v5436_v26  ;;  %v5475_v34 = vld [vmem:[#allocation17 + $0x8] sm:$0xff] (!%p4715_p2)  }
 0xd5e   : > { %v3653_v46 = vmul.f32 0.00390625, %v3651_v45  ;;  %v3658_v42 = vmul.f32 %v3654_v35, %v3654_v35  ;;  %v3659_v47 = vmul.f32 %v3655_v44, %v3655_v44  ;;  %3942 = vmatpush1.bf16.msra.mxu0 (!%p4715_p2), %v5438_v27  ;;  %v5448_v45 = vld [vmem:[#allocation16 + $0x84] ss:$8 sps:$4 sm:$0xff] (!%p4715_p2)   ;;  %4791 = vmatpush3.bf16.msra.mxu1 (!%p4715_p2), %v5475_v34 }
 0xd5f   : > { %3943 = vmatprep.subr.bf16.mxu0 (!%p4715_p2), %v5439_v28 }
 0xd60   : > { %v3656_v48 = vsub.f32 %v3644_v31, %v3653_v46  ;;  %v3657_v38 = vsub.f32 %v3645_v32, %v3653_v46  ;;  %v3662_v49 = vadd.f32 %v3659_v47, %v3658_v42  ;;  %v5444_v31 = vld [vmem:[#allocation16 + $0x60] ss:$8 sps:$4 sm:$0xff] (!%p4715_p2)   ;;  %v5445_v32 = vld [vmem:[#allocation16 + $0x74] ss:$8 sps:$4 sm:$0xff] (!%p4715_p2)  }
 0xd61   : > { %v5450_v46 = vld [vmem:[#allocation16 + $0x80] ss:$8 sps:$4 sm:$0xff] (!%p4715_p2)   ;;  %v5477_v42 = vld [vmem:[#allocation17 + $0x10] sm:$0xff] (!%p4715_p2)   ;;  %v5478_v47 = vld [vmem:[#allocation17 + $0x58] sm:$0xff] (!%p4715_p2)  }
 0xd62   : > { %3663 = vadd.xlane.f32.xlu0 %v3662_v49  ;;  %v3660_v43 = vmul.f32 %v3656_v48, %v3656_v48  ;;  %v3661_v41 = vmul.f32 %v3657_v38, %v3657_v38  ;;  %3944 = vmatpush1.bf16.msra.mxu0 (!%p4715_p2), %v5441_v30  ;;  %v5453_v49 = vld [vmem:[#allocation16 + $0x90] ss:$8 sps:$4 sm:$0xff] (!%p4715_p2)  }
 0xd63   : > { %3945 = vmatprep.subr.bf16.mxu0 (!%p4715_p2), %v5442_v54 }
 0xd64   : > { %v3665_v50 = vadd.f32 %v3661_v41, %v3660_v43  ;;  %v5454_v43 = vld [vmem:[#allocation16 + $0xa4] ss:$8 sps:$4 sm:$0xff] (!%p4715_p2)   ;;  %v5456_v41 = vld [vmem:[#allocation16 + $0xa0] ss:$8 sps:$4 sm:$0xff] (!%p4715_p2)  }
 0xd66   : > { %3666 = vadd.xlane.f32.xlu0 %v3665_v50  ;;  %3946 = vmatpush1.bf16.msra.mxu0 (!%p4715_p2), %v5444_v31  ;;  %v5457_v50 = vld [vmem:[#allocation16 + $0xb4] ss:$8 sps:$4 sm:$0xff] (!%p4715_p2)  }
 0xd67   : > { %3947 = vmatprep.subr.bf16.mxu0 (!%p4715_p2), %v5445_v32 }
 0xdef   : > { %v3664_v51 = vpop.xlane.xlu0 %3663 }
 0xdf0   : > { %v3668_v25 = vmul.f32 0.00390625, %v3664_v51  ;;  %v5459_v51 = vld [vmem:[#allocation16 + $0xb0] ss:$8 sps:$4 sm:$0xff] (!%p4715_p2)  }
 0xdf2   : > { %v3670_v56 = vadd.f32 1e-05, %v3668_v25  ;;  %v5460_v25 = vld [vmem:[#allocation16 + $0xc4] ss:$8 sps:$4 sm:$0xff] (!%p4715_p2)  }
 0xdf3   : > { %v3667_v57 = vpop.xlane.xlu0 %3666 }
 0xdf4   : > { %5418 = vrsqrt.f32 %v3670_v56  ;;  %v3669_v58 = vmul.f32 0.00390625, %v3667_v57  ;;  %v5462_v56 = vld [vmem:[#allocation16 + $0xc0] ss:$8 sps:$4 sm:$0xff] (!%p4715_p2)   ;;  %v5463_v57 = vld [vmem:[#allocation16 + $0xd4] ss:$8 sps:$4 sm:$0xff] (!%p4715_p2)  }
 0xdf6   : > { %v3671_v29 = vadd.f32 1e-05, %v3669_v58  ;;  %v5465_v58 = vld [vmem:[#allocation16 + $0xd0] ss:$8 sps:$4 sm:$0xff] (!%p4715_p2)  }
 0xdf8   : > { %5420 = vrsqrt.f32 %v3671_v29  ;;  %v5466_v29 = vld [vmem:[#allocation16 + $0xe4] ss:$8 sps:$4 sm:$0xff] (!%p4715_p2)  }
 0xdfe   : > { %v5419_v60 = vpop.eup %5418 }
 0xdff   : > { %v3674_v0 = vmul.f32 %v5419_v60, %v3654_v35  ;;  %v3675_v52 = vmul.f32 %v5419_v60, %v3655_v44  ;;  %v5476_v35 = vld [vmem:[#allocation17 + $0x50] sm:$0xff] (!%p4715_p2)  }
 0xe00   : > { %v5447_v44 = vld [vmem:[#allocation16 + $0x70] ss:$8 sps:$4 sm:$0xff] (!%p4715_p2)   ;;  %4792 = vmatprep.subr.bf16.mxu1 (!%p4715_p2), %v5476_v35 }
 0xe01   : > { %v3690_v4 = vmul.f32 %v3683_v61, %v3674_v0  ;;  %v3691_v53 = vmul.f32 %v3687_v62, %v3675_v52  ;;  %3948 = vmatpush1.bf16.msra.mxu0 (!%p4715_p2), %v5447_v44  ;;  %4793 = vmatpush3.bf16.msra.mxu1 (!%p4715_p2), %v5477_v42  ;;  %v5480_v52 = vld [vmem:[#allocation17 + $0x60] sm:$0xff] (!%p4715_p2)  }
 0xe02   : > { %v5421_v1 = vpop.eup %5420  ;;  %3949 = vmatprep.subr.bf16.mxu0 (!%p4715_p2), %v5448_v45  ;;  %4794 = vmatprep.subr.bf16.mxu1 (!%p4715_p2), %v5478_v47 }
 0xe03   : > { %v3676_v5 = vmul.f32 %v5421_v1, %v3656_v48  ;;  %v3677_v8 = vmul.f32 %v5421_v1, %v3657_v38  ;;  %v6826_v10 = vadd.f32 %v3699_v2, %v3690_v4  ;;  %v3707_v6 = vadd.f32 %v3703_v3, %v3691_v53  ;;  %v5451_v48 = vld [vmem:[#allocation16 + $0x94] ss:$8 sps:$4 sm:$0xff] (!%p4715_p2)   ;;  %v5481_v1 = vld [vmem:[#allocation17 + $0x20] sm:$0xff] (!%p4715_p2)  }
 0xe04   : > { %v5479_v38 = vld [vmem:[#allocation17 + $0x18] sm:$0xff] (!%p4715_p2)   ;;  %v5484_v4 = vld [vmem:[#allocation17 + $0x70] sm:$0xff] (!%p4715_p2)  }
 0xe05   : > { %v3692_v19 = vmul.f32 %v3683_v61, %v3676_v5  ;;  %v3693_v37 = vmul.f32 %v3687_v62, %v3677_v8  ;;  %3717 = sbr.rel (%p4715_p2) target bundleno = 4067 (0xfe3), region = 128  ;;  %3950 = vmatpush1.bf16.msra.mxu0 (!%p4715_p2), %v5450_v46  ;;  %4795 = vmatpush3.bf16.msra.mxu1 (!%p4715_p2), %v5479_v38  ;;  %v5469_v61 = vld [vmem:[#allocation16 + $0xf4] ss:$8 sps:$4 sm:$0xff] (!%p4715_p2)   ;;  %v5471_v62 = vld [vmem:[#allocation16 + $0xf0] ss:$8 sps:$4 sm:$0xff] (!%p4715_p2)  }
 0xe06   : > { %3951 = vmatprep.subr.bf16.mxu0 (!%p4715_p2), %v5451_v48  ;;  %4796 = vmatprep.subr.bf16.mxu1 (!%p4715_p2), %v5480_v52  ;;  %v5485_v53 = vld [vmem:[#allocation17 + $0x30] sm:$0xff] (!%p4715_p2)   ;;  %v5486_v5 = vld [vmem:[#allocation17 + $0x78] sm:$0xff] (!%p4715_p2)  }
 0xe07   : > { %v6828_v7 = vadd.f32 %v3699_v2, %v3692_v19  ;;  %v3709_v9 = vadd.f32 %v3703_v3, %v3693_v37  ;;  %v5482_v2 = vld [vmem:[#allocation17 + $0x68] sm:$0xff] (!%p4715_p2)   ;;  %v5487_v8 = vld [vmem:[#allocation17 + $0x38] sm:$0xff] (!%p4715_p2)   ;;  %v3761_v19 = vld [vmem:[%s6999_s4] sm:$0x3] (!%p4715_p2) }
 0xe08   : > { %v5483_v3 = vld [vmem:[#allocation17 + $0x28] sm:$0xff] (!%p4715_p2)   ;;  %v3766_v37 = vrot.slane (!%p4715_p2), %v3761_v19, %v6446_v40  ;;  %v4748_v40 = vld [vmem:[%s7000_s3] ss:$0 sm:$0xff] (!%p4715_p2) }
 0xe09   : > { %v3710_v11 = vpack.c.bf16 %v6828_v7, %v6826_v10  ;;  %v3711_v12 = vpack.c.bf16 %v3709_v9, %v3707_v6  ;;  %v3721_v14 = vrot.slane (!%p4715_p2), %v3709_v9, 7  ;;  %3952 = vmatpush1.bf16.msra.mxu0 (!%p4715_p2), %v5453_v49  ;;  %v3720_v60 = vrot.slane (!%p4715_p2), %v6828_v7, 7  ;;  %4797 = vmatpush3.bf16.msra.mxu1 (!%p4715_p2), %v5481_v1 }
 0xe0a   : > { %3953 = vmatprep.subr.bf16.mxu0 (!%p4715_p2), %v5454_v43  ;;  %4798 = vmatprep.subr.bf16.mxu1 (!%p4715_p2), %v5482_v2 }
 0xe0b   : > { %3712 = vst [vmem:[#allocation2] sm:$0xff] %v3710_v11  ;;  %3713 = vst [vmem:[#allocation2 + $0x8] sm:$0xff] %v3711_v12  ;;  %v3726_v17 = vsel (!%p4715_p2), %vm3724_vm11, %v3707_v6, %v3721_v14  ;;  %v3725_v63 = vsel (!%p4715_p2), %vm3724_vm11, %v6826_v10, %v3720_v60  ;;  %v3770_v10 = vrot.slane (!%p4715_p2), %v3761_v19, %v6450_v36 }
 0xe0c   : > { %v3728_v20 = vpack.c.bf16 %v3726_v17, %v3726_v17  ;;  %v3727_v0 = vpack.c.bf16 %v3725_v63, %v3725_v63 }
 0xe0d   : > { %3954 = vmatpush1.bf16.msra.mxu0 %v5456_v41  ;;  %4799 = vmatpush3.bf16.msra.mxu1 %v5483_v3 }
 0xe0e   : > { %3965 = vmatprep.mubr.bf16.mxu0 %v3728_v20  ;;  %3955 = vmatprep.subr.bf16.mxu0 %v5457_v50 }
 0xe0f   : > { %4800 = vmatprep.subr.bf16.mxu1 %v5484_v4 }
 0xe11   : > { %3956 = vmatpush1.bf16.msra.mxu0 %v5459_v51  ;;  %4801 = vmatpush3.bf16.msra.mxu1 %v5485_v53 }
 0xe12   : > { %3957 = vmatprep.subr.bf16.mxu0 %v5460_v25  ;;  %4802 = vmatprep.subr.bf16.mxu1 %v5486_v5 }
 0xe15   : > { %3958 = vmatpush1.bf16.msra.mxu0 %v5462_v56  ;;  %4803 = vmatpush3.bf16.msra.mxu1 %v5487_v8 }
 0xe16   : > { %3959 = vmatprep.subr.bf16.mxu0 %v5463_v57 }
 0xe19   : > { %3960 = vmatpush1.bf16.msra.mxu0 %v5465_v58 }
 0xe1a   : > { %3961 = vmatprep.subr.bf16.mxu0 %v5466_v29 }
 0xe1d   : > { %3962 = vmatpush1.bf16.msra.mxu0 %v5468_v59 }
 0xe1e   : > { %3963 = vmatprep.subr.bf16.mxu0 %v5469_v61 }
 0xe21   : > { %3964 = vmatpush1.bf16.msra.mxu0 %v5471_v62 }
 0xe24   : > { %3966 = vmatmul.mubr.bf16.vlgmr.msra.gmra.mrb[0].mxu0 %v3727_v0 }
 0xef7   : > { %v3967_v6 = vpop.f32.mrb[0].mxu0 }
 0xef8   : > { %v3968_v7 = vadd.f32 %v3967_v6, %v3766_v37  ;;  %v3969_v9 = vpop.f32.mrb[1].mxu0 }
 0xef9   : > { %v3970_v11 = vadd.f32 %v3969_v9, %v3770_v10  ;;  %v3971_v12 = vpop.f32.mrb[2].mxu0 }
 0xefa   : > { %5488 = vtanh.f32 %v3968_v7  ;;  %v3972_v13 = vpop.f32.mrb[3].mxu0 }
 0xefb   : > { %5490 = vtanh.f32 %v3970_v11 }
 0xf04   : > { %v5489_v14 = vpop.eup %5488 }
 0xf05   : > { %v5491_v15 = vpop.eup %5490  ;;  %v3976_v17 = vpack.c.bf16 %v5489_v14, %v5489_v14 }
 0xf06   : > { %v3977_v16 = vpack.c.bf16 %v5491_v15, %v5491_v15 }
 0xf08   : > { %4145 = vmatprep.mubr.bf16.mxu1 %v3977_v16 }
 0xf09   : > { %4146 = vmatmul.mubr.bf16.vlgmr.msra.gmra.mrb[0].mxu1 %v3976_v17 }
 0xfdc   : > { %v4804_v18 = vpop.f32.mrb[0].mxu1 }
 0xfdd   : > { %v4805_v36 = vpop.f32.mrb[1].mxu1 }
 0xfde   : > { %v4806_v20 = vadd.f32 %v4805_v36, %v4804_v18  ;;  %v4807_v21 = vpop.f32.mrb[2].mxu1 }
 0xfdf   : > { %v4808_v22 = vpop.f32.mrb[3].mxu1 }
 0xfe0   : > { %v4148_v23 = vadd.f32 %v4806_v20, %v4748_v40 }
 0xfe2   : > { %4153 = vst [vmem:[#allocation19] sm:$0x3] %v4148_v23 }
 0xfe3 PF: > { %p4943_p1 = scmp.eq.s32.totalorder %s5973_s25, 1  ;;  %s5846_s10 = smov [#allocation19]  }
 0xfe4   : > { %s4161_s22 = sshll.u32 %s5846_s10, 4  ;;  %s4162_s22 = int_to_ptr.vmem [resolvable:$true] %s4161_s22 }
 0xfe5   : > { %s5736_s9 = scalar_lea.vmem %s4162_s22, 32  ;;  %p5743_p4 = scmp.lt.s32.totalorder %s4162_s22, %s4162_s22 }
 0xfe6   : > { %p5737_p9 = scmp.ne.s32.totalorder %s4162_s22, %s5736_s9  ;;  %p5744_p13 = scmp.lt.s32.totalorder %s5736_s9, %s5736_s9 }
 0xfe8   : > { %p5738_p10 = pnand %p5737_p9, %p4943_p1  ;;  %p5745_p7 = por %p5744_p13, %p5743_p4 }
 0xfea   : > { %p5739_p0 = pneg %p5738_p10 }
 0xfec   : > { %p5746_p8 = pnand %p5745_p7, %p5739_p0 }
 0xfee   : > { %5749 = shalt.err (!%p5746_p8)
}
 0xfef   : > { %s7001_s28 = sld [smem:[#allocation49_spill]] }
 0xff5   : > { %s5750_s29 = scalar_lea.hbm %s7001_s28, 32 }
 0xff6   : > { %p5751_p3 = scmp.ne.s32.totalorder %s7001_s28, %s5750_s29  ;;  %p5756_p5 = scmp.lt.u32.totalorder %s5750_s29, %s7001_s28 }
 0xff8   : > { %p5752_p11 = pnand %p5751_p3, %p4943_p1 }
 0xffa   : > { %p5753_p12 = pneg %p5752_p11 }
 0xffc   : > { %p5758_p6 = pnand %p5756_p5, %p5753_p12 }
 0xffe   : > { %5761 = shalt.err (!%p5758_p6)
}
 0xfff   : > { %4907 = dma.vmem_to_hbm [thread:$0]  (%p4943_p1), %s4162_s22, 32, %s7001_s28, [#allocation7]  }
0x1000   : > { %5805 = dma.done.wait (%p4943_p1), [#allocation7], 32  }
0x1001   : > { %5807 = vsyncadd (%p4943_p1), [#allocation7], 4294967264 }
0x1002 PF: > { %s7002_s24 = sld [smem:[#allocation29_spill]]  ;;  %s7003_s18 = sld [smem:[#allocation28_spill]] }
0x1003   : > { %s7004_s23 = sld [smem:[#allocation30_spill]]  ;;  %s7005_s12 = smov %s5814_s2 }
0x1008   : > { %p41_p2 = scmp.ge.s32.totalorder %s7002_s24, 4   ;;  %s7006_s2 = smov %s7003_s18 }
0x100a   :  { %43 = sbr.rel (!%p41_p2) target bundleno = 35 (0x23), region = 215 }
0x1011   :  { %4174 = vsyncpa [#allocation6], 1 }
0x1012   :  { %4176 = vsyncpa [#allocation6 + $0x1], 1 }
0x1013   :  { %4177 = vsyncpa [#allocation9], 1 }
0x1014   :  { %4179 = vsyncpa [#allocation9 + $0x1], 1 }
0x1015   :  { %4180 = vsyncpa [#allocation12], 1 }
0x1016   :  { %4182 = vsyncpa [#allocation12 + $0x1], 1 }
0x1017   :  { %4183 = vsyncpa [#allocation15], 1 }
0x1018   :  { %4185 = vsyncpa [#allocation15 + $0x1], 1 }
0x1019   :  { %4186 = vsyncpa [#allocation18], 1 }
0x101a   :  { %4187 = vsyncpa [#allocation7], 1 }
0x101b   :  { %4189 = vsyncpa [#allocation7 + $0x1], 1 }

</bundles_post_ra>
